<compile_context>
chip_gen: v6e
topology: v6e:2x2x1
jax: 0.10.0
libtpu: 0.0.40
codegen_flags: <defaults>
</compile_context>

<pallas_src>
import math
import functools

import jax
import jax.numpy as jnp
import numpy as np
from jax.experimental import pallas as pl
from jax.experimental.pallas import tpu as pltpu


# ----------------------------- kernel helpers ------------------------------ #

def _layernorm(h, gamma, beta, eps=1e-5):
    # torch.nn.LayerNorm over the last dim (biased variance), eps=1e-5. fp32.
    mu = jnp.mean(h, axis=-1, keepdims=True)
    var = jnp.mean((h - mu) ** 2, axis=-1, keepdims=True)
    return (h - mu) * jax.lax.rsqrt(var + eps) * gamma + beta


def _split_heads(x2d, head_dim):
    """(S, n*H*hd) -> (n*H, S, hd): reshape + leading-dim permute.

    The lane (minor) dim stays hd; only the two major dims swap, so there is no
    full-width activation transpose through the XLU.
    """
    s = x2d.shape[0]
    return x2d.reshape(s, -1, head_dim).transpose(1, 0, 2)


# score matmul: (H, Sq, hd) x (H, Sk, hd), contracting hd (last-vs-last)
_QK_DIMS = (((2,), (2,)), ((0,), (0,)))
# PV matmul:   (H, Sq, bk) x (H, bk, hd)
_PV_DIMS = (((2,), (1,)), ((0,), (0,)))


def _mha(q, k, v, wo, bo, *, causal, kv_block):
    """Multi-head attention for one batch element, online softmax over kv chunks.

    q:  (H, Sq, hd) bf16, already scaled by 1/sqrt(hd) (folded into Wq)
    k:  (H, Sk, hd) bf16
    v:  (H, Sk, hd) bf16
    wo: (D, D)      bf16  (output projection)
    bo: (1, D)      f32
    returns (Sq, D) f32
    """
    num_heads, sq, hd = q.shape
    sk = k.shape[1]
    bk = min(kv_block, sk)

    m = jnp.full((num_heads, sq, 1), -jnp.inf, jnp.float32)
    l = jnp.zeros((num_heads, sq, 1), jnp.float32)
    acc = jnp.zeros((num_heads, sq, hd), jnp.float32)

    # Static chunk loop: one iteration at demo sizes; at large Sk it bounds the
    # live score tensor to (H, Sq, bk) instead of a dense (H, Sq, Sk).
    for c0 in range(0, sk, bk):
        c1 = min(c0 + bk, sk)
        k_c = k[:, c0:c1, :]                                         # (H,bc,hd)
        v_c = v[:, c0:c1, :]
        s = jax.lax.dot_general(q, k_c, _QK_DIMS,
                                preferred_element_type=jnp.float32)  # (H,Sq,bc)
        if causal:
            # single (Sq, bc) iota pair, broadcast over heads; the diagonal is
            # always unmasked in the first chunk -> no 0/0 NaN.
            row = jax.lax.broadcasted_iota(jnp.int32, (sq, c1 - c0), 0)
            col = c0 + jax.lax.broadcasted_iota(jnp.int32, (sq, c1 - c0), 1)
            s = jnp.where((col <= row)[None], s, -jnp.inf)
        m_new = jnp.maximum(m, jnp.max(s, axis=-1, keepdims=True))
        alpha = jnp.exp(m - m_new)
        p = jnp.exp(s - m_new)
        l = alpha * l + jnp.sum(p, axis=-1, keepdims=True)
        acc = alpha * acc + jax.lax.dot_general(
            p.astype(v_c.dtype), v_c, _PV_DIMS,
            preferred_element_type=jnp.float32)                      # (H,Sq,hd)
        m = m_new

    ctx = acc * pl.reciprocal(l, approx=True)                        # (H,Sq,hd)
    # merge heads (leading-dim permute + reshape) -> ONE K=D output projection
    ctx = ctx.transpose(1, 0, 2).reshape(sq, num_heads * hd)         # (Sq, D)
    return jnp.dot(ctx.astype(wo.dtype), wo,
                   preferred_element_type=jnp.float32) + bo          # (Sq, D)


# ------------------------------ fused kernel ------------------------------- #

def decoder_block_kernel(
    x_ref, mem_ref,
    g1_ref, be1_ref, wqkv1_ref, bqkv1_ref, wo1_ref, bo1_ref,
    g2_ref, be2_ref, wq2_ref, bq2_ref, wkv2_ref, bkv2_ref, wo2_ref, bo2_ref,
    g3_ref, be3_ref, wf1_ref, bf1_ref, wf2_ref, bf2_ref,
    out_ref, *, num_heads, kv_block,
):
    cdt = jnp.bfloat16               # MXU operand dtype; fp32 accumulation
    x = x_ref[0]                     # (S, D)  fp32 residual stream
    mem = mem_ref[0]                 # (Sk, D) fp32 encoder memory
    S, D = x.shape
    hd = D // num_heads

    # --- sublayer 1: causal self-attention (pre-LN) + residual -------------
    h = _layernorm(x, g1_ref[...], be1_ref[...]).astype(cdt)
    qkv = jnp.dot(h, wqkv1_ref[...],
                  preferred_element_type=jnp.float32) + bqkv1_ref[...]   # (S,3D)
    qkv_h = _split_heads(qkv, hd).astype(cdt)                            # (3H,S,hd)
    x = x + _mha(qkv_h[:num_heads], qkv_h[num_heads:2 * num_heads],
                 qkv_h[2 * num_heads:], wo1_ref[...], bo1_ref[...],
                 causal=True, kv_block=kv_block)

    # --- sublayer 2: cross-attention over encoder memory + residual --------
    h = _layernorm(x, g2_ref[...], be2_ref[...]).astype(cdt)
    q = jnp.dot(h, wq2_ref[...],
                preferred_element_type=jnp.float32) + bq2_ref[...]       # (S, D)
    kv = jnp.dot(mem.astype(cdt), wkv2_ref[...],
                 preferred_element_type=jnp.float32) + bkv2_ref[...]     # (Sk,2D)
    qh = _split_heads(q, hd).astype(cdt)                                 # (H,S,hd)
    kv_h = _split_heads(kv, hd).astype(cdt)                              # (2H,Sk,hd)
    x = x + _mha(qh, kv_h[:num_heads], kv_h[num_heads:],
                 wo2_ref[...], bo2_ref[...], causal=False, kv_block=kv_block)

    # --- sublayer 3: feed-forward (Linear -> ReLU -> Linear) + residual ----
    h = _layernorm(x, g3_ref[...], be3_ref[...]).astype(cdt)
    h = jnp.maximum(
        jnp.dot(h, wf1_ref[...], preferred_element_type=jnp.float32)
        + bf1_ref[...], 0.0)
    x = x + jnp.dot(h.astype(cdt), wf2_ref[...],
                    preferred_element_type=jnp.float32) + bf2_ref[...]

    out_ref[0] = x.astype(out_ref.dtype)


# --------------------------------- wrapper ---------------------------------- #

def _vmem_limit_bytes():
    # Generation-aware limit with headroom for compiler scratch / semaphores
    # (v7x: 64 MiB physical -> ~54 MiB; v5e/v6e: 128 MiB -> ~108 MiB).
    try:
        cap = pltpu.get_tpu_info().vmem_capacity_bytes
    except Exception:
        return None
    return int(cap * 0.85)


def gpt_decoder_block(x, memory, params, num_heads, kv_block=512):
    B, S, D = x.shape
    hd = D // num_heads
    scale = 1.0 / math.sqrt(hd)
    cdt = jnp.bfloat16
    p = params

    # Host-side weight prep (cheap O(D^2), constant under jit):
    #  * fused QKV / KV projection weights, 1/sqrt(hd) folded into Wq / bq,
    #  * matmul weights cast to bf16 (fp32 accumulation in-kernel),
    #  * biases and LayerNorm params kept fp32.
    weights = [
        p["g1"], p["be1"],
        jnp.concatenate([p["wq1"] * scale, p["wk1"], p["wv1"]], axis=1).astype(cdt),
        jnp.concatenate([p["bq1"] * scale, p["bk1"], p["bv1"]], axis=1),
        p["wo1"].astype(cdt), p["bo1"],
        p["g2"], p["be2"],
        (p["wq2"] * scale).astype(cdt), p["bq2"] * scale,
        jnp.concatenate([p["wk2"], p["wv2"]], axis=1).astype(cdt),
        jnp.concatenate([p["bk2"], p["bv2"]], axis=1),
        p["wo2"].astype(cdt), p["bo2"],
        p["g3"], p["be3"],
        p["wf1"].astype(cdt), p["bf1"], p["wf2"].astype(cdt), p["bf2"],
    ]

    kernel = functools.partial(decoder_block_kernel,
                               num_heads=num_heads, kv_block=kv_block)

    def build_and_run(weight_mode):
        def weight_spec(arr):
            nd = arr.ndim
            # whole grid-invariant weight block; constant index map across b
            return pl.BlockSpec(arr.shape, lambda b: (0,) * nd,
                                pipeline_mode=weight_mode)

        in_specs = (
            [pl.BlockSpec((1, S, D), lambda b: (b, 0, 0)),
             pl.BlockSpec((1, memory.shape[1], D), lambda b: (b, 0, 0))]
            + [weight_spec(w) for w in weights]
        )
        return pl.pallas_call(
            kernel,
            out_shape=jax.ShapeDtypeStruct((B, S, D), x.dtype),
            grid=(B,),
            in_specs=in_specs,
            out_specs=pl.BlockSpec((1, S, D), lambda b: (b, 0, 0)),
            compiler_params=pltpu.CompilerParams(
                dimension_semantics=("parallel",),
                vmem_limit_bytes=_vmem_limit_bytes(),
            ),
        )(x, memory, *weights)

    try:
        # Single-buffer the grid-invariant weights (no re-DMA across grid steps
        # since their index_map is constant) -> halves their VMEM footprint.
        return jax.block_until_ready(build_and_run(pl.Buffered(1)))
    except Exception:
        # Fallback for JAX versions without pipeline_mode single-buffering.
        return build_and_run(None)


# ------------------------- deterministic parameters ------------------------ #

def xavier_uniform(key, fan_in, fan_out):
    bound = math.sqrt(6.0 / (fan_in + fan_out))
    return jax.random.uniform(key, (fan_in, fan_out), jnp.float32, -bound, bound)


def init_params(key, input_dim, dim_feedforward):
    D, F = input_dim, dim_feedforward
    ks = jax.random.split(key, 10)
    p = {}
    # LayerNorms: weight=1, bias=0 (torch default)
    for n in ("1", "2", "3"):
        p[f"g{n}"] = jnp.ones((1, D), jnp.float32)
        p[f"be{n}"] = jnp.zeros((1, D), jnp.float32)
    # self-attn projections (xavier_uniform weights, zero biases)
    for i, name in enumerate(("q1", "k1", "v1", "o1")):
        p[f"w{name}"] = xavier_uniform(ks[i], D, D)
        p[f"b{name}"] = jnp.zeros((1, D), jnp.float32)
    # cross-attn projections
    for i, name in enumerate(("q2", "k2", "v2", "o2")):
        p[f"w{name}"] = xavier_uniform(ks[4 + i], D, D)
        p[f"b{name}"] = jnp.zeros((1, D), jnp.float32)
    # feed-forward (torch default Linear init: U(-1/sqrt(fan_in), 1/sqrt(fan_in)))
    b1 = 1.0 / math.sqrt(D)
    p["wf1"] = jax.random.uniform(ks[8], (D, F), jnp.float32, -b1, b1)
    p["bf1"] = jnp.zeros((1, F), jnp.float32)
    b2 = 1.0 / math.sqrt(F)
    p["wf2"] = jax.random.uniform(ks[9], (F, D), jnp.float32, -b2, b2)
    p["bf2"] = jnp.zeros((1, D), jnp.float32)
    return p


# ----------------------------- pure-JAX reference --------------------------- #

def _ref_ln(x, g, b, eps=1e-5):
    mu = x.mean(-1, keepdims=True)
    var = ((x - mu) ** 2).mean(-1, keepdims=True)
    return (x - mu) / jnp.sqrt(var + eps) * g + b


def _ref_mha(q_in, kv_in, p, pre, num_heads, causal):
    B, S, D = q_in.shape
    hd = D // num_heads
    q = q_in @ p[f"wq{pre}"] + p[f"bq{pre}"]
    k = kv_in @ p[f"wk{pre}"] + p[f"bk{pre}"]
    v = kv_in @ p[f"wv{pre}"] + p[f"bv{pre}"]
    q = q.reshape(B, S, num_heads, hd).transpose(0, 2, 1, 3)
    k = k.reshape(B, S, num_heads, hd).transpose(0, 2, 1, 3)
    v = v.reshape(B, S, num_heads, hd).transpose(0, 2, 1, 3)
    s = jnp.einsum("bhqd,bhkd->bhqk", q, k) / math.sqrt(hd)
    if causal:
        mask = jnp.tril(jnp.ones((S, S), bool))
        s = jnp.where(mask, s, -jnp.inf)
    a = jax.nn.softmax(s, axis=-1)
    ctx = jnp.einsum("bhqk,bhkd->bhqd", a, v).transpose(0, 2, 1, 3).reshape(B, S, D)
    return ctx @ p[f"wo{pre}"] + p[f"bo{pre}"]


def reference(x, mem, p, num_heads):
    h = _ref_ln(x, p["g1"], p["be1"])
    x = x + _ref_mha(h, h, p, "1", num_heads, causal=True)
    h = _ref_ln(x, p["g2"], p["be2"])
    x = x + _ref_mha(h, mem, p, "2", num_heads, causal=False)
    h = _ref_ln(x, p["g3"], p["be3"])
    h = jnp.maximum(h @ p["wf1"] + p["bf1"], 0.0) @ p["wf2"] + p["bf2"]
    return x + h


# ---------------------------------- main ----------------------------------- #

if __name__ == "__main__":
    B, S, D = 2, 8, 32       # batch, seq, embed
    num_heads = 4
    dim_feedforward = 128

    key = jax.random.PRNGKey(0)
    kx, km, kp = jax.random.split(key, 3)
    x = jax.random.normal(kx, (B, S, D), jnp.float32)
    memory = jax.random.normal(km, (B, S, D), jnp.float32)
    params = init_params(kp, D, dim_feedforward)

    out = gpt_decoder_block(x, memory, params, num_heads)
    out = jax.block_until_ready(out)

    ref = jax.block_until_ready(reference(x, memory, params, num_heads))
    # bf16 matmul operands + approx reciprocal => looser tolerance vs fp32 ref
    np.testing.assert_allclose(np.asarray(out), np.asarray(ref), rtol=5e-2, atol=5e-2)

    print("KERNEL_OK")
</pallas_src>

<mosaic_0001>
module attributes {stable_mosaic.version = 11 : i64} {
  func.func @decoder_block_kernel(%arg0: i32, %arg1: memref<1x8x32xf32, #tpu.memory_space<vmem>>, %arg2: memref<1x8x32xf32, #tpu.memory_space<vmem>>, %arg3: memref<1x32xf32, #tpu.memory_space<vmem>>, %arg4: memref<1x32xf32, #tpu.memory_space<vmem>>, %arg5: memref<32x96xbf16, #tpu.memory_space<vmem>>, %arg6: memref<1x96xf32, #tpu.memory_space<vmem>>, %arg7: memref<32x32xbf16, #tpu.memory_space<vmem>>, %arg8: memref<1x32xf32, #tpu.memory_space<vmem>>, %arg9: memref<1x32xf32, #tpu.memory_space<vmem>>, %arg10: memref<1x32xf32, #tpu.memory_space<vmem>>, %arg11: memref<32x32xbf16, #tpu.memory_space<vmem>>, %arg12: memref<1x32xf32, #tpu.memory_space<vmem>>, %arg13: memref<32x64xbf16, #tpu.memory_space<vmem>>, %arg14: memref<1x64xf32, #tpu.memory_space<vmem>>, %arg15: memref<32x32xbf16, #tpu.memory_space<vmem>>, %arg16: memref<1x32xf32, #tpu.memory_space<vmem>>, %arg17: memref<1x32xf32, #tpu.memory_space<vmem>>, %arg18: memref<1x32xf32, #tpu.memory_space<vmem>>, %arg19: memref<32x128xbf16, #tpu.memory_space<vmem>>, %arg20: memref<1x128xf32, #tpu.memory_space<vmem>>, %arg21: memref<128x32xbf16, #tpu.memory_space<vmem>>, %arg22: memref<1x32xf32, #tpu.memory_space<vmem>>, %arg23: memref<1x8x32xf32, #tpu.memory_space<vmem>>) attributes {dimension_semantics = [#tpu.dimension_semantics<parallel>], iteration_bounds = array<i64: 2>, scalar_prefetch = 0 : i64, scratch_operands = 0 : i64, tpu.core_type = #tpu.core_type<tc>, window_params = [{transform_indices = @transform_0, window_bounds = array<i64: 1, 8, 32>}, {transform_indices = @transform_1, window_bounds = array<i64: 1, 8, 32>}, {pipeline_mode = #tpu.pipeline_mode<synchronous>, transform_indices = @transform_2, window_bounds = array<i64: 1, 32>}, {pipeline_mode = #tpu.pipeline_mode<synchronous>, transform_indices = @transform_3, window_bounds = array<i64: 1, 32>}, {pipeline_mode = #tpu.pipeline_mode<synchronous>, transform_indices = @transform_4, window_bounds = array<i64: 32, 96>}, {pipeline_mode = #tpu.pipeline_mode<synchronous>, transform_indices = @transform_5, window_bounds = array<i64: 1, 96>}, {pipeline_mode = #tpu.pipeline_mode<synchronous>, transform_indices = @transform_6, window_bounds = array<i64: 32, 32>}, {pipeline_mode = #tpu.pipeline_mode<synchronous>, transform_indices = @transform_7, window_bounds = array<i64: 1, 32>}, {pipeline_mode = #tpu.pipeline_mode<synchronous>, transform_indices = @transform_8, window_bounds = array<i64: 1, 32>}, {pipeline_mode = #tpu.pipeline_mode<synchronous>, transform_indices = @transform_9, window_bounds = array<i64: 1, 32>}, {pipeline_mode = #tpu.pipeline_mode<synchronous>, transform_indices = @transform_10, window_bounds = array<i64: 32, 32>}, {pipeline_mode = #tpu.pipeline_mode<synchronous>, transform_indices = @transform_11, window_bounds = array<i64: 1, 32>}, {pipeline_mode = #tpu.pipeline_mode<synchronous>, transform_indices = @transform_12, window_bounds = array<i64: 32, 64>}, {pipeline_mode = #tpu.pipeline_mode<synchronous>, transform_indices = @transform_13, window_bounds = array<i64: 1, 64>}, {pipeline_mode = #tpu.pipeline_mode<synchronous>, transform_indices = @transform_14, window_bounds = array<i64: 32, 32>}, {pipeline_mode = #tpu.pipeline_mode<synchronous>, transform_indices = @transform_15, window_bounds = array<i64: 1, 32>}, {pipeline_mode = #tpu.pipeline_mode<synchronous>, transform_indices = @transform_16, window_bounds = array<i64: 1, 32>}, {pipeline_mode = #tpu.pipeline_mode<synchronous>, transform_indices = @transform_17, window_bounds = array<i64: 1, 32>}, {pipeline_mode = #tpu.pipeline_mode<synchronous>, transform_indices = @transform_18, window_bounds = array<i64: 32, 128>}, {pipeline_mode = #tpu.pipeline_mode<synchronous>, transform_indices = @transform_19, window_bounds = array<i64: 1, 128>}, {pipeline_mode = #tpu.pipeline_mode<synchronous>, transform_indices = @transform_20, window_bounds = array<i64: 128, 32>}, {pipeline_mode = #tpu.pipeline_mode<synchronous>, transform_indices = @transform_21, window_bounds = array<i64: 1, 32>}, {transform_indices = @transform_22, window_bounds = array<i64: 1, 8, 32>}]} {
    %c0 = arith.constant 0 : index
    %c0_0 = arith.constant 0 : index
    %c0_1 = arith.constant 0 : index
    %0 = vector.load %arg1[%c0, %c0_0, %c0_1] : memref<1x8x32xf32, #tpu.memory_space<vmem>>, vector<1x8x32xf32>
    %1 = vector.shape_cast %0 : vector<1x8x32xf32> to vector<8x32xf32>
    %c0_2 = arith.constant 0 : index
    %c0_3 = arith.constant 0 : index
    %c0_4 = arith.constant 0 : index
    %2 = vector.load %arg2[%c0_2, %c0_3, %c0_4] : memref<1x8x32xf32, #tpu.memory_space<vmem>>, vector<1x8x32xf32>
    %3 = vector.shape_cast %2 : vector<1x8x32xf32> to vector<8x32xf32>
    %c0_5 = arith.constant 0 : index
    %c0_6 = arith.constant 0 : index
    %4 = vector.load %arg3[%c0_5, %c0_6] : memref<1x32xf32, #tpu.memory_space<vmem>>, vector<1x32xf32>
    %c0_7 = arith.constant 0 : index
    %c0_8 = arith.constant 0 : index
    %5 = vector.load %arg4[%c0_7, %c0_8] : memref<1x32xf32, #tpu.memory_space<vmem>>, vector<1x32xf32>
    %cst = arith.constant dense<0.000000e+00> : vector<8xf32>
    %6 = vector.multi_reduction <add>, %1, %cst [1] : vector<8x32xf32> to vector<8xf32>
    %7 = vector.shape_cast %6 : vector<8xf32> to vector<8x1xf32>
    %cst_9 = arith.constant 3.200000e+01 : f32
    %8 = vector.broadcast %cst_9 : f32 to vector<8x1xf32>
    %9 = arith.divf %7, %8 : vector<8x1xf32>
    %10 = vector.broadcast %9 : vector<8x1xf32> to vector<8x32xf32>
    %11 = arith.subf %1, %10 : vector<8x32xf32>
    %12 = arith.mulf %11, %11 : vector<8x32xf32>
    %cst_10 = arith.constant dense<0.000000e+00> : vector<8xf32>
    %13 = vector.multi_reduction <add>, %12, %cst_10 [1] : vector<8x32xf32> to vector<8xf32>
    %14 = vector.shape_cast %13 : vector<8xf32> to vector<8x1xf32>
    %cst_11 = arith.constant 3.200000e+01 : f32
    %15 = vector.broadcast %cst_11 : f32 to vector<8x1xf32>
    %16 = arith.divf %14, %15 : vector<8x1xf32>
    %17 = vector.broadcast %9 : vector<8x1xf32> to vector<8x32xf32>
    %18 = arith.subf %1, %17 : vector<8x32xf32>
    %cst_12 = arith.constant 9.99999974E-6 : f32
    %19 = vector.broadcast %cst_12 : f32 to vector<8x1xf32>
    %20 = arith.addf %16, %19 : vector<8x1xf32>
    %21 = math.rsqrt %20 : vector<8x1xf32>
    %22 = vector.broadcast %21 : vector<8x1xf32> to vector<8x32xf32>
    %23 = arith.mulf %18, %22 : vector<8x32xf32>
    %24 = vector.broadcast %4 : vector<1x32xf32> to vector<8x32xf32>
    %25 = arith.mulf %23, %24 : vector<8x32xf32>
    %26 = vector.broadcast %5 : vector<1x32xf32> to vector<8x32xf32>
    %27 = arith.addf %25, %26 : vector<8x32xf32>
    %28 = arith.truncf %27 : vector<8x32xf32> to vector<8x32xbf16>
    %c0_13 = arith.constant 0 : index
    %c0_14 = arith.constant 0 : index
    %29 = vector.load %arg5[%c0_13, %c0_14] : memref<32x96xbf16, #tpu.memory_space<vmem>>, vector<32x96xbf16>
    %cst_15 = arith.constant dense<0.000000e+00> : vector<8x96xf32>
    %30 = tpu.matmul %28, %29, %cst_15 {dimension_numbers = #tpu.dot_dimension_numbers<[1], [0], [0], [1], [0, 0, 1, 1], [], []>} : vector<8x32xbf16>, vector<32x96xbf16>, vector<8x96xf32> -> vector<8x96xf32>
    %c0_16 = arith.constant 0 : index
    %c0_17 = arith.constant 0 : index
    %31 = vector.load %arg6[%c0_16, %c0_17] : memref<1x96xf32, #tpu.memory_space<vmem>>, vector<1x96xf32>
    %32 = vector.broadcast %31 : vector<1x96xf32> to vector<8x96xf32>
    %33 = arith.addf %30, %32 : vector<8x96xf32>
    %34 = vector.shape_cast %33 : vector<8x96xf32> to vector<8x12x8xf32>
    %35 = tpu.transpose %34, [1, 0, 2] : vector<8x12x8xf32> -> vector<12x8x8xf32>
    %36 = arith.truncf %35 : vector<12x8x8xf32> to vector<12x8x8xbf16>
    %37 = vector.extract_strided_slice %36 {offsets = [0, 0, 0], sizes = [4, 8, 8], strides = [1, 1, 1]} : vector<12x8x8xbf16> to vector<4x8x8xbf16>
    %38 = vector.extract_strided_slice %36 {offsets = [4, 0, 0], sizes = [4, 8, 8], strides = [1, 1, 1]} : vector<12x8x8xbf16> to vector<4x8x8xbf16>
    %39 = vector.extract_strided_slice %36 {offsets = [8, 0, 0], sizes = [4, 8, 8], strides = [1, 1, 1]} : vector<12x8x8xbf16> to vector<4x8x8xbf16>
    %c0_18 = arith.constant 0 : index
    %c0_19 = arith.constant 0 : index
    %40 = vector.load %arg7[%c0_18, %c0_19] : memref<32x32xbf16, #tpu.memory_space<vmem>>, vector<32x32xbf16>
    %c0_20 = arith.constant 0 : index
    %c0_21 = arith.constant 0 : index
    %41 = vector.load %arg8[%c0_20, %c0_21] : memref<1x32xf32, #tpu.memory_space<vmem>>, vector<1x32xf32>
    %cst_22 = arith.constant 0xFF800000 : f32
    %42 = vector.broadcast %cst_22 : f32 to vector<4x8x1xf32>
    %cst_23 = arith.constant 0.000000e+00 : f32
    %43 = vector.broadcast %cst_23 : f32 to vector<4x8x1xf32>
    %cst_24 = arith.constant 0.000000e+00 : f32
    %44 = vector.broadcast %cst_24 : f32 to vector<4x8x8xf32>
    %cst_25 = arith.constant dense<0.000000e+00> : vector<4x8x8xf32>
    %45 = tpu.matmul %37, %38, %cst_25 {dimension_numbers = #tpu.dot_dimension_numbers<[2], [2], [1], [1], [0, 0, 0, 1, 1, 1], [0], [0]>} : vector<4x8x8xbf16>, vector<4x8x8xbf16>, vector<4x8x8xf32> -> vector<4x8x8xf32>
    %46 = tpu.iota {dimensions = array<i32: 0>} : vector<8x8xi32>
    %47 = tpu.iota {dimensions = array<i32: 1>} : vector<8x8xi32>
    %c0_i32 = arith.constant 0 : i32
    %48 = vector.broadcast %c0_i32 : i32 to vector<8x8xi32>
    %49 = arith.addi %48, %47 : vector<8x8xi32>
    %50 = arith.cmpi sle, %49, %46 : vector<8x8xi32>
    %51 = vector.shape_cast %50 : vector<8x8xi1> to vector<1x8x8xi1>
    %cst_26 = arith.constant 0xFF800000 : f32
    %52 = vector.shape_cast %51 : vector<1x8x8xi1> to vector<1x8x8xi1>
    %53 = vector.broadcast %52 : vector<1x8x8xi1> to vector<4x8x8xi1>
    %54 = vector.broadcast %cst_26 : f32 to vector<4x8x8xf32>
    %55 = arith.select %53, %45, %54 : vector<4x8x8xi1>, vector<4x8x8xf32>
    %cst_27 = arith.constant dense<0xFF800000> : vector<4x8xf32>
    %56 = vector.multi_reduction <maximumf>, %55, %cst_27 [2] : vector<4x8x8xf32> to vector<4x8xf32>
    %57 = vector.shape_cast %56 : vector<4x8xf32> to vector<4x8x1xf32>
    %58 = arith.maximumf %42, %57 : vector<4x8x1xf32>
    %59 = arith.subf %42, %58 : vector<4x8x1xf32>
    %60 = math.exp %59 : vector<4x8x1xf32>
    %61 = vector.broadcast %58 : vector<4x8x1xf32> to vector<4x8x8xf32>
    %62 = arith.subf %55, %61 : vector<4x8x8xf32>
    %63 = math.exp %62 : vector<4x8x8xf32>
    %64 = arith.mulf %60, %43 : vector<4x8x1xf32>
    %cst_28 = arith.constant dense<0.000000e+00> : vector<4x8xf32>
    %65 = vector.multi_reduction <add>, %63, %cst_28 [2] : vector<4x8x8xf32> to vector<4x8xf32>
    %66 = vector.shape_cast %65 : vector<4x8xf32> to vector<4x8x1xf32>
    %67 = arith.addf %64, %66 : vector<4x8x1xf32>
    %68 = vector.broadcast %60 : vector<4x8x1xf32> to vector<4x8x8xf32>
    %69 = arith.mulf %68, %44 : vector<4x8x8xf32>
    %70 = arith.truncf %63 : vector<4x8x8xf32> to vector<4x8x8xbf16>
    %cst_29 = arith.constant dense<0.000000e+00> : vector<4x8x8xf32>
    %71 = tpu.matmul %70, %39, %cst_29 {dimension_numbers = #tpu.dot_dimension_numbers<[2], [1], [1], [2], [0, 0, 0, 1, 1, 2], [0], [0]>} : vector<4x8x8xbf16>, vector<4x8x8xbf16>, vector<4x8x8xf32> -> vector<4x8x8xf32>
    %72 = arith.addf %69, %71 : vector<4x8x8xf32>
    %73 = tpu.reciprocal %67 {approx = true} : vector<4x8x1xf32> -> vector<4x8x1xf32>
    %74 = vector.broadcast %73 : vector<4x8x1xf32> to vector<4x8x8xf32>
    %75 = arith.mulf %72, %74 : vector<4x8x8xf32>
    %76 = tpu.transpose %75, [1, 0, 2] : vector<4x8x8xf32> -> vector<8x4x8xf32>
    %77 = vector.shape_cast %76 : vector<8x4x8xf32> to vector<8x32xf32>
    %78 = arith.truncf %77 : vector<8x32xf32> to vector<8x32xbf16>
    %cst_30 = arith.constant dense<0.000000e+00> : vector<8x32xf32>
    %79 = tpu.matmul %78, %40, %cst_30 {dimension_numbers = #tpu.dot_dimension_numbers<[1], [0], [0], [1], [0, 0, 1, 1], [], []>} : vector<8x32xbf16>, vector<32x32xbf16>, vector<8x32xf32> -> vector<8x32xf32>
    %80 = vector.broadcast %41 : vector<1x32xf32> to vector<8x32xf32>
    %81 = arith.addf %79, %80 : vector<8x32xf32>
    %82 = arith.addf %1, %81 : vector<8x32xf32>
    %c0_31 = arith.constant 0 : index
    %c0_32 = arith.constant 0 : index
    %83 = vector.load %arg9[%c0_31, %c0_32] : memref<1x32xf32, #tpu.memory_space<vmem>>, vector<1x32xf32>
    %c0_33 = arith.constant 0 : index
    %c0_34 = arith.constant 0 : index
    %84 = vector.load %arg10[%c0_33, %c0_34] : memref<1x32xf32, #tpu.memory_space<vmem>>, vector<1x32xf32>
    %cst_35 = arith.constant dense<0.000000e+00> : vector<8xf32>
    %85 = vector.multi_reduction <add>, %82, %cst_35 [1] : vector<8x32xf32> to vector<8xf32>
    %86 = vector.shape_cast %85 : vector<8xf32> to vector<8x1xf32>
    %cst_36 = arith.constant 3.200000e+01 : f32
    %87 = vector.broadcast %cst_36 : f32 to vector<8x1xf32>
    %88 = arith.divf %86, %87 : vector<8x1xf32>
    %89 = vector.broadcast %88 : vector<8x1xf32> to vector<8x32xf32>
    %90 = arith.subf %82, %89 : vector<8x32xf32>
    %91 = arith.mulf %90, %90 : vector<8x32xf32>
    %cst_37 = arith.constant dense<0.000000e+00> : vector<8xf32>
    %92 = vector.multi_reduction <add>, %91, %cst_37 [1] : vector<8x32xf32> to vector<8xf32>
    %93 = vector.shape_cast %92 : vector<8xf32> to vector<8x1xf32>
    %cst_38 = arith.constant 3.200000e+01 : f32
    %94 = vector.broadcast %cst_38 : f32 to vector<8x1xf32>
    %95 = arith.divf %93, %94 : vector<8x1xf32>
    %96 = vector.broadcast %88 : vector<8x1xf32> to vector<8x32xf32>
    %97 = arith.subf %82, %96 : vector<8x32xf32>
    %cst_39 = arith.constant 9.99999974E-6 : f32
    %98 = vector.broadcast %cst_39 : f32 to vector<8x1xf32>
    %99 = arith.addf %95, %98 : vector<8x1xf32>
    %100 = math.rsqrt %99 : vector<8x1xf32>
    %101 = vector.broadcast %100 : vector<8x1xf32> to vector<8x32xf32>
    %102 = arith.mulf %97, %101 : vector<8x32xf32>
    %103 = vector.broadcast %83 : vector<1x32xf32> to vector<8x32xf32>
    %104 = arith.mulf %102, %103 : vector<8x32xf32>
    %105 = vector.broadcast %84 : vector<1x32xf32> to vector<8x32xf32>
    %106 = arith.addf %104, %105 : vector<8x32xf32>
    %107 = arith.truncf %106 : vector<8x32xf32> to vector<8x32xbf16>
    %c0_40 = arith.constant 0 : index
    %c0_41 = arith.constant 0 : index
    %108 = vector.load %arg11[%c0_40, %c0_41] : memref<32x32xbf16, #tpu.memory_space<vmem>>, vector<32x32xbf16>
    %cst_42 = arith.constant dense<0.000000e+00> : vector<8x32xf32>
    %109 = tpu.matmul %107, %108, %cst_42 {dimension_numbers = #tpu.dot_dimension_numbers<[1], [0], [0], [1], [0, 0, 1, 1], [], []>} : vector<8x32xbf16>, vector<32x32xbf16>, vector<8x32xf32> -> vector<8x32xf32>
    %c0_43 = arith.constant 0 : index
    %c0_44 = arith.constant 0 : index
    %110 = vector.load %arg12[%c0_43, %c0_44] : memref<1x32xf32, #tpu.memory_space<vmem>>, vector<1x32xf32>
    %111 = vector.broadcast %110 : vector<1x32xf32> to vector<8x32xf32>
    %112 = arith.addf %109, %111 : vector<8x32xf32>
    %113 = arith.truncf %3 : vector<8x32xf32> to vector<8x32xbf16>
    %c0_45 = arith.constant 0 : index
    %c0_46 = arith.constant 0 : index
    %114 = vector.load %arg13[%c0_45, %c0_46] : memref<32x64xbf16, #tpu.memory_space<vmem>>, vector<32x64xbf16>
    %cst_47 = arith.constant dense<0.000000e+00> : vector<8x64xf32>
    %115 = tpu.matmul %113, %114, %cst_47 {dimension_numbers = #tpu.dot_dimension_numbers<[1], [0], [0], [1], [0, 0, 1, 1], [], []>} : vector<8x32xbf16>, vector<32x64xbf16>, vector<8x64xf32> -> vector<8x64xf32>
    %c0_48 = arith.constant 0 : index
    %c0_49 = arith.constant 0 : index
    %116 = vector.load %arg14[%c0_48, %c0_49] : memref<1x64xf32, #tpu.memory_space<vmem>>, vector<1x64xf32>
    %117 = vector.broadcast %116 : vector<1x64xf32> to vector<8x64xf32>
    %118 = arith.addf %115, %117 : vector<8x64xf32>
    %119 = vector.shape_cast %112 : vector<8x32xf32> to vector<8x4x8xf32>
    %120 = tpu.transpose %119, [1, 0, 2] : vector<8x4x8xf32> -> vector<4x8x8xf32>
    %121 = arith.truncf %120 : vector<4x8x8xf32> to vector<4x8x8xbf16>
    %122 = vector.shape_cast %118 : vector<8x64xf32> to vector<8x8x8xf32>
    %123 = tpu.transpose %122, [1, 0, 2] : vector<8x8x8xf32> -> vector<8x8x8xf32>
    %124 = arith.truncf %123 : vector<8x8x8xf32> to vector<8x8x8xbf16>
    %125 = vector.extract_strided_slice %124 {offsets = [0, 0, 0], sizes = [4, 8, 8], strides = [1, 1, 1]} : vector<8x8x8xbf16> to vector<4x8x8xbf16>
    %126 = vector.extract_strided_slice %124 {offsets = [4, 0, 0], sizes = [4, 8, 8], strides = [1, 1, 1]} : vector<8x8x8xbf16> to vector<4x8x8xbf16>
    %c0_50 = arith.constant 0 : index
    %c0_51 = arith.constant 0 : index
    %127 = vector.load %arg15[%c0_50, %c0_51] : memref<32x32xbf16, #tpu.memory_space<vmem>>, vector<32x32xbf16>
    %c0_52 = arith.constant 0 : index
    %c0_53 = arith.constant 0 : index
    %128 = vector.load %arg16[%c0_52, %c0_53] : memref<1x32xf32, #tpu.memory_space<vmem>>, vector<1x32xf32>
    %cst_54 = arith.constant 0xFF800000 : f32
    %129 = vector.broadcast %cst_54 : f32 to vector<4x8x1xf32>
    %cst_55 = arith.constant 0.000000e+00 : f32
    %130 = vector.broadcast %cst_55 : f32 to vector<4x8x1xf32>
    %cst_56 = arith.constant 0.000000e+00 : f32
    %131 = vector.broadcast %cst_56 : f32 to vector<4x8x8xf32>
    %cst_57 = arith.constant dense<0.000000e+00> : vector<4x8x8xf32>
    %132 = tpu.matmul %121, %125, %cst_57 {dimension_numbers = #tpu.dot_dimension_numbers<[2], [2], [1], [1], [0, 0, 0, 1, 1, 1], [0], [0]>} : vector<4x8x8xbf16>, vector<4x8x8xbf16>, vector<4x8x8xf32> -> vector<4x8x8xf32>
    %cst_58 = arith.constant dense<0xFF800000> : vector<4x8xf32>
    %133 = vector.multi_reduction <maximumf>, %132, %cst_58 [2] : vector<4x8x8xf32> to vector<4x8xf32>
    %134 = vector.shape_cast %133 : vector<4x8xf32> to vector<4x8x1xf32>
    %135 = arith.maximumf %129, %134 : vector<4x8x1xf32>
    %136 = arith.subf %129, %135 : vector<4x8x1xf32>
    %137 = math.exp %136 : vector<4x8x1xf32>
    %138 = vector.broadcast %135 : vector<4x8x1xf32> to vector<4x8x8xf32>
    %139 = arith.subf %132, %138 : vector<4x8x8xf32>
    %140 = math.exp %139 : vector<4x8x8xf32>
    %141 = arith.mulf %137, %130 : vector<4x8x1xf32>
    %cst_59 = arith.constant dense<0.000000e+00> : vector<4x8xf32>
    %142 = vector.multi_reduction <add>, %140, %cst_59 [2] : vector<4x8x8xf32> to vector<4x8xf32>
    %143 = vector.shape_cast %142 : vector<4x8xf32> to vector<4x8x1xf32>
    %144 = arith.addf %141, %143 : vector<4x8x1xf32>
    %145 = vector.broadcast %137 : vector<4x8x1xf32> to vector<4x8x8xf32>
    %146 = arith.mulf %145, %131 : vector<4x8x8xf32>
    %147 = arith.truncf %140 : vector<4x8x8xf32> to vector<4x8x8xbf16>
    %cst_60 = arith.constant dense<0.000000e+00> : vector<4x8x8xf32>
    %148 = tpu.matmul %147, %126, %cst_60 {dimension_numbers = #tpu.dot_dimension_numbers<[2], [1], [1], [2], [0, 0, 0, 1, 1, 2], [0], [0]>} : vector<4x8x8xbf16>, vector<4x8x8xbf16>, vector<4x8x8xf32> -> vector<4x8x8xf32>
    %149 = arith.addf %146, %148 : vector<4x8x8xf32>
    %150 = tpu.reciprocal %144 {approx = true} : vector<4x8x1xf32> -> vector<4x8x1xf32>
    %151 = vector.broadcast %150 : vector<4x8x1xf32> to vector<4x8x8xf32>
    %152 = arith.mulf %149, %151 : vector<4x8x8xf32>
    %153 = tpu.transpose %152, [1, 0, 2] : vector<4x8x8xf32> -> vector<8x4x8xf32>
    %154 = vector.shape_cast %153 : vector<8x4x8xf32> to vector<8x32xf32>
    %155 = arith.truncf %154 : vector<8x32xf32> to vector<8x32xbf16>
    %cst_61 = arith.constant dense<0.000000e+00> : vector<8x32xf32>
    %156 = tpu.matmul %155, %127, %cst_61 {dimension_numbers = #tpu.dot_dimension_numbers<[1], [0], [0], [1], [0, 0, 1, 1], [], []>} : vector<8x32xbf16>, vector<32x32xbf16>, vector<8x32xf32> -> vector<8x32xf32>
    %157 = vector.broadcast %128 : vector<1x32xf32> to vector<8x32xf32>
    %158 = arith.addf %156, %157 : vector<8x32xf32>
    %159 = arith.addf %82, %158 : vector<8x32xf32>
    %c0_62 = arith.constant 0 : index
    %c0_63 = arith.constant 0 : index
    %160 = vector.load %arg17[%c0_62, %c0_63] : memref<1x32xf32, #tpu.memory_space<vmem>>, vector<1x32xf32>
    %c0_64 = arith.constant 0 : index
    %c0_65 = arith.constant 0 : index
    %161 = vector.load %arg18[%c0_64, %c0_65] : memref<1x32xf32, #tpu.memory_space<vmem>>, vector<1x32xf32>
    %cst_66 = arith.constant dense<0.000000e+00> : vector<8xf32>
    %162 = vector.multi_reduction <add>, %159, %cst_66 [1] : vector<8x32xf32> to vector<8xf32>
    %163 = vector.shape_cast %162 : vector<8xf32> to vector<8x1xf32>
    %cst_67 = arith.constant 3.200000e+01 : f32
    %164 = vector.broadcast %cst_67 : f32 to vector<8x1xf32>
    %165 = arith.divf %163, %164 : vector<8x1xf32>
    %166 = vector.broadcast %165 : vector<8x1xf32> to vector<8x32xf32>
    %167 = arith.subf %159, %166 : vector<8x32xf32>
    %168 = arith.mulf %167, %167 : vector<8x32xf32>
    %cst_68 = arith.constant dense<0.000000e+00> : vector<8xf32>
    %169 = vector.multi_reduction <add>, %168, %cst_68 [1] : vector<8x32xf32> to vector<8xf32>
    %170 = vector.shape_cast %169 : vector<8xf32> to vector<8x1xf32>
    %cst_69 = arith.constant 3.200000e+01 : f32
    %171 = vector.broadcast %cst_69 : f32 to vector<8x1xf32>
    %172 = arith.divf %170, %171 : vector<8x1xf32>
    %173 = vector.broadcast %165 : vector<8x1xf32> to vector<8x32xf32>
    %174 = arith.subf %159, %173 : vector<8x32xf32>
    %cst_70 = arith.constant 9.99999974E-6 : f32
    %175 = vector.broadcast %cst_70 : f32 to vector<8x1xf32>
    %176 = arith.addf %172, %175 : vector<8x1xf32>
    %177 = math.rsqrt %176 : vector<8x1xf32>
    %178 = vector.broadcast %177 : vector<8x1xf32> to vector<8x32xf32>
    %179 = arith.mulf %174, %178 : vector<8x32xf32>
    %180 = vector.broadcast %160 : vector<1x32xf32> to vector<8x32xf32>
    %181 = arith.mulf %179, %180 : vector<8x32xf32>
    %182 = vector.broadcast %161 : vector<1x32xf32> to vector<8x32xf32>
    %183 = arith.addf %181, %182 : vector<8x32xf32>
    %184 = arith.truncf %183 : vector<8x32xf32> to vector<8x32xbf16>
    %c0_71 = arith.constant 0 : index
    %c0_72 = arith.constant 0 : index
    %185 = vector.load %arg19[%c0_71, %c0_72] : memref<32x128xbf16, #tpu.memory_space<vmem>>, vector<32x128xbf16>
    %cst_73 = arith.constant dense<0.000000e+00> : vector<8x128xf32>
    %186 = tpu.matmul %184, %185, %cst_73 {dimension_numbers = #tpu.dot_dimension_numbers<[1], [0], [0], [1], [0, 0, 1, 1], [], []>} : vector<8x32xbf16>, vector<32x128xbf16>, vector<8x128xf32> -> vector<8x128xf32>
    %c0_74 = arith.constant 0 : index
    %c0_75 = arith.constant 0 : index
    %187 = vector.load %arg20[%c0_74, %c0_75] : memref<1x128xf32, #tpu.memory_space<vmem>>, vector<1x128xf32>
    %188 = vector.broadcast %187 : vector<1x128xf32> to vector<8x128xf32>
    %189 = arith.addf %186, %188 : vector<8x128xf32>
    %cst_76 = arith.constant 0.000000e+00 : f32
    %190 = vector.broadcast %cst_76 : f32 to vector<8x128xf32>
    %191 = arith.maximumf %189, %190 : vector<8x128xf32>
    %192 = arith.truncf %191 : vector<8x128xf32> to vector<8x128xbf16>
    %c0_77 = arith.constant 0 : index
    %c0_78 = arith.constant 0 : index
    %193 = vector.load %arg21[%c0_77, %c0_78] : memref<128x32xbf16, #tpu.memory_space<vmem>>, vector<128x32xbf16>
    %cst_79 = arith.constant dense<0.000000e+00> : vector<8x32xf32>
    %194 = tpu.matmul %192, %193, %cst_79 {dimension_numbers = #tpu.dot_dimension_numbers<[1], [0], [0], [1], [0, 0, 1, 1], [], []>} : vector<8x128xbf16>, vector<128x32xbf16>, vector<8x32xf32> -> vector<8x32xf32>
    %195 = arith.addf %159, %194 : vector<8x32xf32>
    %c0_80 = arith.constant 0 : index
    %c0_81 = arith.constant 0 : index
    %196 = vector.load %arg22[%c0_80, %c0_81] : memref<1x32xf32, #tpu.memory_space<vmem>>, vector<1x32xf32>
    %197 = vector.broadcast %196 : vector<1x32xf32> to vector<8x32xf32>
    %198 = arith.addf %195, %197 : vector<8x32xf32>
    %c0_82 = arith.constant 0 : index
    %c0_83 = arith.constant 0 : index
    %c0_84 = arith.constant 0 : index
    %199 = vector.load %arg23[%c0_82, %c0_83, %c0_84] : memref<1x8x32xf32, #tpu.memory_space<vmem>>, vector<1x8x32xf32>
    %200 = vector.shape_cast %199 : vector<1x8x32xf32> to vector<8x32xf32>
    %201 = vector.shape_cast %198 : vector<8x32xf32> to vector<1x8x32xf32>
    tpu.vector_store %arg23[%c0_82, %c0_83, %c0_84], %201 {strides = array<i32>} : memref<1x8x32xf32, #tpu.memory_space<vmem>>, vector<1x8x32xf32>,
    return
  }
  func.func @transform_0(%arg0: i32) -> (i32, i32, i32) {
    %c0_i32 = arith.constant 0 : i32
    %c0_i32_0 = arith.constant 0 : i32
    %c0_i32_1 = arith.constant 0 : i32
    return %arg0, %c0_i32, %c0_i32_0 : i32, i32, i32
  }
  func.func @transform_1(%arg0: i32) -> (i32, i32, i32) {
    %c0_i32 = arith.constant 0 : i32
    %c0_i32_0 = arith.constant 0 : i32
    %c0_i32_1 = arith.constant 0 : i32
    return %arg0, %c0_i32, %c0_i32_0 : i32, i32, i32
  }
  func.func @transform_2(%arg0: i32) -> (i32, i32) {
    %c0_i32 = arith.constant 0 : i32
    %c0_i32_0 = arith.constant 0 : i32
    %c0_i32_1 = arith.constant 0 : i32
    return %c0_i32, %c0_i32_0 : i32, i32
  }
  func.func @transform_3(%arg0: i32) -> (i32, i32) {
    %c0_i32 = arith.constant 0 : i32
    %c0_i32_0 = arith.constant 0 : i32
    %c0_i32_1 = arith.constant 0 : i32
    return %c0_i32, %c0_i32_0 : i32, i32
  }
  func.func @transform_4(%arg0: i32) -> (i32, i32) {
    %c0_i32 = arith.constant 0 : i32
    %c0_i32_0 = arith.constant 0 : i32
    %c0_i32_1 = arith.constant 0 : i32
    return %c0_i32, %c0_i32_0 : i32, i32
  }
  func.func @transform_5(%arg0: i32) -> (i32, i32) {
    %c0_i32 = arith.constant 0 : i32
    %c0_i32_0 = arith.constant 0 : i32
    %c0_i32_1 = arith.constant 0 : i32
    return %c0_i32, %c0_i32_0 : i32, i32
  }
  func.func @transform_6(%arg0: i32) -> (i32, i32) {
    %c0_i32 = arith.constant 0 : i32
    %c0_i32_0 = arith.constant 0 : i32
    %c0_i32_1 = arith.constant 0 : i32
    return %c0_i32, %c0_i32_0 : i32, i32
  }
  func.func @transform_7(%arg0: i32) -> (i32, i32) {
    %c0_i32 = arith.constant 0 : i32
    %c0_i32_0 = arith.constant 0 : i32
    %c0_i32_1 = arith.constant 0 : i32
    return %c0_i32, %c0_i32_0 : i32, i32
  }
  func.func @transform_8(%arg0: i32) -> (i32, i32) {
    %c0_i32 = arith.constant 0 : i32
    %c0_i32_0 = arith.constant 0 : i32
    %c0_i32_1 = arith.constant 0 : i32
    return %c0_i32, %c0_i32_0 : i32, i32
  }
  func.func @transform_9(%arg0: i32) -> (i32, i32) {
    %c0_i32 = arith.constant 0 : i32
    %c0_i32_0 = arith.constant 0 : i32
    %c0_i32_1 = arith.constant 0 : i32
    return %c0_i32, %c0_i32_0 : i32, i32
  }
  func.func @transform_10(%arg0: i32) -> (i32, i32) {
    %c0_i32 = arith.constant 0 : i32
    %c0_i32_0 = arith.constant 0 : i32
    %c0_i32_1 = arith.constant 0 : i32
    return %c0_i32, %c0_i32_0 : i32, i32
  }
  func.func @transform_11(%arg0: i32) -> (i32, i32) {
    %c0_i32 = arith.constant 0 : i32
    %c0_i32_0 = arith.constant 0 : i32
    %c0_i32_1 = arith.constant 0 : i32
    return %c0_i32, %c0_i32_0 : i32, i32
  }
  func.func @transform_12(%arg0: i32) -> (i32, i32) {
    %c0_i32 = arith.constant 0 : i32
    %c0_i32_0 = arith.constant 0 : i32
    %c0_i32_1 = arith.constant 0 : i32
    return %c0_i32, %c0_i32_0 : i32, i32
  }
  func.func @transform_13(%arg0: i32) -> (i32, i32) {
    %c0_i32 = arith.constant 0 : i32
    %c0_i32_0 = arith.constant 0 : i32
    %c0_i32_1 = arith.constant 0 : i32
    return %c0_i32, %c0_i32_0 : i32, i32
  }
  func.func @transform_14(%arg0: i32) -> (i32, i32) {
    %c0_i32 = arith.constant 0 : i32
    %c0_i32_0 = arith.constant 0 : i32
    %c0_i32_1 = arith.constant 0 : i32
    return %c0_i32, %c0_i32_0 : i32, i32
  }
  func.func @transform_15(%arg0: i32) -> (i32, i32) {
    %c0_i32 = arith.constant 0 : i32
    %c0_i32_0 = arith.constant 0 : i32
    %c0_i32_1 = arith.constant 0 : i32
    return %c0_i32, %c0_i32_0 : i32, i32
  }
  func.func @transform_16(%arg0: i32) -> (i32, i32) {
    %c0_i32 = arith.constant 0 : i32
    %c0_i32_0 = arith.constant 0 : i32
    %c0_i32_1 = arith.constant 0 : i32
    return %c0_i32, %c0_i32_0 : i32, i32
  }
  func.func @transform_17(%arg0: i32) -> (i32, i32) {
    %c0_i32 = arith.constant 0 : i32
    %c0_i32_0 = arith.constant 0 : i32
    %c0_i32_1 = arith.constant 0 : i32
    return %c0_i32, %c0_i32_0 : i32, i32
  }
  func.func @transform_18(%arg0: i32) -> (i32, i32) {
    %c0_i32 = arith.constant 0 : i32
    %c0_i32_0 = arith.constant 0 : i32
    %c0_i32_1 = arith.constant 0 : i32
    return %c0_i32, %c0_i32_0 : i32, i32
  }
  func.func @transform_19(%arg0: i32) -> (i32, i32) {
    %c0_i32 = arith.constant 0 : i32
    %c0_i32_0 = arith.constant 0 : i32
    %c0_i32_1 = arith.constant 0 : i32
    return %c0_i32, %c0_i32_0 : i32, i32
  }
  func.func @transform_20(%arg0: i32) -> (i32, i32) {
    %c0_i32 = arith.constant 0 : i32
    %c0_i32_0 = arith.constant 0 : i32
    %c0_i32_1 = arith.constant 0 : i32
    return %c0_i32, %c0_i32_0 : i32, i32
  }
  func.func @transform_21(%arg0: i32) -> (i32, i32) {
    %c0_i32 = arith.constant 0 : i32
    %c0_i32_0 = arith.constant 0 : i32
    %c0_i32_1 = arith.constant 0 : i32
    return %c0_i32, %c0_i32_0 : i32, i32
  }
  func.func @transform_22(%arg0: i32) -> (i32, i32, i32) {
    %c0_i32 = arith.constant 0 : i32
    %c0_i32_0 = arith.constant 0 : i32
    %c0_i32_1 = arith.constant 0 : i32
    return %arg0, %c0_i32, %c0_i32_0 : i32, i32, i32
  }
}

module attributes {stable_mosaic.version = 11 : i64} {
  func.func @decoder_block_kernel(%arg0: i32, %arg1: memref<1x8x32xf32, #tpu.memory_space<vmem>>, %arg2: memref<1x8x32xf32, #tpu.memory_space<vmem>>, %arg3: memref<1x32xf32, #tpu.memory_space<vmem>>, %arg4: memref<1x32xf32, #tpu.memory_space<vmem>>, %arg5: memref<32x96xbf16, #tpu.memory_space<vmem>>, %arg6: memref<1x96xf32, #tpu.memory_space<vmem>>, %arg7: memref<32x32xbf16, #tpu.memory_space<vmem>>, %arg8: memref<1x32xf32, #tpu.memory_space<vmem>>, %arg9: memref<1x32xf32, #tpu.memory_space<vmem>>, %arg10: memref<1x32xf32, #tpu.memory_space<vmem>>, %arg11: memref<32x32xbf16, #tpu.memory_space<vmem>>, %arg12: memref<1x32xf32, #tpu.memory_space<vmem>>, %arg13: memref<32x64xbf16, #tpu.memory_space<vmem>>, %arg14: memref<1x64xf32, #tpu.memory_space<vmem>>, %arg15: memref<32x32xbf16, #tpu.memory_space<vmem>>, %arg16: memref<1x32xf32, #tpu.memory_space<vmem>>, %arg17: memref<1x32xf32, #tpu.memory_space<vmem>>, %arg18: memref<1x32xf32, #tpu.memory_space<vmem>>, %arg19: memref<32x128xbf16, #tpu.memory_space<vmem>>, %arg20: memref<1x128xf32, #tpu.memory_space<vmem>>, %arg21: memref<128x32xbf16, #tpu.memory_space<vmem>>, %arg22: memref<1x32xf32, #tpu.memory_space<vmem>>, %arg23: memref<1x8x32xf32, #tpu.memory_space<vmem>>) attributes {dimension_semantics = [#tpu.dimension_semantics<parallel>], iteration_bounds = array<i64: 2>, scalar_prefetch = 0 : i64, scratch_operands = 0 : i64, tpu.core_type = #tpu.core_type<tc>, window_params = [{transform_indices = @transform_0, window_bounds = array<i64: 1, 8, 32>}, {transform_indices = @transform_1, window_bounds = array<i64: 1, 8, 32>}, {pipeline_mode = #tpu.pipeline_mode<synchronous>, transform_indices = @transform_2, window_bounds = array<i64: 1, 32>}, {pipeline_mode = #tpu.pipeline_mode<synchronous>, transform_indices = @transform_3, window_bounds = array<i64: 1, 32>}, {pipeline_mode = #tpu.pipeline_mode<synchronous>, transform_indices = @transform_4, window_bounds = array<i64: 32, 96>}, {pipeline_mode = #tpu.pipeline_mode<synchronous>, transform_indices = @transform_5, window_bounds = array<i64: 1, 96>}, {pipeline_mode = #tpu.pipeline_mode<synchronous>, transform_indices = @transform_6, window_bounds = array<i64: 32, 32>}, {pipeline_mode = #tpu.pipeline_mode<synchronous>, transform_indices = @transform_7, window_bounds = array<i64: 1, 32>}, {pipeline_mode = #tpu.pipeline_mode<synchronous>, transform_indices = @transform_8, window_bounds = array<i64: 1, 32>}, {pipeline_mode = #tpu.pipeline_mode<synchronous>, transform_indices = @transform_9, window_bounds = array<i64: 1, 32>}, {pipeline_mode = #tpu.pipeline_mode<synchronous>, transform_indices = @transform_10, window_bounds = array<i64: 32, 32>}, {pipeline_mode = #tpu.pipeline_mode<synchronous>, transform_indices = @transform_11, window_bounds = array<i64: 1, 32>}, {pipeline_mode = #tpu.pipeline_mode<synchronous>, transform_indices = @transform_12, window_bounds = array<i64: 32, 64>}, {pipeline_mode = #tpu.pipeline_mode<synchronous>, transform_indices = @transform_13, window_bounds = array<i64: 1, 64>}, {pipeline_mode = #tpu.pipeline_mode<synchronous>, transform_indices = @transform_14, window_bounds = array<i64: 32, 32>}, {pipeline_mode = #tpu.pipeline_mode<synchronous>, transform_indices = @transform_15, window_bounds = array<i64: 1, 32>}, {pipeline_mode = #tpu.pipeline_mode<synchronous>, transform_indices = @transform_16, window_bounds = array<i64: 1, 32>}, {pipeline_mode = #tpu.pipeline_mode<synchronous>, transform_indices = @transform_17, window_bounds = array<i64: 1, 32>}, {pipeline_mode = #tpu.pipeline_mode<synchronous>, transform_indices = @transform_18, window_bounds = array<i64: 32, 128>}, {pipeline_mode = #tpu.pipeline_mode<synchronous>, transform_indices = @transform_19, window_bounds = array<i64: 1, 128>}, {pipeline_mode = #tpu.pipeline_mode<synchronous>, transform_indices = @transform_20, window_bounds = array<i64: 128, 32>}, {pipeline_mode = #tpu.pipeline_mode<synchronous>, transform_indices = @transform_21, window_bounds = array<i64: 1, 32>}, {transform_indices = @transform_22, window_bounds = array<i64: 1, 8, 32>}]} {
    %c0 = arith.constant 0 : index
    %c0_0 = arith.constant 0 : index
    %c0_1 = arith.constant 0 : index
    %0 = vector.load %arg1[%c0, %c0_0, %c0_1] : memref<1x8x32xf32, #tpu.memory_space<vmem>>, vector<1x8x32xf32>
    %1 = vector.shape_cast %0 : vector<1x8x32xf32> to vector<8x32xf32>
    %c0_2 = arith.constant 0 : index
    %c0_3 = arith.constant 0 : index
    %c0_4 = arith.constant 0 : index
    %2 = vector.load %arg2[%c0_2, %c0_3, %c0_4] : memref<1x8x32xf32, #tpu.memory_space<vmem>>, vector<1x8x32xf32>
    %3 = vector.shape_cast %2 : vector<1x8x32xf32> to vector<8x32xf32>
    %c0_5 = arith.constant 0 : index
    %c0_6 = arith.constant 0 : index
    %4 = vector.load %arg3[%c0_5, %c0_6] : memref<1x32xf32, #tpu.memory_space<vmem>>, vector<1x32xf32>
    %c0_7 = arith.constant 0 : index
    %c0_8 = arith.constant 0 : index
    %5 = vector.load %arg4[%c0_7, %c0_8] : memref<1x32xf32, #tpu.memory_space<vmem>>, vector<1x32xf32>
    %cst = arith.constant dense<0.000000e+00> : vector<8xf32>
    %6 = vector.multi_reduction <add>, %1, %cst [1] : vector<8x32xf32> to vector<8xf32>
    %7 = vector.shape_cast %6 : vector<8xf32> to vector<8x1xf32>
    %cst_9 = arith.constant 3.200000e+01 : f32
    %8 = vector.broadcast %cst_9 : f32 to vector<8x1xf32>
    %9 = arith.divf %7, %8 : vector<8x1xf32>
    %10 = vector.broadcast %9 : vector<8x1xf32> to vector<8x32xf32>
    %11 = arith.subf %1, %10 : vector<8x32xf32>
    %12 = arith.mulf %11, %11 : vector<8x32xf32>
    %cst_10 = arith.constant dense<0.000000e+00> : vector<8xf32>
    %13 = vector.multi_reduction <add>, %12, %cst_10 [1] : vector<8x32xf32> to vector<8xf32>
    %14 = vector.shape_cast %13 : vector<8xf32> to vector<8x1xf32>
    %cst_11 = arith.constant 3.200000e+01 : f32
    %15 = vector.broadcast %cst_11 : f32 to vector<8x1xf32>
    %16 = arith.divf %14, %15 : vector<8x1xf32>
    %17 = vector.broadcast %9 : vector<8x1xf32> to vector<8x32xf32>
    %18 = arith.subf %1, %17 : vector<8x32xf32>
    %cst_12 = arith.constant 9.99999974E-6 : f32
    %19 = vector.broadcast %cst_12 : f32 to vector<8x1xf32>
    %20 = arith.addf %16, %19 : vector<8x1xf32>
    %21 = math.rsqrt %20 : vector<8x1xf32>
    %22 = vector.broadcast %21 : vector<8x1xf32> to vector<8x32xf32>
    %23 = arith.mulf %18, %22 : vector<8x32xf32>
    %24 = vector.broadcast %4 : vector<1x32xf32> to vector<8x32xf32>
    %25 = arith.mulf %23, %24 : vector<8x32xf32>
    %26 = vector.broadcast %5 : vector<1x32xf32> to vector<8x32xf32>
    %27 = arith.addf %25, %26 : vector<8x32xf32>
    %28 = arith.truncf %27 : vector<8x32xf32> to vector<8x32xbf16>
    %c0_13 = arith.constant 0 : index
    %c0_14 = arith.constant 0 : index
    %29 = vector.load %arg5[%c0_13, %c0_14] : memref<32x96xbf16, #tpu.memory_space<vmem>>, vector<32x96xbf16>
    %cst_15 = arith.constant dense<0.000000e+00> : vector<8x96xf32>
    %30 = tpu.matmul %28, %29, %cst_15 {dimension_numbers = #tpu.dot_dimension_numbers<[1], [0], [0], [1], [0, 0, 1, 1], [], []>} : vector<8x32xbf16>, vector<32x96xbf16>, vector<8x96xf32> -> vector<8x96xf32>
    %c0_16 = arith.constant 0 : index
    %c0_17 = arith.constant 0 : index
    %31 = vector.load %arg6[%c0_16, %c0_17] : memref<1x96xf32, #tpu.memory_space<vmem>>, vector<1x96xf32>
    %32 = vector.broadcast %31 : vector<1x96xf32> to vector<8x96xf32>
    %33 = arith.addf %30, %32 : vector<8x96xf32>
    %34 = vector.shape_cast %33 : vector<8x96xf32> to vector<8x12x8xf32>
    %35 = tpu.transpose %34, [1, 0, 2] : vector<8x12x8xf32> -> vector<12x8x8xf32>
    %36 = arith.truncf %35 : vector<12x8x8xf32> to vector<12x8x8xbf16>
    %37 = vector.extract_strided_slice %36 {offsets = [0, 0, 0], sizes = [4, 8, 8], strides = [1, 1, 1]} : vector<12x8x8xbf16> to vector<4x8x8xbf16>
    %38 = vector.extract_strided_slice %36 {offsets = [4, 0, 0], sizes = [4, 8, 8], strides = [1, 1, 1]} : vector<12x8x8xbf16> to vector<4x8x8xbf16>
    %39 = vector.extract_strided_slice %36 {offsets = [8, 0, 0], sizes = [4, 8, 8], strides = [1, 1, 1]} : vector<12x8x8xbf16> to vector<4x8x8xbf16>
    %c0_18 = arith.constant 0 : index
    %c0_19 = arith.constant 0 : index
    %40 = vector.load %arg7[%c0_18, %c0_19] : memref<32x32xbf16, #tpu.memory_space<vmem>>, vector<32x32xbf16>
    %c0_20 = arith.constant 0 : index
    %c0_21 = arith.constant 0 : index
    %41 = vector.load %arg8[%c0_20, %c0_21] : memref<1x32xf32, #tpu.memory_space<vmem>>, vector<1x32xf32>
    %cst_22 = arith.constant 0xFF800000 : f32
    %42 = vector.broadcast %cst_22 : f32 to vector<4x8x1xf32>
    %cst_23 = arith.constant 0.000000e+00 : f32
    %43 = vector.broadcast %cst_23 : f32 to vector<4x8x1xf32>
    %cst_24 = arith.constant 0.000000e+00 : f32
    %44 = vector.broadcast %cst_24 : f32 to vector<4x8x8xf32>
    %cst_25 = arith.constant dense<0.000000e+00> : vector<4x8x8xf32>
    %45 = tpu.matmul %37, %38, %cst_25 {dimension_numbers = #tpu.dot_dimension_numbers<[2], [2], [1], [1], [0, 0, 0, 1, 1, 1], [0], [0]>} : vector<4x8x8xbf16>, vector<4x8x8xbf16>, vector<4x8x8xf32> -> vector<4x8x8xf32>
    %46 = tpu.iota {dimensions = array<i32: 0>} : vector<8x8xi32>
    %47 = tpu.iota {dimensions = array<i32: 1>} : vector<8x8xi32>
    %c0_i32 = arith.constant 0 : i32
    %48 = vector.broadcast %c0_i32 : i32 to vector<8x8xi32>
    %49 = arith.addi %48, %47 : vector<8x8xi32>
    %50 = arith.cmpi sle, %49, %46 : vector<8x8xi32>
    %51 = vector.shape_cast %50 : vector<8x8xi1> to vector<1x8x8xi1>
    %cst_26 = arith.constant 0xFF800000 : f32
    %52 = vector.shape_cast %51 : vector<1x8x8xi1> to vector<1x8x8xi1>
    %53 = vector.broadcast %52 : vector<1x8x8xi1> to vector<4x8x8xi1>
    %54 = vector.broadcast %cst_26 : f32 to vector<4x8x8xf32>
    %55 = arith.select %53, %45, %54 : vector<4x8x8xi1>, vector<4x8x8xf32>
    %cst_27 = arith.constant dense<0xFF800000> : vector<4x8xf32>
    %56 = vector.multi_reduction <maximumf>, %55, %cst_27 [2] : vector<4x8x8xf32> to vector<4x8xf32>
    %57 = vector.shape_cast %56 : vector<4x8xf32> to vector<4x8x1xf32>
    %58 = arith.maximumf %42, %57 : vector<4x8x1xf32>
    %59 = arith.subf %42, %58 : vector<4x8x1xf32>
    %60 = math.exp %59 : vector<4x8x1xf32>
    %61 = vector.broadcast %58 : vector<4x8x1xf32> to vector<4x8x8xf32>
    %62 = arith.subf %55, %61 : vector<4x8x8xf32>
    %63 = math.exp %62 : vector<4x8x8xf32>
    %64 = arith.mulf %60, %43 : vector<4x8x1xf32>
    %cst_28 = arith.constant dense<0.000000e+00> : vector<4x8xf32>
    %65 = vector.multi_reduction <add>, %63, %cst_28 [2] : vector<4x8x8xf32> to vector<4x8xf32>
    %66 = vector.shape_cast %65 : vector<4x8xf32> to vector<4x8x1xf32>
    %67 = arith.addf %64, %66 : vector<4x8x1xf32>
    %68 = vector.broadcast %60 : vector<4x8x1xf32> to vector<4x8x8xf32>
    %69 = arith.mulf %68, %44 : vector<4x8x8xf32>
    %70 = arith.truncf %63 : vector<4x8x8xf32> to vector<4x8x8xbf16>
    %cst_29 = arith.constant dense<0.000000e+00> : vector<4x8x8xf32>
    %71 = tpu.matmul %70, %39, %cst_29 {dimension_numbers = #tpu.dot_dimension_numbers<[2], [1], [1], [2], [0, 0, 0, 1, 1, 2], [0], [0]>} : vector<4x8x8xbf16>, vector<4x8x8xbf16>, vector<4x8x8xf32> -> vector<4x8x8xf32>
    %72 = arith.addf %69, %71 : vector<4x8x8xf32>
    %73 = tpu.reciprocal %67 {approx = true} : vector<4x8x1xf32> -> vector<4x8x1xf32>
    %74 = vector.broadcast %73 : vector<4x8x1xf32> to vector<4x8x8xf32>
    %75 = arith.mulf %72, %74 : vector<4x8x8xf32>
    %76 = tpu.transpose %75, [1, 0, 2] : vector<4x8x8xf32> -> vector<8x4x8xf32>
    %77 = vector.shape_cast %76 : vector<8x4x8xf32> to vector<8x32xf32>
    %78 = arith.truncf %77 : vector<8x32xf32> to vector<8x32xbf16>
    %cst_30 = arith.constant dense<0.000000e+00> : vector<8x32xf32>
    %79 = tpu.matmul %78, %40, %cst_30 {dimension_numbers = #tpu.dot_dimension_numbers<[1], [0], [0], [1], [0, 0, 1, 1], [], []>} : vector<8x32xbf16>, vector<32x32xbf16>, vector<8x32xf32> -> vector<8x32xf32>
    %80 = vector.broadcast %41 : vector<1x32xf32> to vector<8x32xf32>
    %81 = arith.addf %79, %80 : vector<8x32xf32>
    %82 = arith.addf %1, %81 : vector<8x32xf32>
    %c0_31 = arith.constant 0 : index
    %c0_32 = arith.constant 0 : index
    %83 = vector.load %arg9[%c0_31, %c0_32] : memref<1x32xf32, #tpu.memory_space<vmem>>, vector<1x32xf32>
    %c0_33 = arith.constant 0 : index
    %c0_34 = arith.constant 0 : index
    %84 = vector.load %arg10[%c0_33, %c0_34] : memref<1x32xf32, #tpu.memory_space<vmem>>, vector<1x32xf32>
    %cst_35 = arith.constant dense<0.000000e+00> : vector<8xf32>
    %85 = vector.multi_reduction <add>, %82, %cst_35 [1] : vector<8x32xf32> to vector<8xf32>
    %86 = vector.shape_cast %85 : vector<8xf32> to vector<8x1xf32>
    %cst_36 = arith.constant 3.200000e+01 : f32
    %87 = vector.broadcast %cst_36 : f32 to vector<8x1xf32>
    %88 = arith.divf %86, %87 : vector<8x1xf32>
    %89 = vector.broadcast %88 : vector<8x1xf32> to vector<8x32xf32>
    %90 = arith.subf %82, %89 : vector<8x32xf32>
    %91 = arith.mulf %90, %90 : vector<8x32xf32>
    %cst_37 = arith.constant dense<0.000000e+00> : vector<8xf32>
    %92 = vector.multi_reduction <add>, %91, %cst_37 [1] : vector<8x32xf32> to vector<8xf32>
    %93 = vector.shape_cast %92 : vector<8xf32> to vector<8x1xf32>
    %cst_38 = arith.constant 3.200000e+01 : f32
    %94 = vector.broadcast %cst_38 : f32 to vector<8x1xf32>
    %95 = arith.divf %93, %94 : vector<8x1xf32>
    %96 = vector.broadcast %88 : vector<8x1xf32> to vector<8x32xf32>
    %97 = arith.subf %82, %96 : vector<8x32xf32>
    %cst_39 = arith.constant 9.99999974E-6 : f32
    %98 = vector.broadcast %cst_39 : f32 to vector<8x1xf32>
    %99 = arith.addf %95, %98 : vector<8x1xf32>
    %100 = math.rsqrt %99 : vector<8x1xf32>
    %101 = vector.broadcast %100 : vector<8x1xf32> to vector<8x32xf32>
    %102 = arith.mulf %97, %101 : vector<8x32xf32>
    %103 = vector.broadcast %83 : vector<1x32xf32> to vector<8x32xf32>
    %104 = arith.mulf %102, %103 : vector<8x32xf32>
    %105 = vector.broadcast %84 : vector<1x32xf32> to vector<8x32xf32>
    %106 = arith.addf %104, %105 : vector<8x32xf32>
    %107 = arith.truncf %106 : vector<8x32xf32> to vector<8x32xbf16>
    %c0_40 = arith.constant 0 : index
    %c0_41 = arith.constant 0 : index
    %108 = vector.load %arg11[%c0_40, %c0_41] : memref<32x32xbf16, #tpu.memory_space<vmem>>, vector<32x32xbf16>
    %cst_42 = arith.constant dense<0.000000e+00> : vector<8x32xf32>
    %109 = tpu.matmul %107, %108, %cst_42 {dimension_numbers = #tpu.dot_dimension_numbers<[1], [0], [0], [1], [0, 0, 1, 1], [], []>} : vector<8x32xbf16>, vector<32x32xbf16>, vector<8x32xf32> -> vector<8x32xf32>
    %c0_43 = arith.constant 0 : index
    %c0_44 = arith.constant 0 : index
    %110 = vector.load %arg12[%c0_43, %c0_44] : memref<1x32xf32, #tpu.memory_space<vmem>>, vector<1x32xf32>
    %111 = vector.broadcast %110 : vector<1x32xf32> to vector<8x32xf32>
    %112 = arith.addf %109, %111 : vector<8x32xf32>
    %113 = arith.truncf %3 : vector<8x32xf32> to vector<8x32xbf16>
    %c0_45 = arith.constant 0 : index
    %c0_46 = arith.constant 0 : index
    %114 = vector.load %arg13[%c0_45, %c0_46] : memref<32x64xbf16, #tpu.memory_space<vmem>>, vector<32x64xbf16>
    %cst_47 = arith.constant dense<0.000000e+00> : vector<8x64xf32>
    %115 = tpu.matmul %113, %114, %cst_47 {dimension_numbers = #tpu.dot_dimension_numbers<[1], [0], [0], [1], [0, 0, 1, 1], [], []>} : vector<8x32xbf16>, vector<32x64xbf16>, vector<8x64xf32> -> vector<8x64xf32>
    %c0_48 = arith.constant 0 : index
    %c0_49 = arith.constant 0 : index
    %116 = vector.load %arg14[%c0_48, %c0_49] : memref<1x64xf32, #tpu.memory_space<vmem>>, vector<1x64xf32>
    %117 = vector.broadcast %116 : vector<1x64xf32> to vector<8x64xf32>
    %118 = arith.addf %115, %117 : vector<8x64xf32>
    %119 = vector.shape_cast %112 : vector<8x32xf32> to vector<8x4x8xf32>
    %120 = tpu.transpose %119, [1, 0, 2] : vector<8x4x8xf32> -> vector<4x8x8xf32>
    %121 = arith.truncf %120 : vector<4x8x8xf32> to vector<4x8x8xbf16>
    %122 = vector.shape_cast %118 : vector<8x64xf32> to vector<8x8x8xf32>
    %123 = tpu.transpose %122, [1, 0, 2] : vector<8x8x8xf32> -> vector<8x8x8xf32>
    %124 = arith.truncf %123 : vector<8x8x8xf32> to vector<8x8x8xbf16>
    %125 = vector.extract_strided_slice %124 {offsets = [0, 0, 0], sizes = [4, 8, 8], strides = [1, 1, 1]} : vector<8x8x8xbf16> to vector<4x8x8xbf16>
    %126 = vector.extract_strided_slice %124 {offsets = [4, 0, 0], sizes = [4, 8, 8], strides = [1, 1, 1]} : vector<8x8x8xbf16> to vector<4x8x8xbf16>
    %c0_50 = arith.constant 0 : index
    %c0_51 = arith.constant 0 : index
    %127 = vector.load %arg15[%c0_50, %c0_51] : memref<32x32xbf16, #tpu.memory_space<vmem>>, vector<32x32xbf16>
    %c0_52 = arith.constant 0 : index
    %c0_53 = arith.constant 0 : index
    %128 = vector.load %arg16[%c0_52, %c0_53] : memref<1x32xf32, #tpu.memory_space<vmem>>, vector<1x32xf32>
    %cst_54 = arith.constant 0xFF800000 : f32
    %129 = vector.broadcast %cst_54 : f32 to vector<4x8x1xf32>
    %cst_55 = arith.constant 0.000000e+00 : f32
    %130 = vector.broadcast %cst_55 : f32 to vector<4x8x1xf32>
    %cst_56 = arith.constant 0.000000e+00 : f32
    %131 = vector.broadcast %cst_56 : f32 to vector<4x8x8xf32>
    %cst_57 = arith.constant dense<0.000000e+00> : vector<4x8x8xf32>
    %132 = tpu.matmul %121, %125, %cst_57 {dimension_numbers = #tpu.dot_dimension_numbers<[2], [2], [1], [1], [0, 0, 0, 1, 1, 1], [0], [0]>} : vector<4x8x8xbf16>, vector<4x8x8xbf16>, vector<4x8x8xf32> -> vector<4x8x8xf32>
    %cst_58 = arith.constant dense<0xFF800000> : vector<4x8xf32>
    %133 = vector.multi_reduction <maximumf>, %132, %cst_58 [2] : vector<4x8x8xf32> to vector<4x8xf32>
    %134 = vector.shape_cast %133 : vector<4x8xf32> to vector<4x8x1xf32>
    %135 = arith.maximumf %129, %134 : vector<4x8x1xf32>
    %136 = arith.subf %129, %135 : vector<4x8x1xf32>
    %137 = math.exp %136 : vector<4x8x1xf32>
    %138 = vector.broadcast %135 : vector<4x8x1xf32> to vector<4x8x8xf32>
    %139 = arith.subf %132, %138 : vector<4x8x8xf32>
    %140 = math.exp %139 : vector<4x8x8xf32>
    %141 = arith.mulf %137, %130 : vector<4x8x1xf32>
    %cst_59 = arith.constant dense<0.000000e+00> : vector<4x8xf32>
    %142 = vector.multi_reduction <add>, %140, %cst_59 [2] : vector<4x8x8xf32> to vector<4x8xf32>
    %143 = vector.shape_cast %142 : vector<4x8xf32> to vector<4x8x1xf32>
    %144 = arith.addf %141, %143 : vector<4x8x1xf32>
    %145 = vector.broadcast %137 : vector<4x8x1xf32> to vector<4x8x8xf32>
    %146 = arith.mulf %145, %131 : vector<4x8x8xf32>
    %147 = arith.truncf %140 : vector<4x8x8xf32> to vector<4x8x8xbf16>
    %cst_60 = arith.constant dense<0.000000e+00> : vector<4x8x8xf32>
    %148 = tpu.matmul %147, %126, %cst_60 {dimension_numbers = #tpu.dot_dimension_numbers<[2], [1], [1], [2], [0, 0, 0, 1, 1, 2], [0], [0]>} : vector<4x8x8xbf16>, vector<4x8x8xbf16>, vector<4x8x8xf32> -> vector<4x8x8xf32>
    %149 = arith.addf %146, %148 : vector<4x8x8xf32>
    %150 = tpu.reciprocal %144 {approx = true} : vector<4x8x1xf32> -> vector<4x8x1xf32>
    %151 = vector.broadcast %150 : vector<4x8x1xf32> to vector<4x8x8xf32>
    %152 = arith.mulf %149, %151 : vector<4x8x8xf32>
    %153 = tpu.transpose %152, [1, 0, 2] : vector<4x8x8xf32> -> vector<8x4x8xf32>
    %154 = vector.shape_cast %153 : vector<8x4x8xf32> to vector<8x32xf32>
    %155 = arith.truncf %154 : vector<8x32xf32> to vector<8x32xbf16>
    %cst_61 = arith.constant dense<0.000000e+00> : vector<8x32xf32>
    %156 = tpu.matmul %155, %127, %cst_61 {dimension_numbers = #tpu.dot_dimension_numbers<[1], [0], [0], [1], [0, 0, 1, 1], [], []>} : vector<8x32xbf16>, vector<32x32xbf16>, vector<8x32xf32> -> vector<8x32xf32>
    %157 = vector.broadcast %128 : vector<1x32xf32> to vector<8x32xf32>
    %158 = arith.addf %156, %157 : vector<8x32xf32>
    %159 = arith.addf %82, %158 : vector<8x32xf32>
    %c0_62 = arith.constant 0 : index
    %c0_63 = arith.constant 0 : index
    %160 = vector.load %arg17[%c0_62, %c0_63] : memref<1x32xf32, #tpu.memory_space<vmem>>, vector<1x32xf32>
    %c0_64 = arith.constant 0 : index
    %c0_65 = arith.constant 0 : index
    %161 = vector.load %arg18[%c0_64, %c0_65] : memref<1x32xf32, #tpu.memory_space<vmem>>, vector<1x32xf32>
    %cst_66 = arith.constant dense<0.000000e+00> : vector<8xf32>
    %162 = vector.multi_reduction <add>, %159, %cst_66 [1] : vector<8x32xf32> to vector<8xf32>
    %163 = vector.shape_cast %162 : vector<8xf32> to vector<8x1xf32>
    %cst_67 = arith.constant 3.200000e+01 : f32
    %164 = vector.broadcast %cst_67 : f32 to vector<8x1xf32>
    %165 = arith.divf %163, %164 : vector<8x1xf32>
    %166 = vector.broadcast %165 : vector<8x1xf32> to vector<8x32xf32>
    %167 = arith.subf %159, %166 : vector<8x32xf32>
    %168 = arith.mulf %167, %167 : vector<8x32xf32>
    %cst_68 = arith.constant dense<0.000000e+00> : vector<8xf32>
    %169 = vector.multi_reduction <add>, %168, %cst_68 [1] : vector<8x32xf32> to vector<8xf32>
    %170 = vector.shape_cast %169 : vector<8xf32> to vector<8x1xf32>
    %cst_69 = arith.constant 3.200000e+01 : f32
    %171 = vector.broadcast %cst_69 : f32 to vector<8x1xf32>
    %172 = arith.divf %170, %171 : vector<8x1xf32>
    %173 = vector.broadcast %165 : vector<8x1xf32> to vector<8x32xf32>
    %174 = arith.subf %159, %173 : vector<8x32xf32>
    %cst_70 = arith.constant 9.99999974E-6 : f32
    %175 = vector.broadcast %cst_70 : f32 to vector<8x1xf32>
    %176 = arith.addf %172, %175 : vector<8x1xf32>
    %177 = math.rsqrt %176 : vector<8x1xf32>
    %178 = vector.broadcast %177 : vector<8x1xf32> to vector<8x32xf32>
    %179 = arith.mulf %174, %178 : vector<8x32xf32>
    %180 = vector.broadcast %160 : vector<1x32xf32> to vector<8x32xf32>
    %181 = arith.mulf %179, %180 : vector<8x32xf32>
    %182 = vector.broadcast %161 : vector<1x32xf32> to vector<8x32xf32>
    %183 = arith.addf %181, %182 : vector<8x32xf32>
    %184 = arith.truncf %183 : vector<8x32xf32> to vector<8x32xbf16>
    %c0_71 = arith.constant 0 : index
    %c0_72 = arith.constant 0 : index
    %185 = vector.load %arg19[%c0_71, %c0_72] : memref<32x128xbf16, #tpu.memory_space<vmem>>, vector<32x128xbf16>
    %cst_73 = arith.constant dense<0.000000e+00> : vector<8x128xf32>
    %186 = tpu.matmul %184, %185, %cst_73 {dimension_numbers = #tpu.dot_dimension_numbers<[1], [0], [0], [1], [0, 0, 1, 1], [], []>} : vector<8x32xbf16>, vector<32x128xbf16>, vector<8x128xf32> -> vector<8x128xf32>
    %c0_74 = arith.constant 0 : index
    %c0_75 = arith.constant 0 : index
    %187 = vector.load %arg20[%c0_74, %c0_75] : memref<1x128xf32, #tpu.memory_space<vmem>>, vector<1x128xf32>
    %188 = vector.broadcast %187 : vector<1x128xf32> to vector<8x128xf32>
    %189 = arith.addf %186, %188 : vector<8x128xf32>
    %cst_76 = arith.constant 0.000000e+00 : f32
    %190 = vector.broadcast %cst_76 : f32 to vector<8x128xf32>
    %191 = arith.maximumf %189, %190 : vector<8x128xf32>
    %192 = arith.truncf %191 : vector<8x128xf32> to vector<8x128xbf16>
    %c0_77 = arith.constant 0 : index
    %c0_78 = arith.constant 0 : index
    %193 = vector.load %arg21[%c0_77, %c0_78] : memref<128x32xbf16, #tpu.memory_space<vmem>>, vector<128x32xbf16>
    %cst_79 = arith.constant dense<0.000000e+00> : vector<8x32xf32>
    %194 = tpu.matmul %192, %193, %cst_79 {dimension_numbers = #tpu.dot_dimension_numbers<[1], [0], [0], [1], [0, 0, 1, 1], [], []>} : vector<8x128xbf16>, vector<128x32xbf16>, vector<8x32xf32> -> vector<8x32xf32>
    %195 = arith.addf %159, %194 : vector<8x32xf32>
    %c0_80 = arith.constant 0 : index
    %c0_81 = arith.constant 0 : index
    %196 = vector.load %arg22[%c0_80, %c0_81] : memref<1x32xf32, #tpu.memory_space<vmem>>, vector<1x32xf32>
    %197 = vector.broadcast %196 : vector<1x32xf32> to vector<8x32xf32>
    %198 = arith.addf %195, %197 : vector<8x32xf32>
    %c0_82 = arith.constant 0 : index
    %c0_83 = arith.constant 0 : index
    %c0_84 = arith.constant 0 : index
    %199 = vector.load %arg23[%c0_82, %c0_83, %c0_84] : memref<1x8x32xf32, #tpu.memory_space<vmem>>, vector<1x8x32xf32>
    %200 = vector.shape_cast %199 : vector<1x8x32xf32> to vector<8x32xf32>
    %201 = vector.shape_cast %198 : vector<8x32xf32> to vector<1x8x32xf32>
    tpu.vector_store %arg23[%c0_82, %c0_83, %c0_84], %201 {strides = array<i32>} : memref<1x8x32xf32, #tpu.memory_space<vmem>>, vector<1x8x32xf32>,
    return
  }
  func.func @transform_0(%arg0: i32) -> (i32, i32, i32) {
    %c0_i32 = arith.constant 0 : i32
    %c0_i32_0 = arith.constant 0 : i32
    %c0_i32_1 = arith.constant 0 : i32
    return %arg0, %c0_i32, %c0_i32_0 : i32, i32, i32
  }
  func.func @transform_1(%arg0: i32) -> (i32, i32, i32) {
    %c0_i32 = arith.constant 0 : i32
    %c0_i32_0 = arith.constant 0 : i32
    %c0_i32_1 = arith.constant 0 : i32
    return %arg0, %c0_i32, %c0_i32_0 : i32, i32, i32
  }
  func.func @transform_2(%arg0: i32) -> (i32, i32) {
    %c0_i32 = arith.constant 0 : i32
    %c0_i32_0 = arith.constant 0 : i32
    %c0_i32_1 = arith.constant 0 : i32
    return %c0_i32, %c0_i32_0 : i32, i32
  }
  func.func @transform_3(%arg0: i32) -> (i32, i32) {
    %c0_i32 = arith.constant 0 : i32
    %c0_i32_0 = arith.constant 0 : i32
    %c0_i32_1 = arith.constant 0 : i32
    return %c0_i32, %c0_i32_0 : i32, i32
  }
  func.func @transform_4(%arg0: i32) -> (i32, i32) {
    %c0_i32 = arith.constant 0 : i32
    %c0_i32_0 = arith.constant 0 : i32
    %c0_i32_1 = arith.constant 0 : i32
    return %c0_i32, %c0_i32_0 : i32, i32
  }
  func.func @transform_5(%arg0: i32) -> (i32, i32) {
    %c0_i32 = arith.constant 0 : i32
    %c0_i32_0 = arith.constant 0 : i32
    %c0_i32_1 = arith.constant 0 : i32
    return %c0_i32, %c0_i32_0 : i32, i32
  }
  func.func @transform_6(%arg0: i32) -> (i32, i32) {
    %c0_i32 = arith.constant 0 : i32
    %c0_i32_0 = arith.constant 0 : i32
    %c0_i32_1 = arith.constant 0 : i32
    return %c0_i32, %c0_i32_0 : i32, i32
  }
  func.func @transform_7(%arg0: i32) -> (i32, i32) {
    %c0_i32 = arith.constant 0 : i32
    %c0_i32_0 = arith.constant 0 : i32
    %c0_i32_1 = arith.constant 0 : i32
    return %c0_i32, %c0_i32_0 : i32, i32
  }
  func.func @transform_8(%arg0: i32) -> (i32, i32) {
    %c0_i32 = arith.constant 0 : i32
    %c0_i32_0 = arith.constant 0 : i32
    %c0_i32_1 = arith.constant 0 : i32
    return %c0_i32, %c0_i32_0 : i32, i32
  }
  func.func @transform_9(%arg0: i32) -> (i32, i32) {
    %c0_i32 = arith.constant 0 : i32
    %c0_i32_0 = arith.constant 0 : i32
    %c0_i32_1 = arith.constant 0 : i32
    return %c0_i32, %c0_i32_0 : i32, i32
  }
  func.func @transform_10(%arg0: i32) -> (i32, i32) {
    %c0_i32 = arith.constant 0 : i32
    %c0_i32_0 = arith.constant 0 : i32
    %c0_i32_1 = arith.constant 0 : i32
    return %c0_i32, %c0_i32_0 : i32, i32
  }
  func.func @transform_11(%arg0: i32) -> (i32, i32) {
    %c0_i32 = arith.constant 0 : i32
    %c0_i32_0 = arith.constant 0 : i32
    %c0_i32_1 = arith.constant 0 : i32
    return %c0_i32, %c0_i32_0 : i32, i32
  }
  func.func @transform_12(%arg0: i32) -> (i32, i32) {
    %c0_i32 = arith.constant 0 : i32
    %c0_i32_0 = arith.constant 0 : i32
    %c0_i32_1 = arith.constant 0 : i32
    return %c0_i32, %c0_i32_0 : i32, i32
  }
  func.func @transform_13(%arg0: i32) -> (i32, i32) {
    %c0_i32 = arith.constant 0 : i32
    %c0_i32_0 = arith.constant 0 : i32
    %c0_i32_1 = arith.constant 0 : i32
    return %c0_i32, %c0_i32_0 : i32, i32
  }
  func.func @transform_14(%arg0: i32) -> (i32, i32) {
    %c0_i32 = arith.constant 0 : i32
    %c0_i32_0 = arith.constant 0 : i32
    %c0_i32_1 = arith.constant 0 : i32
    return %c0_i32, %c0_i32_0 : i32, i32
  }
  func.func @transform_15(%arg0: i32) -> (i32, i32) {
    %c0_i32 = arith.constant 0 : i32
    %c0_i32_0 = arith.constant 0 : i32
    %c0_i32_1 = arith.constant 0 : i32
    return %c0_i32, %c0_i32_0 : i32, i32
  }
  func.func @transform_16(%arg0: i32) -> (i32, i32) {
    %c0_i32 = arith.constant 0 : i32
    %c0_i32_0 = arith.constant 0 : i32
    %c0_i32_1 = arith.constant 0 : i32
    return %c0_i32, %c0_i32_0 : i32, i32
  }
  func.func @transform_17(%arg0: i32) -> (i32, i32) {
    %c0_i32 = arith.constant 0 : i32
    %c0_i32_0 = arith.constant 0 : i32
    %c0_i32_1 = arith.constant 0 : i32
    return %c0_i32, %c0_i32_0 : i32, i32
  }
  func.func @transform_18(%arg0: i32) -> (i32, i32) {
    %c0_i32 = arith.constant 0 : i32
    %c0_i32_0 = arith.constant 0 : i32
    %c0_i32_1 = arith.constant 0 : i32
    return %c0_i32, %c0_i32_0 : i32, i32
  }
  func.func @transform_19(%arg0: i32) -> (i32, i32) {
    %c0_i32 = arith.constant 0 : i32
    %c0_i32_0 = arith.constant 0 : i32
    %c0_i32_1 = arith.constant 0 : i32
    return %c0_i32, %c0_i32_0 : i32, i32
  }
  func.func @transform_20(%arg0: i32) -> (i32, i32) {
    %c0_i32 = arith.constant 0 : i32
    %c0_i32_0 = arith.constant 0 : i32
    %c0_i32_1 = arith.constant 0 : i32
    return %c0_i32, %c0_i32_0 : i32, i32
  }
  func.func @transform_21(%arg0: i32) -> (i32, i32) {
    %c0_i32 = arith.constant 0 : i32
    %c0_i32_0 = arith.constant 0 : i32
    %c0_i32_1 = arith.constant 0 : i32
    return %c0_i32, %c0_i32_0 : i32, i32
  }
  func.func @transform_22(%arg0: i32) -> (i32, i32, i32) {
    %c0_i32 = arith.constant 0 : i32
    %c0_i32_0 = arith.constant 0 : i32
    %c0_i32_1 = arith.constant 0 : i32
    return %arg0, %c0_i32, %c0_i32_0 : i32, i32, i32
  }
}

</mosaic_0001>

<bundles_post_ra>
// kernel: tpu_custom_call.1
= control target key start
LH: loop header
LB: loop body
LE: loop exit
PB: predicated region body
PF: predicated region fallthrough
CT: control target
= control target key end

     0   :  { %s5686_s0 = inlined_call_operand.vmem [shape: f32[2,8,32], index: 0, kind: input, shape index: {}]   ;;  %s5687_s1 = inlined_call_operand.vmem [shape: f32[2,8,32], index: 1, kind: input, shape index: {}]   ;;  %s5688_s2 = inlined_call_operand.hbm [shape: f32[1,32], index: 2, kind: input, shape index: {}]   ;;  %s5689_s3 = inlined_call_operand.hbm [shape: f32[1,32], index: 3, kind: input, shape index: {}]   ;;  %s5690_s4 = inlined_call_operand.vmem [shape: bf16[32,96], index: 4, kind: input, shape index: {}]   ;;  %s5691_s5 = inlined_call_operand.hbm [shape: f32[1,96], index: 5, kind: input, shape index: {}]   ;;  %s5692_s6 = inlined_call_operand.vmem [shape: bf16[32,32], index: 6, kind: input, shape index: {}]   ;;  %s5693_s7 = inlined_call_operand.hbm [shape: f32[1,32], index: 7, kind: input, shape index: {}]   ;;  %s5694_s8 = inlined_call_operand.hbm [shape: f32[1,32], index: 8, kind: input, shape index: {}]   ;;  %s5695_s9 = inlined_call_operand.hbm [shape: f32[1,32], index: 9, kind: input, shape index: {}]   ;;  %s5696_s10 = inlined_call_operand.vmem [shape: bf16[32,32], index: 10, kind: input, shape index: {}]   ;;  %s5697_s11 = inlined_call_operand.hbm [shape: f32[1,32], index: 11, kind: input, shape index: {}]   ;;  %s5698_s12 = inlined_call_operand.vmem [shape: bf16[32,64], index: 12, kind: input, shape index: {}]   ;;  %s5699_s13 = inlined_call_operand.hbm [shape: f32[1,64], index: 13, kind: input, shape index: {}]   ;;  %s5700_s14 = inlined_call_operand.hbm [shape: bf16[32,32], index: 14, kind: input, shape index: {}]   ;;  %s5701_s15 = inlined_call_operand.hbm [shape: f32[1,32], index: 15, kind: input, shape index: {}]   ;;  %s5702_s16 = inlined_call_operand.hbm [shape: f32[1,32], index: 16, kind: input, shape index: {}]   ;;  %s5703_s17 = inlined_call_operand.hbm [shape: f32[1,32], index: 17, kind: input, shape index: {}]   ;;  %s5704_s18 = inlined_call_operand.hbm [shape: bf16[32,128], index: 18, kind: input, shape index: {}]   ;;  %s5705_s19 = inlined_call_operand.vmem [shape: f32[1,128], index: 19, kind: input, shape index: {}]   ;;  %s5706_s20 = inlined_call_operand.vmem [shape: bf16[128,32], index: 20, kind: input, shape index: {}]   ;;  %s5707_s21 = inlined_call_operand.vmem [shape: f32[1,32], index: 21, kind: input, shape index: {}]   ;;  %s5708_s22 = inlined_call_operand.hbm [shape: f32[2,8,32], index: 22, kind: output, shape index: {}]  }
   0x1   :  { %5730 = sst [smem:[#allocation38_spill]] %s5686_s0 }
   0x2   :  { %5731 = sst [smem:[#allocation39_spill]] %s5687_s1 }
   0x3   :  { %5732 = sst [smem:[#allocation40_spill]] %s5688_s2 }
   0x4   :  { %5733 = sst [smem:[#allocation41_spill]] %s5689_s3 }
   0x5   :  { %5734 = sst [smem:[#allocation42_spill]] %s5690_s4 }
   0x6   :  { %5735 = sst [smem:[#allocation43_spill]] %s5691_s5 }
   0x7   :  { %5736 = sst [smem:[#allocation44_spill]] %s5692_s6 }
   0x8   :  { %5737 = sst [smem:[#allocation45_spill]] %s5693_s7 }
   0x9   :  { %5738 = sst [smem:[#allocation46_spill]] %s5708_s22 }
   0xa   :  { %27 = vsyncpa [#allocation3], 0 }
   0xb   :  { %28 = vsyncpa [#allocation6], 0 }
   0xc   :  { %29 = vsyncpa [#allocation9], 0 }
   0xd   :  { %30 = vsyncpa [#allocation12], 0 }
   0xe   :  { %31 = vsyncpa [#allocation15], 0 }
   0xf   :  { %32 = vsyncpa [#allocation18], 0 }
  0x10   :  { %33 = vsyncpa [#allocation21], 0 }
  0x11   :  { %34 = vsyncpa [#allocation4], 0 }
  0x12   :  { %36 = vsyncpa [#allocation4 + $0x1], 0  ;;  %s4969_s3 = smov 0   ;;  %s4971_s28 = smov 0  }
  0x13   :  { %s4973_s29 = smov 0   ;;  %s4975_s30 = smov 0  }
  0x14 LB: > { %5739 = sst [smem:[#allocation32_spill]] %s4806_s3  ;;  %s4990_s4 = sadd.s32 4294967295, %s4818_s30   ;;  %s4818_s30 = sphi %s4975_s30, %s5789_s30   ;;  %s4814_s29 = sphi %s4973_s29, %s5791_s29   ;;  %s4810_s28 = sphi %s4971_s28, %s5793_s28   ;;  %s4806_s3 = sphi %s4969_s3, %s5792_s3  }
  0x15   : > { %5740 = sst [smem:[#allocation33_spill]] %s4814_s29  ;;  %s3789_s0 = sadd.s32 4294967294, %s4818_s30  }
  0x16   : > { %5741 = sst [smem:[#allocation34_spill]] %s4818_s30  ;;  %s4994_s23 = sadd.s32 1, %s4818_s30  }
  0x17   : > { %5742 = sst [smem:[#allocation35_spill]] %s4994_s23  ;;  %s521_s1 = sadd.s32 1, %s4814_s29 }
  0x18   : > { %s518_s5 = ssub.s32 %s4818_s30, %s4994_s23  ;;  %p531_p0 = scmp.ne.s32.totalorder %s4814_s29, %s4810_s28 }
  0x19   : > { %p519_p1 = scmp.eq.s32.totalorder %s518_s5, 0  ;;  %p532_p2 = scmp.eq.s32.totalorder %s4990_s4, 1 }
  0x1a   : > { %p537_p3 = scmp.ne.s32.totalorder %s4810_s28, %s4806_s3  ;;  %p538_p4 = scmp.eq.s32.totalorder %s3789_s0, 1 }
  0x1b   : > { %s5005_s24 = scalar_select %p519_p1, %s4814_s29, %s521_s1  }
  0x1c   : > { %p5007_p5 = por %p532_p2, %p531_p0  ;;  %p5011_p6 = por %p538_p4, %p537_p3 }
  0x1d   : > { %5743 = sst [smem:[#allocation36_spill]] %s5005_s24  ;;  %p3790_p7 = scmp.ge.s32.totalorder %s4818_s30, 1 }
  0x1e   : > { %s5744_s6 = scalar_select %p5007_p5, 1, 0 }
  0x1f   : > { %s5745_s25 = scalar_select %p5011_p6, 1, 0 }
  0x20   : > { %p545_p8 = scmp.lt.s32.totalorder %s4818_s30, 3  ;;  %p5717_p9 = scmp.eq.s32.totalorder %s4990_s4, 0 }
  0x21   : > { %5746 = sst [smem:[#allocation37_spill]] %s5745_s25  ;;  %s4820_s2 = smov [#allocation5]  }
  0x22   : > { %p5018_p10 = pnand %p3790_p7, %p545_p8  ;;  %s569_s27 = sshll.u32 %s4820_s2, 4  ;;  %s570_s27 = int_to_ptr.vmem [resolvable:$true] %s569_s27 }
  0x23   : > { %s4821_s0 = smov [#allocation8]   ;;  %s4822_s24 = smov [#allocation11]  }
  0x24   : > { %s5747_s26 = scalar_select %p5018_p10, 1, 0 }
  0x25   : > { %p4182_p11 = pneg %p5018_p10  ;;  %s597_s1 = sshll.u32 %s4821_s0, 4  ;;  %s598_s1 = int_to_ptr.vmem [resolvable:$true] %s597_s1 }
  0x26   : > { %s619_s29 = sshll.u32 %s4822_s24, 4  ;;  %s4403_s2 = scalar_lea.vmem %s570_s27, 16  ;;  %s5030_s29 = int_to_ptr.vmem [resolvable:$true] %s619_s29 }
  0x27   : > { %p5026_p12 = pnand %p5717_p9, %p4182_p11  ;;  %p4404_p0 = scmp.ne.s32.totalorder %s570_s27, %s4403_s2 }
  0x28   : > { %s4410_s0 = scalar_lea.vmem %s570_s27, 32  ;;  %p4411_p3 = scmp.lt.s32.totalorder %s570_s27, %s570_s27 }
  0x29   : > { %p5034_p13 = pneg %p5026_p12  ;;  %p4412_p4 = scmp.lt.s32.totalorder %s4410_s0, %s4403_s2 }
  0x2b   : > { %p4406_p1 = pnand %p4404_p0, %p5034_p13  ;;  %p4413_p7 = por %p4412_p4, %p4411_p3 }
  0x2d   : > { %p4407_p2 = pneg %p4406_p1 }
  0x2f   : > { %p4414_p8 = pnand %p4413_p7, %p4407_p2 }
  0x31   : > { %4417 = shalt.err (!%p4414_p8)
}
  0x32   : > { %s5750_s3 = sld [smem:[#allocation41_spill]]  ;;  %s4429_s30 = scalar_lea.vmem %s598_s1, 16 }
  0x33   : > { %p4430_p11 = scmp.ne.s32.totalorder %s598_s1, %s4429_s30  ;;  %s4436_s22 = scalar_lea.vmem %s598_s1, 32 }
  0x34   : > { %p4437_p0 = scmp.lt.s32.totalorder %s598_s1, %s598_s1  ;;  %p4438_p1 = scmp.lt.s32.totalorder %s4436_s22, %s4429_s30 }
  0x35   : > { %p4432_p9 = pnand %p4430_p11, %p5034_p13 }
  0x36   : > { %p4439_p5 = por %p4438_p1, %p4437_p0 }
  0x37   : > { %p4433_p6 = pneg %p4432_p9 }
  0x38   : > { %4188 = dma.hbm_to_vmem [thread:$0]  (!%p5026_p12), %s5750_s3, 16, %s570_s27, [#allocation6]  }
  0x39   : > { %p4440_p10 = pnand %p4439_p5, %p4433_p6 }
  0x3b   : > { %4443 = shalt.err (!%p4440_p10)
}
  0x3c   : > { %s5751_s7 = sld [smem:[#allocation45_spill]]  ;;  %s4455_s3 = scalar_lea.vmem %s5030_s29, 16 }
  0x3d   : > { %p4456_p2 = scmp.ne.s32.totalorder %s5030_s29, %s4455_s3  ;;  %s4462_s22 = scalar_lea.vmem %s5030_s29, 32 }
  0x3e   : > { %p4463_p5 = scmp.lt.s32.totalorder %s5030_s29, %s5030_s29  ;;  %p4464_p6 = scmp.lt.s32.totalorder %s4462_s22, %s4455_s3 }
  0x3f   : > { %p4458_p9 = pnand %p4456_p2, %p5034_p13 }
  0x40   : > { %p4465_p10 = por %p4464_p6, %p4463_p5 }
  0x41   : > { %p4459_p3 = pneg %p4458_p9 }
  0x42   : > { %4194 = dma.hbm_to_vmem [thread:$0]  (!%p5026_p12), %s5751_s7, 16, %s598_s1, [#allocation9]  }
  0x43   : > { %p4466_p4 = pnand %p4465_p10, %p4459_p3 }
  0x45   : > { %4469 = shalt.err (!%p4466_p4)
}
  0x46   : > { %4200 = dma.hbm_to_vmem [thread:$0]  (!%p5026_p12), %s5695_s9, 16, %s5030_s29, [#allocation12]  }
  0x47   : > { %s4823_s27 = smov [#allocation14]   ;;  %s4824_s24 = smov [#allocation17]  }
  0x48   : > { %s647_s1 = sshll.u32 %s4823_s27, 4  ;;  %s671_s2 = sshll.u32 %s4824_s24, 4  ;;  %s648_s1 = int_to_ptr.vmem [resolvable:$true] %s647_s1  ;;  %s672_s2 = int_to_ptr.vmem [resolvable:$true] %s671_s2 }
  0x49   : > { %s4481_s0 = scalar_lea.vmem %s648_s1, 16  ;;  %s4488_s3 = scalar_lea.vmem %s648_s1, 32 }
  0x4a   : > { %p4482_p7 = scmp.ne.s32.totalorder %s648_s1, %s4481_s0  ;;  %p4489_p0 = scmp.lt.s32.totalorder %s648_s1, %s648_s1 }
  0x4b   : > { %p4490_p1 = scmp.lt.s32.totalorder %s4488_s3, %s4481_s0 }
  0x4c   : > { %p4484_p8 = pnand %p4482_p7, %p5034_p13 }
  0x4d   : > { %p4491_p2 = por %p4490_p1, %p4489_p0 }
  0x4e   : > { %p4485_p11 = pneg %p4484_p8 }
  0x50   : > { %p4492_p9 = pnand %p4491_p2, %p4485_p11 }
  0x52   : > { %4495 = shalt.err (!%p4492_p9)
}
  0x53   : > { %4206 = dma.hbm_to_vmem [thread:$0]  (!%p5026_p12), %s5699_s13, 16, %s648_s1, [#allocation15]  }
  0x54   : > { %s4507_s30 = scalar_lea.vmem %s672_s2, 16  ;;  %s4514_s25 = scalar_lea.vmem %s672_s2, 32 }
  0x55   : > { %p4508_p3 = scmp.ne.s32.totalorder %s672_s2, %s4507_s30  ;;  %p4515_p10 = scmp.lt.s32.totalorder %s672_s2, %s672_s2 }
  0x56   : > { %p4516_p4 = scmp.lt.s32.totalorder %s4514_s25, %s4507_s30 }
  0x57   : > { %p4510_p5 = pnand %p4508_p3, %p5034_p13 }
  0x58   : > { %p4517_p7 = por %p4516_p4, %p4515_p10 }
  0x59   : > { %p4511_p6 = pneg %p4510_p5 }
  0x5b   : > { %p4518_p8 = pnand %p4517_p7, %p4511_p6 }
  0x5d   : > { %4521 = shalt.err (!%p4518_p8)
}
  0x5e   : > { %4212 = dma.hbm_to_vmem [thread:$0]  (!%p5026_p12), %s5701_s15, 16, %s672_s2, [#allocation18]  }
  0x5f   : > { %s4825_s1 = smov [#allocation20]   ;;  %s4826_s3 = smov [#allocation2]  }
  0x60   : > { %s693_s0 = sshll.u32 %s4825_s1, 4  ;;  %s558_s22 = sshll.u32 %s4826_s3, 4  ;;  %s694_s0 = int_to_ptr.vmem [resolvable:$true] %s693_s0  ;;  %s559_s22 = int_to_ptr.vmem [resolvable:$true] %s558_s22 }
  0x61   : > { %s4533_s29 = scalar_lea.vmem %s694_s0, 16  ;;  %s4540_s30 = scalar_lea.vmem %s694_s0, 32 }
  0x62   : > { %p4534_p11 = scmp.ne.s32.totalorder %s694_s0, %s4533_s29  ;;  %p4541_p2 = scmp.lt.s32.totalorder %s694_s0, %s694_s0 }
  0x63   : > { %p4542_p9 = scmp.lt.s32.totalorder %s4540_s30, %s4533_s29 }
  0x64   : > { %p4536_p0 = pnand %p4534_p11, %p5034_p13 }
  0x65   : > { %p4543_p3 = por %p4542_p9, %p4541_p2 }
  0x66   : > { %p4537_p1 = pneg %p4536_p0 }
  0x68   : > { %p4544_p5 = pnand %p4543_p3, %p4537_p1 }
  0x6a   : > { %4547 = shalt.err (!%p4544_p5)
}
  0x6b   : > { %4218 = dma.hbm_to_vmem [thread:$0]  (!%p5026_p12), %s5703_s17, 16, %s694_s0, [#allocation21]  }
  0x6c   : > { %s4559_s27 = scalar_lea.vmem %s559_s22, 16  ;;  %s4566_s24 = scalar_lea.vmem %s559_s22, 32 }
  0x6d   : > { %p4560_p6 = scmp.ne.s32.totalorder %s559_s22, %s4559_s27  ;;  %p4567_p7 = scmp.lt.s32.totalorder %s559_s22, %s559_s22 }
  0x6e   : > { %p4568_p8 = scmp.lt.s32.totalorder %s4566_s24, %s4559_s27 }
  0x6f   : > { %p4562_p10 = pnand %p4560_p6, %p5034_p13 }
  0x70   : > { %p4569_p11 = por %p4568_p8, %p4567_p7 }
  0x71   : > { %p4563_p4 = pneg %p4562_p10 }
  0x73   : > { %p4570_p0 = pnand %p4569_p11, %p4563_p4 }
  0x75   : > { %4573 = shalt.err (!%p4570_p0)
}
  0x76   : > { %s5752_s29 = sld [smem:[#allocation40_spill]]  ;;  %s4827_s0 = smov [#allocation7]  }
  0x77   : > { %s583_s30 = sshll.u32 %s4827_s0, 4  ;;  %s4828_s25 = smov [#allocation10]   ;;  %s584_s30 = int_to_ptr.vmem [resolvable:$true] %s583_s30 }
  0x78   : > { %s608_s2 = sshll.u32 %s4828_s25, 4  ;;  %s4585_s7 = scalar_lea.vmem %s584_s30, 16  ;;  %s609_s2 = int_to_ptr.vmem [resolvable:$true] %s608_s2 }
  0x79   : > { %p4586_p1 = scmp.ne.s32.totalorder %s584_s30, %s4585_s7  ;;  %s4592_s27 = scalar_lea.vmem %s584_s30, 32 }
  0x7a   : > { %p4593_p3 = scmp.lt.s32.totalorder %s584_s30, %s584_s30  ;;  %p4594_p5 = scmp.lt.s32.totalorder %s4592_s27, %s4585_s7 }
  0x7b   : > { %p4588_p2 = pnand %p4586_p1, %p5034_p13 }
  0x7c   : > { %4185 = dma.hbm_to_vmem [thread:$0]  (!%p5026_p12), %s5752_s29, 16, %s559_s22, [#allocation3]  }
  0x7d   : > { %p4589_p9 = pneg %p4588_p2  ;;  %p4595_p6 = por %p4594_p5, %p4593_p3 }
  0x7f   : > { %p4596_p10 = pnand %p4595_p6, %p4589_p9 }
  0x81   : > { %4599 = shalt.err (!%p4596_p10)
}
  0x82   : > { %s5753_s1 = sld [smem:[#allocation43_spill]]  ;;  %s4611_s3 = scalar_lea.vmem %s609_s2, 16 }
  0x83   : > { %p4612_p4 = scmp.ne.s32.totalorder %s609_s2, %s4611_s3  ;;  %s4618_s29 = scalar_lea.vmem %s609_s2, 32 }
  0x84   : > { %p4619_p11 = scmp.lt.s32.totalorder %s609_s2, %s609_s2  ;;  %p4620_p0 = scmp.lt.s32.totalorder %s4618_s29, %s4611_s3 }
  0x85   : > { %p4614_p7 = pnand %p4612_p4, %p5034_p13 }
  0x86   : > { %p4621_p1 = por %p4620_p0, %p4619_p11 }
  0x87   : > { %p4615_p8 = pneg %p4614_p7 }
  0x88   : > { %4191 = dma.hbm_to_vmem [thread:$0]  (!%p5026_p12), %s5753_s1, 16, %s584_s30, [#allocation6]  }
  0x89   : > { %p4622_p2 = pnand %p4621_p1, %p4615_p8 }
  0x8b   : > { %4625 = shalt.err (!%p4622_p2)
}
  0x8c   : > { %4197 = dma.hbm_to_vmem [thread:$0]  (!%p5026_p12), %s5694_s8, 16, %s609_s2, [#allocation9]  }
  0x8d   : > { %s4829_s30 = smov [#allocation13]   ;;  %s4830_s27 = smov [#allocation16]  }
  0x8e   : > { %s633_s25 = sshll.u32 %s4829_s30, 4  ;;  %s657_s24 = sshll.u32 %s4830_s27, 4  ;;  %s634_s25 = int_to_ptr.vmem [resolvable:$true] %s633_s25  ;;  %s658_s24 = int_to_ptr.vmem [resolvable:$true] %s657_s24 }
  0x8f   : > { %s4637_s22 = scalar_lea.vmem %s634_s25, 16  ;;  %s4644_s1 = scalar_lea.vmem %s634_s25, 32 }
  0x90   : > { %p4638_p9 = scmp.ne.s32.totalorder %s634_s25, %s4637_s22  ;;  %p4645_p6 = scmp.lt.s32.totalorder %s634_s25, %s634_s25 }
  0x91   : > { %p4646_p10 = scmp.lt.s32.totalorder %s4644_s1, %s4637_s22 }
  0x92   : > { %p4640_p3 = pnand %p4638_p9, %p5034_p13 }
  0x93   : > { %p4647_p4 = por %p4646_p10, %p4645_p6 }
  0x94   : > { %p4641_p5 = pneg %p4640_p3 }
  0x96   : > { %p4648_p7 = pnand %p4647_p4, %p4641_p5 }
  0x98   : > { %4651 = shalt.err (!%p4648_p7)
}
  0x99   : > { %4203 = dma.hbm_to_vmem [thread:$0]  (!%p5026_p12), %s5697_s11, 16, %s634_s25, [#allocation12]  }
  0x9a   : > { %s4663_s29 = scalar_lea.vmem %s658_s24, 256  ;;  %p4671_p1 = scmp.lt.s32.totalorder %s658_s24, %s658_s24 }
  0x9b   : > { %p4664_p8 = scmp.ne.s32.totalorder %s658_s24, %s4663_s29  ;;  %p4672_p2 = scmp.lt.s32.totalorder %s4663_s29, %s4663_s29 }
  0x9d   : > { %p4666_p11 = pnand %p4664_p8, %p5034_p13  ;;  %p4673_p9 = por %p4672_p2, %p4671_p1 }
  0x9f   : > { %p4667_p0 = pneg %p4666_p11 }
  0xa1   : > { %p4674_p3 = pnand %p4673_p9, %p4667_p0 }
  0xa3   : > { %4677 = shalt.err (!%p4674_p3)
}
  0xa4   : > { %s4831_s7 = smov 64   ;;  %s4832_s0 = smov 4  }
  0xa5   : > { %4209 = dma.hbm_to_vmem [thread:$0]  (!%p5026_p12), %s5700_s14, 256, %s658_s24, [#allocation15], %s4831_s7, %s4831_s7, %s4832_s0  }
  0xa6   : > { %s4833_s27 = smov [#allocation19]   ;;  %s4834_s1 = smov [#allocation22]  }
  0xa7   : > { %s682_s22 = sshll.u32 %s4833_s27, 4  ;;  %s703_s3 = sshll.u32 %s4834_s1, 4  ;;  %s683_s22 = int_to_ptr.vmem [resolvable:$true] %s682_s22  ;;  %s704_s3 = int_to_ptr.vmem [resolvable:$true] %s703_s3 }
  0xa8   : > { %s4689_s2 = scalar_lea.vmem %s683_s22, 16  ;;  %s4696_s29 = scalar_lea.vmem %s683_s22, 32 }
  0xa9   : > { %p4690_p5 = scmp.ne.s32.totalorder %s683_s22, %s4689_s2  ;;  %p4697_p4 = scmp.lt.s32.totalorder %s683_s22, %s683_s22 }
  0xaa   : > { %p4698_p7 = scmp.lt.s32.totalorder %s4696_s29, %s4689_s2 }
  0xab   : > { %p4692_p6 = pnand %p4690_p5, %p5034_p13 }
  0xac   : > { %p4699_p8 = por %p4698_p7, %p4697_p4 }
  0xad   : > { %p4693_p10 = pneg %p4692_p6 }
  0xaf   : > { %p4700_p11 = pnand %p4699_p8, %p4693_p10 }
  0xb1   : > { %4703 = shalt.err (!%p4700_p11)
}
  0xb2   : > { %4215 = dma.hbm_to_vmem [thread:$0]  (!%p5026_p12), %s5702_s16, 16, %s683_s22, [#allocation18]  }
  0xb3   : > { %s4715_s25 = scalar_lea.vmem %s704_s3, 256  ;;  %p4723_p9 = scmp.lt.s32.totalorder %s704_s3, %s704_s3 }
  0xb4   : > { %p4716_p0 = scmp.ne.s32.totalorder %s704_s3, %s4715_s25  ;;  %p4724_p3 = scmp.lt.s32.totalorder %s4715_s25, %s4715_s25 }
  0xb6   : > { %p4718_p1 = pnand %p4716_p0, %p5034_p13  ;;  %p4725_p5 = por %p4724_p3, %p4723_p9 }
  0xb8   : > { %p4719_p2 = pneg %p4718_p1 }
  0xba   : > { %p4726_p6 = pnand %p4725_p5, %p4719_p2 }
  0xbc   : > { %4729 = shalt.err (!%p4726_p6)
}
  0xbd   : > { %4221 = dma.hbm_to_vmem [thread:$0]  (!%p5026_p12), %s5704_s18, 256, %s704_s3, [#allocation21], %s4831_s7, %s4831_s7, %s4832_s0  }
  0xbe   : > { %p5754_p10 = scmp.ne.s32.totalorder %s5747_s26, 0 }
  0xbf   : > { %p5755_p13 = scmp.eq.s32.totalorder (!%p5754_p10), %s4990_s4, 0 }
  0xc0   : > { %742 = sbr.rel (%p5754_p10) target bundleno = 4137 (0x1029), region = 108 }
  0xc5   : > { %4773 = dma.done.wait (%p5755_p13), [#allocation3], 16   ;;  %p5756_p4 = pmov %p5755_p13 }
  0xc7   : > { %4775 = vsyncadd (%p5756_p4), [#allocation3], 4294967280  ;;  %p5757_p7 = pmov %p5756_p4 }
  0xc8   : > { %p5758_p8 = pmov %p5756_p4 }
  0xc9   : > { %4777 = dma.done.wait (%p5757_p7), [#allocation6], 32  }
  0xca   : > { %4779 = vsyncadd (%p5758_p8), [#allocation6], 4294967264  ;;  %p5759_p11 = pmov %p5756_p4 }
  0xcb   : > { %p5760_p12 = pmov %p5756_p4 }
  0xcc   : > { %4781 = dma.done.wait (%p5759_p11), [#allocation9], 32  }
  0xcd   : > { %4783 = vsyncadd (%p5760_p12), [#allocation9], 4294967264  ;;  %p5761_p0 = pmov %p5756_p4 }
  0xcf   : > { %4785 = dma.done.wait (%p5761_p0), [#allocation12], 32   ;;  %p5762_p1 = pmov %p5761_p0 }
  0xd0   : > { %p5763_p2 = pmov %p5761_p0 }
  0xd1   : > { %4787 = vsyncadd (%p5762_p1), [#allocation12], 4294967264 }
  0xd2   : > { %4789 = dma.done.wait (%p5763_p2), [#allocation15], 272   ;;  %p5764_p9 = pmov %p5761_p0 }
  0xd3   : > { %p5765_p3 = pmov %p5761_p0 }
  0xd4   : > { %4791 = vsyncadd (%p5764_p9), [#allocation15], 4294967024 }
  0xd5   : > { %4793 = dma.done.wait (%p5765_p3), [#allocation18], 32   ;;  %p5766_p5 = pmov %p5761_p0 }
  0xd6   : > { %p5767_p6 = pmov %p5761_p0 }
  0xd7   : > { %4795 = vsyncadd (%p5766_p5), [#allocation18], 4294967264 }
  0xd8   : > { %4797 = dma.done.wait (%p5767_p6), [#allocation21], 272   ;;  %p5768_p10 = pmov %p5761_p0 }
  0xd9   : > { %p855_p13 = scmp.lt.s32.totalorder %s4990_s4, 1  ;;  %s5769_s0 = sld [smem:[#allocation38_spill]]  ;;  %vm868_vm0 = vcmask 261120   ;;  %v4835_v8 = vmov 0.0   ;;  %vm4836_vm1 = vmmov 0   ;;  %v1003_v28 = vlaneseq }
  0xda   : > { %4799 = vsyncadd (%p5768_p10), [#allocation21], 4294967024  ;;  %s5770_s29 = sld [smem:[#allocation42_spill]]  ;;  %3964 = vmatprep.subr.bf16.mxu1 %v4835_v8  ;;  %3968 = vmatprep.mubr.msk.bf16.mxu1 %vm4836_vm1, %v4835_v8  ;;  %v3822_v14 = vld [vmem:[#allocation2] ss:$0 sm:$0xff]  ;;  %s5725_s27 = smov 80  }
  0xdb   : > { %s5173_s23 = scalar_select %p855_p13, %s4990_s4, 1  ;;  %3990 = vmatprep.subr.bf16.mxu0 %v4835_v8  ;;  %3992 = vmatprep.mubr.msk.bf16.mxu0 %vm4836_vm1, %v4835_v8  ;;  %v3823_v16 = vld [vmem:[#allocation5] ss:$0 sm:$0xff]  ;;  %v3824_v20 = vld [vmem:[#allocation7] ss:$0 sm:$0xff]  ;;  %v5222_v33 = vshrl.u32 %v1003_v28, 7 }
  0xdc   : > { %s5726_s1 = smov 96   ;;  %s5727_s5 = smov 88   ;;  %v4845_v26 = vmov 1983009808   ;;  %v4846_v30 = vmov 1934713408  }
  0xdd   : > { %s3820_s26 = sshll.u32 %s5173_s23, 3  ;;  %s5724_s7 = smov 72   ;;  %v1001_v27 = vunpack.c.l.s4 %v4845_v26  ;;  %v1065_v31 = vunpack.c.l.s4 %v4846_v30  ;;  %vm1423_vm2 = vcmask 64512   ;;  %vm1682_vm4 = vcmask 1043456  }
  0xde   : > { %s5728_s3 = smov 104   ;;  %s4844_s2 = smov 64   ;;  %vm2025_vm5 = vcmask 130048   ;;  %vm2027_vm6 = vcmask 195584  }
  0xdf   : > { %s858_s22 = scalar_lea.vmem %s5769_s0, %s3820_s26  ;;  %s4841_s0 = smov 120   ;;  %v1002_v32 = vunpack.c.0.s8 %v1001_v27  ;;  %v1066_v36 = vunpack.c.0.s8 %v1065_v31 }
  0xe0   : > { %v5181_v0 = vld [vmem:[%s858_s22] sm:$0xff]  ;;  %s5771_s24 = smov %s5770_s29  ;;  %v4318_v7 = vld [vmem:[%s5770_s29 + $0x8] sm:$0xff]   ;;  %s4842_s22 = smov 112  }
  0xe1   : > { %v869_v1 = vsel %vm868_vm0, %v5181_v0, 0.0  ;;  %3965 = vmatpush3.bf16.msra.mxu1 %v4318_v7  ;;  %v4319_v9 = vld [vmem:[%s5771_s24] sm:$0xff]   ;;  %v5225_v37 = vsub.s32 %v1002_v32, %v5222_v33  ;;  %v5228_v43 = vsub.s32 %v1066_v36, %v5222_v33  ;;  %s4847_s29 = smov 48   ;;  %s4848_s30 = smov 40  }
  0xe2   : > { %870 = vadd.xlane.f32.xlu0 %v869_v1  ;;  %3966 = vmatprep.subr.bf16.mxu1 %v4835_v8  ;;  %s4849_s25 = smov 56   ;;  %p5784_p7 = scmp.ne.s32.totalorder %s5744_s6, 0 }
  0xe5   : > { %3967 = vmatpush3.bf16.msra.mxu1 %v4319_v9 }
  0xe6   : > { %3972 = vmatprep.subr.bf16.mxu1 %v4835_v8 }
 0x16b   : > { %v871_v2 = vpop.xlane.xlu0 %870 }
 0x16c   : > { %v873_v3 = vmul.f32 0.03125, %v871_v2 }
 0x16e   : > { %v874_v4 = vsub.f32 %v5181_v0, %v873_v3 }
 0x170   : > { %v875_v5 = vmul.f32 %v874_v4, %v874_v4 }
 0x172   : > { %v876_v6 = vsel %vm868_vm0, %v875_v5, 0.0 }
 0x173   : > { %877 = vadd.xlane.f32.xlu0 %v876_v6 }
 0x1fc   : > { %v878_v10 = vpop.xlane.xlu0 %877 }
 0x1fd   : > { %v879_v11 = vmul.f32 0.03125, %v878_v10 }
 0x1ff   : > { %v880_v12 = vadd.f32 1e-05, %v879_v11 }
 0x201   : > { %4338 = vrsqrt.f32 %v880_v12 }
 0x20e   : > { %v4339_v13 = vpop.eup %4338 }
 0x20f   : > { %v882_v15 = vmul.f32 %v4339_v13, %v874_v4 }
 0x211   : > { %v889_v17 = vmul.f32 %v3822_v14, %v882_v15 }
 0x213   : > { %v896_v18 = vadd.f32 %v3823_v16, %v889_v17 }
 0x215   : > { %v897_v19 = vpack.c.bf16 %v896_v18, %v896_v18 }
 0x217   : > { %3969 = vmatmul.mubr.msk.bf16.vlgmr.msra.gmra.mxu1 %vm868_vm0, %v897_v19 }
 0x218   : > { %3974 = vmatprep.mubr.msk.bf16.mxu1 %vm4836_vm1, %v4835_v8 }
 0x2d7   : > { %v958_v21 = vpop.f32.mrf.mxu1 }
 0x2d8   : > { %v5204_v22 = vadd.f32 %v3824_v20, %v958_v21 }
 0x2d9   : > { %v3970_v23 = vpop.f32.mrf.mxu1 }
 0x2da   : > { %980 = vrot.lane.b32.xlu0 %v5204_v22, %s5725_s27  ;;  %974 = vrot.lane.b32.xlu1 %v5204_v22, %s5726_s1  ;;  %s5783_s1 = sld [smem:[#allocation46_spill]] }
 0x2db   : > { %v961_v24 = vpop.f32.mrf.mxu1 }
 0x2dd   : > { %v3971_v25 = vpop.f32.mrf.mxu1 }
 0x2de   : > { %977 = vrot.lane.b32.xlu1 %v5204_v22, %s5727_s5  ;;  %s5775_s5 = smov 104  }
 0x2e2   : > { %983 = vrot.lane.b32.xlu1 %v5204_v22, %s5724_s7 }
 0x2e6   : > { %965 = vrot.lane.b32.xlu1 %v5204_v22, %s4841_s0 }
 0x2ea   : > { %968 = vrot.lane.b32.xlu1 %v5204_v22, %s4842_s22 }
 0x2ee   : > { %971 = vrot.lane.b32.xlu1 %v5204_v22, %s5728_s3  ;;  %s5777_s3 = smov 96  }
 0x2f2   : > { %986 = vrot.lane.b32.xlu1 %v5204_v22, %s4844_s2  ;;  %s5722_s2 = smov 8  }
 0x34c   : > { %v975_v29 = vpop.permute.xlu1 %974  ;;  %v981_v34 = vpop.permute.xlu0 %980 }
 0x34d   : > { %v1030_v38 = vcombine.low %v975_v29, %v981_v34  ;;  %v1031_v39 = vcombine.high %v975_v29, %v981_v34 }
 0x34f   : > { %v1038_v44 = vrot.slane %v1030_v38, %v5225_v37  ;;  %v1045_v45 = vrot.slane %v1031_v39, %v5225_v37 }
 0x350   : > { %v978_v35 = vpop.permute.xlu1 %977 }
 0x354   : > { %v984_v40 = vpop.permute.xlu1 %983 }
 0x355   : > { %v1046_v41 = vcombine.low %v978_v35, %v984_v40  ;;  %v1047_v42 = vcombine.high %v978_v35, %v984_v40 }
 0x357   : > { %v1054_v46 = vrot.slane %v1046_v41, %v5225_v37  ;;  %v1061_v47 = vrot.slane %v1047_v42, %v5225_v37 }
 0x358   : > { %v966_v48 = vpop.permute.xlu1 %965 }
 0x359   : > { %v1094_v49 = vcombine.low %v1038_v44, %v1054_v46  ;;  %v1095_v50 = vcombine.high %v1038_v44, %v1054_v46  ;;  %v1110_v51 = vcombine.low %v1045_v45, %v1061_v47  ;;  %v1111_v52 = vcombine.high %v1045_v45, %v1061_v47 }
 0x35b   : > { %v1102_v53 = vrot.slane %v1094_v49, %v5228_v43  ;;  %v1109_v54 = vrot.slane %v1095_v50, %v5228_v43  ;;  %v1118_v55 = vrot.slane %v1110_v51, %v5228_v43  ;;  %v1125_v56 = vrot.slane %v1111_v52, %v5228_v43 }
 0x35c   : > { %v969_v57 = vpop.permute.xlu1 %968 }
 0x35d   : > { %v3829_v58 = vcombine.low %v1102_v53, %v1109_v54  ;;  %v3831_v59 = vcombine.high %v1102_v53, %v1109_v54  ;;  %v3833_v60 = vcombine.low %v1118_v55, %v1125_v56  ;;  %v3835_v61 = vcombine.high %v1118_v55, %v1125_v56 }
 0x35e   : > { %v998_v62 = vcombine.low %v5204_v22, %v969_v57  ;;  %v999_v63 = vcombine.high %v5204_v22, %v969_v57 }
 0x35f   : > { %v1217_v1 = vrot.slane %v3829_v58, %v5225_v37  ;;  %v1233_v2 = vrot.slane %v3831_v59, %v5225_v37  ;;  %v1249_v3 = vrot.slane %v3833_v60, %v5225_v37  ;;  %v1265_v4 = vrot.slane %v3835_v61, %v5225_v37 }
 0x360   : > { %v972_v5 = vpop.permute.xlu1 %971  ;;  %v1006_v11 = vrot.slane %v998_v62, %v5225_v37  ;;  %v1013_v12 = vrot.slane %v999_v63, %v5225_v37 }
 0x361   : > { %v1014_v6 = vcombine.low %v966_v48, %v972_v5  ;;  %v1015_v7 = vcombine.high %v966_v48, %v972_v5  ;;  %v1282_v9 = vcombine.low %v1217_v1, %v1233_v2  ;;  %v1314_v10 = vcombine.low %v1249_v3, %v1265_v4 }
 0x362   : > { %v1283_v13 = vcombine.high %v1217_v1, %v1233_v2  ;;  %v1315_v14 = vcombine.high %v1249_v3, %v1265_v4 }
 0x363   : > { %v1022_v15 = vrot.slane %v1014_v6, %v5225_v37  ;;  %v1029_v16 = vrot.slane %v1015_v7, %v5225_v37  ;;  %v1290_v17 = vrot.slane %v1282_v9, %v5228_v43  ;;  %v1322_v18 = vrot.slane %v1314_v10, %v5228_v43 }
 0x364   : > { %v1297_v19 = vrot.slane %v1283_v13, %v5228_v43  ;;  %v1329_v20 = vrot.slane %v1315_v14, %v5228_v43  ;;  %v1611_v7 = vand.u32 127, %v1003_v28 }
 0x365   : > { %v1062_v21 = vcombine.low %v1006_v11, %v1022_v15  ;;  %v1063_v23 = vcombine.high %v1006_v11, %v1022_v15  ;;  %v1078_v24 = vcombine.low %v1013_v12, %v1029_v16  ;;  %v1079_v25 = vcombine.high %v1013_v12, %v1029_v16 }
 0x366   : > { %v1334_v26 = vcombine.low %v1290_v17, %v1322_v18  ;;  %v1337_v27 = vcombine.high %v1297_v19, %v1329_v20  ;;  %v1335_v48 = vcombine.high %v1290_v17, %v1322_v18  ;;  %v1336_v63 = vcombine.low %v1297_v19, %v1329_v20 }
 0x367   : > { %v1070_v29 = vrot.slane %v1062_v21, %v5228_v43  ;;  %v1077_v30 = vrot.slane %v1063_v23, %v5228_v43  ;;  %v1086_v31 = vrot.slane %v1078_v24, %v5228_v43  ;;  %v1093_v32 = vrot.slane %v1079_v25, %v5228_v43 }
 0x368   : > { %v1410_v34 = vpack.c.bf16 %v1334_v26, %v1334_v26  ;;  %v1413_v35 = vpack.c.bf16 %v1337_v27, %v1337_v27  ;;  %v1411_v58 = vpack.c.bf16 %v1335_v48, %v1335_v48  ;;  %v1412_v2 = vpack.c.bf16 %v1336_v63, %v1336_v63 }
 0x369   : > { %v3828_v36 = vcombine.low %v1070_v29, %v1077_v30  ;;  %v3830_v38 = vcombine.high %v1070_v29, %v1077_v30  ;;  %v3832_v39 = vcombine.low %v1086_v31, %v1093_v32  ;;  %v3834_v40 = vcombine.high %v1086_v31, %v1093_v32 }
 0x36a   : > { %v1428_v41 = vsel %vm1423_vm2, %v1410_v34, 0  ;;  %v1566_v42 = vsel %vm1423_vm2, %v1413_v35, 0  ;;  %v1474_v62 = vsel %vm1423_vm2, %v1411_v58, 0  ;;  %v1520_v4 = vsel %vm1423_vm2, %v1412_v2, 0  ;;  %v987_v35 = vpop.permute.xlu1 %986 }
 0x36b   : > { %v1210_v44 = vrot.slane %v3828_v36, %v5225_v37  ;;  %v1226_v45 = vrot.slane %v3830_v38, %v5225_v37  ;;  %v1242_v46 = vrot.slane %v3832_v39, %v5225_v37  ;;  %v1258_v47 = vrot.slane %v3834_v40, %v5225_v37  ;;  %3973 = vmatpush3.bf16.xpose.msra.mxu1 %v1428_v41 }
 0x36c   : > { %3991 = vmatpush3.bf16.xpose.msra.mxu0 %v1566_v42  ;;  %3978 = vmatprep.subr.bf16.mxu1 %v4835_v8  ;;  %vm1612_vm3 = vcmp.le.s32.totalorder %v1611_v7, %v5222_v33 }
 0x36d   : > { %v1266_v49 = vcombine.low %v1210_v44, %v1226_v45  ;;  %v1298_v50 = vcombine.low %v1242_v46, %v1258_v47  ;;  %v1267_v51 = vcombine.high %v1210_v44, %v1226_v45  ;;  %v1299_v52 = vcombine.high %v1242_v46, %v1258_v47  ;;  %4002 = vmatprep.subr.bf16.mxu0 %v4835_v8 }
 0x36f   : > { %v1274_v53 = vrot.slane %v1266_v49, %v5228_v43  ;;  %v1306_v54 = vrot.slane %v1298_v50, %v5228_v43  ;;  %v1281_v55 = vrot.slane %v1267_v51, %v5228_v43  ;;  %v1313_v56 = vrot.slane %v1299_v52, %v5228_v43 }
 0x371   : > { %v1330_v57 = vcombine.low %v1274_v53, %v1306_v54  ;;  %v1333_v59 = vcombine.high %v1281_v55, %v1313_v56  ;;  %v1331_v1 = vcombine.high %v1274_v53, %v1306_v54  ;;  %v1332_v5 = vcombine.low %v1281_v55, %v1313_v56 }
 0x373   : > { %v1406_v60 = vpack.c.bf16 %v1330_v57, %v1330_v57  ;;  %v1409_v61 = vpack.c.bf16 %v1333_v59, %v1333_v59  ;;  %v1407_v3 = vpack.c.bf16 %v1331_v1, %v1331_v1  ;;  %v1408_v6 = vpack.c.bf16 %v1332_v5, %v1332_v5 }
 0x375   : > { %3975 = vmatmul.mubr.msk.bf16.vlgmr.msra.gmra.mxu1 %vm1423_vm2, %v1406_v60  ;;  %3993 = vmatmul.mubr.msk.bf16.vlgmr.msra.gmra.mxu0 %vm1423_vm2, %v1409_v61 }
 0x376   : > { %3979 = vmatpush3.bf16.xpose.msra.mxu1 %v1474_v62  ;;  %3980 = vmatprep.mubr.msk.bf16.mxu1 %vm4836_vm1, %v4835_v8 }
 0x377   : > { %3984 = vmatprep.subr.bf16.mxu1 %v4835_v8  ;;  %4004 = vmatprep.mubr.msk.bf16.mxu0 %vm4836_vm1, %v4835_v8 }
 0x37d   : > { %3981 = vmatmul.mubr.msk.bf16.vlgmr.msra.gmra.mxu1 %vm1423_vm2, %v1407_v3 }
 0x37e   : > { %3985 = vmatpush3.bf16.xpose.msra.mxu1 %v1520_v4  ;;  %3986 = vmatprep.mubr.msk.bf16.mxu1 %vm4836_vm1, %v4835_v8 }
 0x37f   : > { %3996 = vmatprep.subr.bf16.mxu1 %v4835_v8 }
 0x385   : > { %3987 = vmatmul.mubr.msk.bf16.vlgmr.msra.gmra.mxu1 %vm1423_vm2, %v1408_v6 }
 0x386   : > { %3998 = vmatprep.mubr.msk.bf16.mxu1 %vm4836_vm1, %v4835_v8 }
 0x435   : > { %v1464_v9 = vpop.f32.mrf.mxu1  ;;  %v1602_v10 = vpop.f32.mrf.mxu0 }
 0x436   : > { %v1615_v11 = vsel %vm1612_vm3, %v1464_v9, -inf  ;;  %v5297_v30 = vsel %vm1612_vm3, %v1602_v10, -inf }
 0x437   : > { %v3976_v12 = vpop.f32.mrf.mxu1  ;;  %v3994_v13 = vpop.f32.mrf.mxu0  ;;  %v1619_v14 = vsel %vm1423_vm2, %v1615_v11, -inf  ;;  %v1628_v31 = vsel %vm1423_vm2, %v5297_v30, -inf }
 0x438   : > { %1620 = vmax.xlane.f32.xlu1 %v1619_v14 }
 0x439   : > { %v1467_v15 = vpop.f32.mrf.mxu1  ;;  %v1605_v16 = vpop.f32.mrf.mxu0 }
 0x43b   : > { %v3977_v17 = vpop.f32.mrf.mxu1  ;;  %v3995_v18 = vpop.f32.mrf.mxu0 }
 0x43d   : > { %v1510_v19 = vpop.f32.mrf.mxu1 }
 0x43e   : > { %v1616_v28 = vsel %vm1612_vm3, %v1510_v19, -inf }
 0x43f   : > { %v3982_v20 = vpop.f32.mrf.mxu1  ;;  %v1622_v21 = vsel %vm1423_vm2, %v1616_v28, -inf }
 0x440   : > { %1623 = vmax.xlane.f32.xlu0 %v1622_v21 }
 0x441   : > { %v1513_v23 = vpop.f32.mrf.mxu1 }
 0x443   : > { %v3983_v24 = vpop.f32.mrf.mxu1 }
 0x445   : > { %v1556_v25 = vpop.f32.mrf.mxu1 }
 0x446   : > { %v5303_v32 = vsel %vm1612_vm3, %v1556_v25, -inf }
 0x447   : > { %v3988_v26 = vpop.f32.mrf.mxu1  ;;  %v1625_v34 = vsel %vm1423_vm2, %v5303_v32, -inf }
 0x449   : > { %992 = vrot.lane.b32.xlu1 %v5204_v22, %s4847_s29  ;;  %v1559_v27 = vpop.f32.mrf.mxu1  ;;  %s5721_s29 = smov 24  }
 0x44b   : > { %v3989_v29 = vpop.f32.mrf.mxu1 }
 0x44d   : > { %995 = vrot.lane.b32.xlu1 %v5204_v22, %s4848_s30  ;;  %s5772_s30 = sld [smem:[#allocation44_spill]] }
 0x456   : > { %989 = vrot.lane.b32.xlu0 %v5204_v22, %s4849_s25  ;;  %s5773_s25 = smov %s5772_s30 }
 0x471   : > { %1629 = vmax.xlane.f32.xlu1 %v1628_v31 }
 0x475   : > { %1626 = vmax.xlane.f32.xlu0 %v1625_v34 }
 0x4c1   : > { %v5307_v36 = vpop.xlane.xlu1 %1620 }
 0x4c2   : > { %v1643_v22 = vsub.f32 %v1615_v11, %v5307_v36 }
 0x4c4   : > { %v1647_v38 = vmul.f32 1.442695, %v1643_v22 }
 0x4c5   : > { %v993_v39 = vpop.permute.xlu1 %992 }
 0x4c6   : > { %4340 = vpow2.f32 %v1647_v38  ;;  %v1134_v33 = vcombine.low %v987_v35, %v993_v39  ;;  %v1135_v42 = vcombine.high %v987_v35, %v993_v39 }
 0x4c8   : > { %v1142_v49 = vrot.slane %v1134_v33, %v5225_v37  ;;  %v1149_v50 = vrot.slane %v1135_v42, %v5225_v37 }
 0x4c9   : > { %v5310_v40 = vpop.xlane.xlu0 %1623  ;;  %v996_v45 = vpop.permute.xlu1 %995 }
 0x4ca   : > { %v1644_v41 = vsub.f32 %v1616_v28, %v5310_v40 }
 0x4cc   : > { %v1649_v44 = vmul.f32 1.442695, %v1644_v41 }
 0x4cd   : > { %v990_v46 = vpop.permute.xlu0 %989 }
 0x4ce   : > { %v1150_v47 = vcombine.low %v990_v46, %v996_v45  ;;  %v1151_v48 = vcombine.high %v990_v46, %v996_v45  ;;  %4342 = vpow2.f32 %v1649_v44 }
 0x4d0   : > { %v1158_v51 = vrot.slane %v1150_v47, %v5225_v37  ;;  %v1165_v52 = vrot.slane %v1151_v48, %v5225_v37 }
 0x4d2   : > { %v1166_v53 = vcombine.low %v1142_v49, %v1158_v51  ;;  %v1167_v54 = vcombine.high %v1142_v49, %v1158_v51  ;;  %v1182_v55 = vcombine.low %v1149_v50, %v1165_v52  ;;  %v1183_v56 = vcombine.high %v1149_v50, %v1165_v52 }
 0x4d3   : > { %v4341_v57 = vpop.eup %4340 }
 0x4d4   : > { %v1174_v58 = vrot.slane %v1166_v53, %v5228_v43  ;;  %v1181_v59 = vrot.slane %v1167_v54, %v5228_v43  ;;  %v1190_v60 = vrot.slane %v1182_v55, %v5228_v43  ;;  %v1197_v61 = vrot.slane %v1183_v56, %v5228_v43 }
 0x4d5   : > { %v1659_v62 = vsel %vm1423_vm2, %v4341_v57, 0.0  ;;  %v1675_v31 = vpack.c.bf16 %v4341_v57, %v4341_v57  ;;  %v1632_v55 = vsub.f32 -inf, %v5310_v40  ;;  %v1631_v56 = vsub.f32 -inf, %v5307_v36 }
 0x4d6   : > { %v1338_v63 = vcombine.low %v1174_v58, %v1181_v59  ;;  %v3836_v1 = vcombine.high %v1174_v58, %v1181_v59  ;;  %v1354_v2 = vcombine.low %v1190_v60, %v1197_v61  ;;  %v3837_v3 = vcombine.high %v1190_v60, %v1197_v61  ;;  %1660 = vadd.xlane.f32.xlu0 %v1659_v62 }
 0x4d8   : > { %v1345_v4 = vrot.slane %v1338_v63, %v5225_v37  ;;  %v1353_v5 = vrot.slane %v3836_v1, %v5225_v37  ;;  %v1361_v6 = vrot.slane %v1354_v2, %v5225_v37  ;;  %v1369_v7 = vrot.slane %v3837_v3, %v5225_v37 }
 0x4d9   : > { %v1637_v63 = vmul.f32 1.442695, %v1632_v55  ;;  %v1635_v1 = vmul.f32 1.442695, %v1631_v56 }
 0x4da   : > { %v1370_v9 = vcombine.low %v1345_v4, %v1353_v5  ;;  %v1386_v10 = vcombine.low %v1361_v6, %v1369_v7  ;;  %v1371_v11 = vcombine.high %v1345_v4, %v1353_v5  ;;  %v1387_v12 = vcombine.high %v1361_v6, %v1369_v7 }
 0x4db   : > { %v4343_v13 = vpop.eup %4342 }
 0x4dc   : > { %v1378_v14 = vrot.slane %v1370_v9, %v5228_v43  ;;  %v1394_v15 = vrot.slane %v1386_v10, %v5228_v43  ;;  %v1385_v16 = vrot.slane %v1371_v11, %v5228_v43  ;;  %v1401_v17 = vrot.slane %v1387_v12, %v5228_v43 }
 0x4dd   : > { %v1662_v18 = vsel %vm1423_vm2, %v4343_v13, 0.0  ;;  %v1676_v34 = vpack.c.bf16 %v4343_v13, %v4343_v13 }
 0x4de   : > { %1663 = vadd.xlane.f32.xlu0 %v1662_v18  ;;  %v1402_v19 = vcombine.low %v1378_v14, %v1394_v15  ;;  %v1403_v28 = vcombine.high %v1378_v14, %v1394_v15  ;;  %v1404_v20 = vcombine.low %v1385_v16, %v1401_v17  ;;  %v1405_v21 = vcombine.high %v1385_v16, %v1401_v17 }
 0x4e0   : > { %v1414_v23 = vpack.c.bf16 %v1402_v19, %v1402_v19  ;;  %v1415_v24 = vpack.c.bf16 %v1403_v28, %v1403_v28  ;;  %v1416_v27 = vpack.c.bf16 %v1404_v20, %v1404_v20  ;;  %v1417_v29 = vpack.c.bf16 %v1405_v21, %v1405_v21 }
 0x4e2   : > { %v1684_v25 = vsel %vm1682_vm4, %v1414_v23, 0  ;;  %v1730_v26 = vsel %vm1682_vm4, %v1415_v24, 0  ;;  %v1776_v35 = vsel %vm1682_vm4, %v1416_v27, 0  ;;  %v1822_v22 = vsel %vm1682_vm4, %v1417_v29, 0 }
 0x4e3   : > { %3997 = vmatpush3.bf16.msra.mxu1 %v1684_v25  ;;  %4003 = vmatpush3.bf16.msra.mxu0 %v1730_v26 }
 0x4e4   : > { %4008 = vmatprep.subr.bf16.mxu1 %v4835_v8  ;;  %4014 = vmatprep.subr.bf16.mxu0 %v4835_v8 }
 0x4e6   : > { %3999 = vmatmul.mubr.msk.bf16.vlgmr.msra.gmra.mxu1 %vm1423_vm2, %v1675_v31  ;;  %4005 = vmatmul.mubr.msk.bf16.vlgmr.msra.gmra.mxu0 %vm1423_vm2, %v1676_v34 }
 0x4e7   : > { %4009 = vmatpush3.bf16.msra.mxu1 %v1776_v35  ;;  %4015 = vmatpush3.bf16.msra.mxu0 %v1822_v22 }
 0x4e8   : > { %4016 = vmatprep.mubr.msk.bf16.mxu0 %vm4836_vm1, %v4835_v8  ;;  %4010 = vmatprep.mubr.msk.bf16.mxu1 %vm4836_vm1, %v4835_v8 }
 0x4e9   : > { %4020 = vmatprep.subr.bf16.mxu1 %v4835_v8  ;;  %4028 = vmatprep.subr.bf16.mxu0 %v4835_v8 }
 0x4fa   : > { %v1630_v38 = vpop.xlane.xlu1 %1629 }
 0x4fb   : > { %v1646_v39 = vsub.f32 %v5297_v30, %v1630_v38  ;;  %v1634_v52 = vsub.f32 -inf, %v1630_v38 }
 0x4fd   : > { %v1653_v41 = vmul.f32 1.442695, %v1646_v39  ;;  %v1641_v59 = vmul.f32 1.442695, %v1634_v52 }
 0x4fe   : > { %v1627_v33 = vpop.xlane.xlu0 %1626 }
 0x4ff   : > { %v1645_v42 = vsub.f32 %v5303_v32, %v1627_v33  ;;  %4344 = vpow2.f32 %v1653_v41  ;;  %v4320_v32 = vld [vmem:[%s5772_s30 + $0x8] sm:$0xff]   ;;  %v1633_v60 = vsub.f32 -inf, %v1627_v33  ;;  %s5723_s30 = smov 16  }
 0x501   : > { %v1651_v44 = vmul.f32 1.442695, %v1645_v42  ;;  %v1639_v2 = vmul.f32 1.442695, %v1633_v60 }
 0x503   : > { %4346 = vpow2.f32 %v1651_v44 }
 0x504   : > { %4348 = vpow2.f32 %v1641_v59 }
 0x505   : > { %4350 = vpow2.f32 %v1637_v63 }
 0x506   : > { %4352 = vpow2.f32 %v1635_v1 }
 0x507   : > { %4354 = vpow2.f32 %v1639_v2 }
 0x50c   : > { %v4345_v45 = vpop.eup %4344 }
 0x50d   : > { %v1668_v46 = vsel %vm1423_vm2, %v4345_v45, 0.0  ;;  %v1678_v47 = vpack.c.bf16 %v4345_v45, %v4345_v45 }
 0x50e   : > { %1669 = vadd.xlane.f32.xlu0 %v1668_v46 }
 0x50f   : > { %4017 = vmatmul.mubr.msk.bf16.vlgmr.msra.gmra.mxu0 %vm1423_vm2, %v1678_v47 }
 0x510   : > { %v4347_v48 = vpop.eup %4346  ;;  %4032 = vmatprep.mubr.msk.bf16.mxu0 %vm4836_vm1, %v4835_v8 }
 0x511   : > { %v1665_v30 = vsel %vm1423_vm2, %v4347_v48, 0.0  ;;  %v1677_v49 = vpack.c.bf16 %v4347_v48, %v4347_v48  ;;  %v4349_v5 = vpop.eup %4348 }
 0x512   : > { %1666 = vadd.xlane.f32.xlu1 %v1665_v30  ;;  %v4351_v6 = vpop.eup %4350  ;;  %v1658_v36 = vmul.f32 0.0, %v4349_v5 }
 0x513   : > { %4011 = vmatmul.mubr.msk.bf16.vlgmr.msra.gmra.mxu1 %vm1423_vm2, %v1677_v49  ;;  %v4353_v7 = vpop.eup %4352  ;;  %v1656_v10 = vmul.f32 0.0, %v4351_v6 }
 0x514   : > { %4024 = vmatprep.mubr.msk.bf16.mxu1 %vm4836_vm1, %v4835_v8  ;;  %4021 = vmatpush3.bf16.msra.mxu1 %v4320_v32  ;;  %v4355_v9 = vpop.eup %4354  ;;  %v1655_v12 = vmul.f32 0.0, %v4353_v7 }
 0x515   : > { %4022 = vmatprep.subr.bf16.mxu1 %v4835_v8  ;;  %v1657_v15 = vmul.f32 0.0, %v4355_v9 }
 0x55f   : > { %v1661_v3 = vpop.xlane.xlu0 %1660 }
 0x560   : > { %v1671_v16 = vadd.f32 %v1661_v3, %v1655_v12 }
 0x567   : > { %v1664_v4 = vpop.xlane.xlu0 %1663 }
 0x568   : > { %v1672_v14 = vadd.f32 %v1664_v4, %v1656_v10 }
 0x597   : > { %v1670_v40 = vpop.xlane.xlu0 %1669 }
 0x598   : > { %v1674_v11 = vadd.f32 %v1670_v40, %v1658_v36 }
 0x59a   : > { %4356 = vrcp.f32 %v1674_v11 }
 0x59b   : > { %v1667_v13 = vpop.xlane.xlu1 %1666  ;;  %4358 = vrcp.f32 %v1672_v14 }
 0x59c   : > { %v1673_v17 = vadd.f32 %v1667_v13, %v1657_v15  ;;  %4360 = vrcp.f32 %v1671_v16 }
 0x59e   : > { %4362 = vrcp.f32 %v1673_v17 }
 0x5a6   : > { %v1720_v50 = vpop.f32.mrf.mxu1  ;;  %v1766_v51 = vpop.f32.mrf.mxu0 }
 0x5a7   : > { %v1865_v19 = vadd.f32 %v1766_v51, %v1656_v10  ;;  %v4357_v20 = vpop.eup %4356  ;;  %v1864_v23 = vadd.f32 %v1720_v50, %v1655_v12 }
 0x5a8   : > { %v4000_v53 = vpop.f32.mrf.mxu1  ;;  %v4006_v54 = vpop.f32.mrf.mxu0 }
 0x5a9   : > { %v4359_v25 = vpop.eup %4358  ;;  %v4321_v54 = vld [vmem:[%s5773_s25] sm:$0xff]  }
 0x5aa   : > { %v1723_v57 = vpop.f32.mrf.mxu1  ;;  %v1769_v58 = vpop.f32.mrf.mxu0  ;;  %v1873_v31 = vmul.f32 %v4359_v25, %v1865_v19  ;;  %4023 = vmatpush3.bf16.msra.mxu1 %v4321_v54  ;;  %v3852_v54 = vld [vmem:[#allocation10] ss:$0 sm:$0xff] }
 0x5ab   : > { %v4361_v29 = vpop.eup %4360  ;;  %4036 = vmatprep.subr.bf16.mxu1 %v4835_v8 }
 0x5ac   : > { %v4001_v61 = vpop.f32.mrf.mxu1  ;;  %v4007_v62 = vpop.f32.mrf.mxu0  ;;  %v1872_v39 = vmul.f32 %v4361_v29, %v1864_v23 }
 0x5ad   : > { %v4363_v35 = vpop.eup %4362 }
 0x5cf   : > { %v1858_v18 = vpop.f32.mrf.mxu0 }
 0x5d0   : > { %v1867_v28 = vadd.f32 %v1858_v18, %v1658_v36 }
 0x5d1   : > { %v4018_v21 = vpop.f32.mrf.mxu0 }
 0x5d2   : > { %v1875_v24 = vmul.f32 %v4357_v20, %v1867_v28  ;;  %v3848_v21 = vld [vmem:[#allocation8] ss:$0 sm:$0xff] }
 0x5d3   : > { %v1812_v26 = vpop.f32.mrf.mxu1  ;;  %v1861_v27 = vpop.f32.mrf.mxu0 }
 0x5d4   : > { %v1866_v34 = vadd.f32 %v1812_v26, %v1657_v15  ;;  %v1892_v41 = vcombine.low %v1873_v31, %v1875_v24  ;;  %v1893_v33 = vcombine.high %v1873_v31, %v1875_v24 }
 0x5d5   : > { %v4012_v22 = vpop.f32.mrf.mxu1  ;;  %v4019_v38 = vpop.f32.mrf.mxu0 }
 0x5d6   : > { %v1874_v42 = vmul.f32 %v4363_v35, %v1866_v34  ;;  %v1900_v48 = vrot.slane %v1892_v41, %v5225_v37  ;;  %v1907_v30 = vrot.slane %v1893_v33, %v5225_v37  ;;  %v4322_v34 = vld [vmem:[%s5698_s12 + $0x8] sm:$0xff]  }
 0x5d7   : > { %v1815_v44 = vpop.f32.mrf.mxu1 }
 0x5d8   : > { %v1876_v45 = vcombine.low %v1872_v39, %v1874_v42  ;;  %v1877_v46 = vcombine.high %v1872_v39, %v1874_v42  ;;  %v4324_v44 = vld [vmem:[%s5696_s10 + $0x8] sm:$0xff]  }
 0x5d9   : > { %v4013_v47 = vpop.f32.mrf.mxu1  ;;  %4029 = vmatpush3.bf16.msra.mxu0 %v4324_v44 }
 0x5da   : > { %v1884_v49 = vrot.slane %v1876_v45, %v5225_v37  ;;  %v1891_v32 = vrot.slane %v1877_v46, %v5225_v37  ;;  %v4325_v45 = vld [vmem:[%s5696_s10] sm:$0xff]   ;;  %4030 = vmatprep.subr.bf16.mxu0 %v4835_v8  ;;  %v3858_v46 = vld [vmem:[#allocation14] ss:$0 sm:$0xff] }
 0x5dc   : > { %v1908_v50 = vcombine.low %v1884_v49, %v1900_v48  ;;  %v1909_v51 = vcombine.high %v1884_v49, %v1900_v48  ;;  %v1924_v52 = vcombine.low %v1891_v32, %v1907_v30  ;;  %v1925_v53 = vcombine.high %v1891_v32, %v1907_v30 }
 0x5dd   : > { %4031 = vmatpush3.bf16.msra.mxu0 %v4325_v45  ;;  %v3854_v45 = vld [vmem:[#allocation13] ss:$0 sm:$0xff] }
 0x5de   : > { %v1916_v55 = vrot.slane %v1908_v50, %v5228_v43  ;;  %v1923_v56 = vrot.slane %v1909_v51, %v5228_v43  ;;  %v1932_v57 = vrot.slane %v1924_v52, %v5228_v43  ;;  %v1939_v58 = vrot.slane %v1925_v53, %v5228_v43  ;;  %4044 = vmatprep.subr.bf16.mxu0 %v4835_v8 }
 0x5e0   : > { %v1944_v59 = vcombine.low %v1916_v55, %v1923_v56  ;;  %v3846_v60 = vcombine.high %v1916_v55, %v1923_v56  ;;  %v1960_v61 = vcombine.low %v1932_v57, %v1939_v58  ;;  %v3847_v62 = vcombine.high %v1932_v57, %v1939_v58  ;;  %v3853_v56 = vld [vmem:[#allocation11] ss:$0 sm:$0xff] }
 0x5e2   : > { %v1951_v63 = vrot.slane %v1944_v59, %v5225_v37  ;;  %v1959_v1 = vrot.slane %v3846_v60, %v5225_v37  ;;  %v1967_v2 = vrot.slane %v1960_v61, %v5225_v37  ;;  %v1975_v3 = vrot.slane %v3847_v62, %v5225_v37 }
 0x5e4   : > { %v1977_v4 = vcombine.high %v1951_v63, %v1959_v1  ;;  %v1993_v5 = vcombine.high %v1967_v2, %v1975_v3  ;;  %v1976_v6 = vcombine.low %v1951_v63, %v1959_v1  ;;  %v1992_v40 = vcombine.low %v1967_v2, %v1975_v3 }
 0x5e6   : > { %v1991_v7 = vrot.slane %v1977_v4, %v5228_v43  ;;  %v2007_v36 = vrot.slane %v1993_v5, %v5228_v43  ;;  %v1984_v9 = vrot.slane %v1976_v6, %v5228_v43  ;;  %v2000_v10 = vrot.slane %v1992_v40, %v5228_v43 }
 0x5e8   : > { %v2010_v11 = vcombine.low %v1991_v7, %v2007_v36  ;;  %v2009_v12 = vcombine.high %v1984_v9, %v2000_v10  ;;  %v2011_v13 = vcombine.high %v1991_v7, %v2007_v36  ;;  %v2008_v14 = vcombine.low %v1984_v9, %v2000_v10 }
 0x5ea   : > { %2017 = vrot.lane.b32.xlu0 %v2010_v11, %s5723_s30  ;;  %2013 = vrot.lane.b32.xlu1 %v2009_v12, %s5722_s2  ;;  %s5774_s30 = sld [smem:[#allocation39_spill]]  ;;  %s5781_s2 = smov 8  }
 0x5ee   : > { %2021 = vrot.lane.b32.xlu1 %v2011_v13, %s5721_s29  ;;  %s5782_s29 = smov 24  }
 0x5f0   : > { %s862_s7 = scalar_lea.vmem %s5774_s30, %s3820_s26  ;;  %s5780_s30 = smov 16  }
 0x5f1   : > { %v865_v35 = vld [vmem:[%s862_s7] sm:$0xff]  ;;  %s5776_s7 = smov 88  }
 0x5f2   : > { %v2188_v22 = vpack.c.bf16 %v865_v35, %v865_v35 }
 0x65c   : > { %v2014_v15 = vpop.permute.xlu1 %2013  ;;  %v2018_v16 = vpop.permute.xlu0 %2017 }
 0x65d   : > { %v2024_v17 = vsel %vm1423_vm2, %v2008_v14, %v2014_v15 }
 0x65e   : > { %v2026_v19 = vsel %vm2025_vm5, %v2024_v17, %v2018_v16 }
 0x660   : > { %v2022_v18 = vpop.permute.xlu1 %2021 }
 0x661   : > { %v2028_v28 = vsel %vm2027_vm6, %v2026_v19, %v2022_v18 }
 0x662   : > { %v2029_v20 = vpack.c.bf16 %v2028_v28, %v2028_v28 }
 0x664   : > { %4025 = vmatmul.mubr.msk.bf16.vlgmr.msra.gmra.mxu1 %vm868_vm0, %v2029_v20 }
 0x665   : > { %4040 = vmatprep.mubr.msk.bf16.mxu1 %vm4836_vm1, %v4835_v8  ;;  %4037 = vmatpush3.bf16.msra.mxu1 %v4322_v34 }
 0x666   : > { %4038 = vmatprep.subr.bf16.mxu1 %v4835_v8 }
 0x724   : > { %v2085_v23 = vpop.f32.mrf.mxu1 }
 0x725   : > { %v2086_v24 = vadd.f32 %v3848_v21, %v2085_v23 }
 0x726   : > { %v4026_v25 = vpop.f32.mrf.mxu1 }
 0x727   : > { %v5391_v26 = vadd.f32 %v2086_v24, %v5181_v0  ;;  %v4323_v0 = vld [vmem:[%s5698_s12] sm:$0xff]  }
 0x728   : > { %v2088_v27 = vpop.f32.mrf.mxu1  ;;  %4039 = vmatpush3.bf16.msra.mxu1 %v4323_v0 }
 0x729   : > { %v2094_v29 = vsel %vm868_vm0, %v5391_v26, 0.0  ;;  %4050 = vmatprep.subr.bf16.mxu1 %v4835_v8 }
 0x72a   : > { %2095 = vadd.xlane.f32.xlu1 %v2094_v29  ;;  %v4027_v31 = vpop.f32.mrf.mxu1 }
 0x72b   : > { %4041 = vmatmul.mubr.msk.bf16.vlgmr.msra.gmra.mxu1 %vm868_vm0, %v2188_v22 }
 0x72c   : > { %4052 = vmatprep.mubr.msk.bf16.mxu1 %vm4836_vm1, %v4835_v8 }
 0x7b3   : > { %v2096_v38 = vpop.xlane.xlu1 %2095 }
 0x7b4   : > { %v2097_v39 = vmul.f32 0.03125, %v2096_v38 }
 0x7b6   : > { %v2098_v41 = vsub.f32 %v5391_v26, %v2097_v39 }
 0x7b8   : > { %v2099_v33 = vmul.f32 %v2098_v41, %v2098_v41 }
 0x7ba   : > { %v2100_v42 = vsel %vm868_vm0, %v2099_v33, 0.0 }
 0x7bb   : > { %2101 = vadd.xlane.f32.xlu0 %v2100_v42 }
 0x7eb   : > { %v2249_v47 = vpop.f32.mrf.mxu1 }
 0x7ec   : > { %v5421_v48 = vadd.f32 %v3858_v46, %v2249_v47 }
 0x7ed   : > { %v4042_v30 = vpop.f32.mrf.mxu1 }
 0x7ee   : > { %2409 = vrot.lane.b32.xlu1 %v5421_v48, %s4842_s22  ;;  %2406 = vrot.lane.b32.xlu0 %v5421_v48, %s4841_s0 }
 0x7ef   : > { %v2252_v49 = vpop.f32.mrf.mxu1 }
 0x7f1   : > { %v4043_v32 = vpop.f32.mrf.mxu1 }
 0x7f2   : > { %2412 = vrot.lane.b32.xlu1 %v5421_v48, %s5775_s5 }
 0x844   : > { %v2102_v50 = vpop.xlane.xlu0 %2101 }
 0x845   : > { %v2103_v51 = vmul.f32 0.03125, %v2102_v50 }
 0x847   : > { %v2104_v52 = vadd.f32 1e-05, %v2103_v51 }
 0x849   : > { %4364 = vrsqrt.f32 %v2104_v52 }
 0x856   : > { %v4365_v53 = vpop.eup %4364 }
 0x857   : > { %v2106_v55 = vmul.f32 %v4365_v53, %v2098_v41 }
 0x859   : > { %v2113_v57 = vmul.f32 %v3852_v54, %v2106_v55 }
 0x85b   : > { %v2120_v58 = vadd.f32 %v3853_v56, %v2113_v57 }
 0x85d   : > { %v2121_v59 = vpack.c.bf16 %v2120_v58, %v2120_v58 }
 0x85f   : > { %4033 = vmatmul.mubr.msk.bf16.vlgmr.msra.gmra.mxu0 %vm868_vm0, %v2121_v59 }
 0x860   : > { %4046 = vmatprep.mubr.msk.bf16.mxu0 %vm4836_vm1, %v4835_v8  ;;  %v2410_v60 = vpop.permute.xlu1 %2409  ;;  %v2407_v62 = vpop.permute.xlu0 %2406 }
 0x861   : > { %v2427_v63 = vcombine.low %v5421_v48, %v2410_v60  ;;  %v2428_v1 = vcombine.high %v5421_v48, %v2410_v60 }
 0x863   : > { %v2435_v4 = vrot.slane %v2427_v63, %v5225_v37  ;;  %v2442_v5 = vrot.slane %v2428_v1, %v5225_v37 }
 0x864   : > { %v2413_v61 = vpop.permute.xlu1 %2412 }
 0x865   : > { %v2443_v2 = vcombine.low %v2407_v62, %v2413_v61  ;;  %v2444_v3 = vcombine.high %v2407_v62, %v2413_v61 }
 0x867   : > { %v2451_v6 = vrot.slane %v2443_v2, %v5225_v37  ;;  %v2458_v40 = vrot.slane %v2444_v3, %v5225_v37 }
 0x869   : > { %v2491_v7 = vcombine.low %v2435_v4, %v2451_v6  ;;  %v2492_v36 = vcombine.high %v2435_v4, %v2451_v6  ;;  %v2507_v9 = vcombine.low %v2442_v5, %v2458_v40  ;;  %v2508_v10 = vcombine.high %v2442_v5, %v2458_v40 }
 0x86b   : > { %v2499_v11 = vrot.slane %v2491_v7, %v5228_v43  ;;  %v2506_v12 = vrot.slane %v2492_v36, %v5228_v43  ;;  %v2515_v13 = vrot.slane %v2507_v9, %v5228_v43  ;;  %v2522_v14 = vrot.slane %v2508_v10, %v5228_v43 }
 0x86d   : > { %v3864_v15 = vcombine.low %v2499_v11, %v2506_v12  ;;  %v3866_v16 = vcombine.high %v2499_v11, %v2506_v12  ;;  %v3868_v17 = vcombine.low %v2515_v13, %v2522_v14  ;;  %v3870_v18 = vcombine.high %v2515_v13, %v2522_v14 }
 0x86f   : > { %v2571_v19 = vrot.slane %v3864_v15, %v5225_v37  ;;  %v2587_v28 = vrot.slane %v3866_v16, %v5225_v37  ;;  %v2603_v20 = vrot.slane %v3868_v17, %v5225_v37  ;;  %v2619_v21 = vrot.slane %v3870_v18, %v5225_v37 }
 0x871   : > { %v2627_v23 = vcombine.low %v2571_v19, %v2587_v28  ;;  %v2659_v24 = vcombine.low %v2603_v20, %v2619_v21  ;;  %v2628_v25 = vcombine.high %v2571_v19, %v2587_v28  ;;  %v2660_v27 = vcombine.high %v2603_v20, %v2619_v21 }
 0x873   : > { %v2635_v29 = vrot.slane %v2627_v23, %v5228_v43  ;;  %v2667_v31 = vrot.slane %v2659_v24, %v5228_v43  ;;  %v2642_v34 = vrot.slane %v2628_v25, %v5228_v43  ;;  %v2674_v35 = vrot.slane %v2660_v27, %v5228_v43 }
 0x875   : > { %v2691_v0 = vcombine.low %v2635_v29, %v2667_v31  ;;  %v2692_v22 = vcombine.high %v2635_v29, %v2667_v31  ;;  %v5450_v38 = vcombine.low %v2642_v34, %v2674_v35  ;;  %v5452_v39 = vcombine.high %v2642_v34, %v2674_v35 }
 0x877   : > { %v2699_v41 = vpack.c.bf16 %v2691_v0, %v2691_v0  ;;  %v2700_v33 = vpack.c.bf16 %v2692_v22, %v2692_v22  ;;  %v2701_v20 = vpack.c.bf16 %v5450_v38, %v5450_v38  ;;  %v2702_v21 = vpack.c.bf16 %v5452_v39, %v5452_v39 }
 0x879   : > { %v2716_v42 = vsel %vm1423_vm2, %v2699_v41, 0  ;;  %v2762_v44 = vsel %vm1423_vm2, %v2700_v33, 0  ;;  %v2808_v29 = vsel %vm1423_vm2, %v2701_v20, 0  ;;  %v2854_v31 = vsel %vm1423_vm2, %v2702_v21, 0 }
 0x87a   : > { %4045 = vmatpush3.bf16.xpose.msra.mxu0 %v2716_v42  ;;  %4051 = vmatpush3.bf16.xpose.msra.mxu1 %v2762_v44 }
 0x87b   : > { %4056 = vmatprep.subr.bf16.mxu0 %v4835_v8  ;;  %4062 = vmatprep.subr.bf16.mxu1 %v4835_v8 }
 0x91f   : > { %v2182_v46 = vpop.f32.mrf.mxu0 }
 0x920   : > { %v2183_v47 = vadd.f32 %v3854_v45, %v2182_v46 }
 0x921   : > { %v4034_v30 = vpop.f32.mrf.mxu0 }
 0x922   : > { %2259 = vrot.lane.b32.xlu1 %v2183_v47, %s4842_s22  ;;  %2256 = vrot.lane.b32.xlu0 %v2183_v47, %s4841_s0  ;;  %s5778_s0 = smov 80   ;;  %s5779_s22 = smov 72  }
 0x923   : > { %v2185_v49 = vpop.f32.mrf.mxu0 }
 0x925   : > { %v4035_v32 = vpop.f32.mrf.mxu0 }
 0x926   : > { %2418 = vrot.lane.b32.xlu1 %v5421_v48, %s5776_s7  ;;  %2262 = vrot.lane.b32.xlu0 %v2183_v47, %s5775_s5 }
 0x92a   : > { %2415 = vrot.lane.b32.xlu0 %v5421_v48, %s5777_s3  ;;  %s852_s3 = sand.u32 1, %s4810_s28  }
 0x994   : > { %v2260_v50 = vpop.permute.xlu1 %2259  ;;  %v2257_v51 = vpop.permute.xlu0 %2256 }
 0x995   : > { %v2265_v52 = vcombine.low %v2183_v47, %v2260_v50  ;;  %v2266_v53 = vcombine.high %v2183_v47, %v2260_v50 }
 0x997   : > { %v2273_v57 = vrot.slane %v2265_v52, %v5225_v37  ;;  %v2280_v58 = vrot.slane %v2266_v53, %v5225_v37 }
 0x998   : > { %v2263_v54 = vpop.permute.xlu0 %2262 }
 0x999   : > { %v2281_v55 = vcombine.low %v2257_v51, %v2263_v54  ;;  %v2282_v56 = vcombine.high %v2257_v51, %v2263_v54 }
 0x99b   : > { %v2289_v59 = vrot.slane %v2281_v55, %v5225_v37  ;;  %v2296_v60 = vrot.slane %v2282_v56, %v5225_v37 }
 0x99d   : > { %v2297_v61 = vcombine.low %v2273_v57, %v2289_v59  ;;  %v2298_v62 = vcombine.high %v2273_v57, %v2289_v59  ;;  %v2313_v63 = vcombine.low %v2280_v58, %v2296_v60  ;;  %v2314_v1 = vcombine.high %v2280_v58, %v2296_v60  ;;  %v2419_v58 = vpop.permute.xlu1 %2418  ;;  %v2416_v59 = vpop.permute.xlu0 %2415 }
 0x99f   : > { %v2305_v2 = vrot.slane %v2297_v61, %v5228_v43  ;;  %v2312_v3 = vrot.slane %v2298_v62, %v5228_v43  ;;  %v2321_v4 = vrot.slane %v2313_v63, %v5228_v43  ;;  %v2328_v5 = vrot.slane %v2314_v1, %v5228_v43 }
 0x9a1   : > { %v2333_v6 = vcombine.low %v2305_v2, %v2312_v3  ;;  %v3862_v40 = vcombine.high %v2305_v2, %v2312_v3  ;;  %v2349_v7 = vcombine.low %v2321_v4, %v2328_v5  ;;  %v3863_v36 = vcombine.high %v2321_v4, %v2328_v5 }
 0x9a3   : > { %v2340_v9 = vrot.slane %v2333_v6, %v5225_v37  ;;  %v2348_v10 = vrot.slane %v3862_v40, %v5225_v37  ;;  %v2356_v11 = vrot.slane %v2349_v7, %v5225_v37  ;;  %v2364_v12 = vrot.slane %v3863_v36, %v5225_v37 }
 0x9a5   : > { %v2365_v13 = vcombine.low %v2340_v9, %v2348_v10  ;;  %v2381_v14 = vcombine.low %v2356_v11, %v2364_v12  ;;  %v2366_v15 = vcombine.high %v2340_v9, %v2348_v10  ;;  %v2382_v16 = vcombine.high %v2356_v11, %v2364_v12 }
 0x9a7   : > { %v2373_v17 = vrot.slane %v2365_v13, %v5228_v43  ;;  %v2389_v18 = vrot.slane %v2381_v14, %v5228_v43  ;;  %v2380_v25 = vrot.slane %v2366_v15, %v5228_v43  ;;  %v2396_v27 = vrot.slane %v2382_v16, %v5228_v43 }
 0x9a9   : > { %v2397_v19 = vcombine.low %v2373_v17, %v2389_v18  ;;  %v2398_v28 = vcombine.high %v2373_v17, %v2389_v18  ;;  %v2399_v34 = vcombine.low %v2380_v25, %v2396_v27  ;;  %v2400_v35 = vcombine.high %v2380_v25, %v2396_v27 }
 0x9ab   : > { %v2401_v23 = vpack.c.bf16 %v2397_v19, %v2397_v19  ;;  %v2402_v24 = vpack.c.bf16 %v2398_v28, %v2398_v28  ;;  %v2403_v0 = vpack.c.bf16 %v2399_v34, %v2399_v34  ;;  %v2404_v22 = vpack.c.bf16 %v2400_v35, %v2400_v35 }
 0x9ad   : > { %4047 = vmatmul.mubr.msk.bf16.vlgmr.msra.gmra.mxu0 %vm1423_vm2, %v2401_v23  ;;  %4053 = vmatmul.mubr.msk.bf16.vlgmr.msra.gmra.mxu1 %vm1423_vm2, %v2402_v24 }
 0x9ae   : > { %4057 = vmatpush3.bf16.xpose.msra.mxu0 %v2808_v29  ;;  %4063 = vmatpush3.bf16.xpose.msra.mxu1 %v2854_v31 }
 0x9af   : > { %4058 = vmatprep.mubr.msk.bf16.mxu0 %vm4836_vm1, %v4835_v8  ;;  %4064 = vmatprep.mubr.msk.bf16.mxu1 %vm4836_vm1, %v4835_v8 }
 0x9b0   : > { %4068 = vmatprep.subr.bf16.mxu0 %v4835_v8  ;;  %4074 = vmatprep.subr.bf16.mxu1 %v4835_v8 }
 0x9b5   : > { %4059 = vmatmul.mubr.msk.bf16.vlgmr.msra.gmra.mxu0 %vm1423_vm2, %v2403_v0  ;;  %4065 = vmatmul.mubr.msk.bf16.vlgmr.msra.gmra.mxu1 %vm1423_vm2, %v2404_v22 }
 0x9b6   : > { %4070 = vmatprep.mubr.msk.bf16.mxu0 %vm4836_vm1, %v4835_v8  ;;  %4076 = vmatprep.mubr.msk.bf16.mxu1 %vm4836_vm1, %v4835_v8 }
 0xa6d   : > { %v2752_v38 = vpop.f32.mrf.mxu0  ;;  %v2798_v39 = vpop.f32.mrf.mxu1 }
 0xa6e   : > { %v2896_v41 = vsel %vm1423_vm2, %v2752_v38, -inf  ;;  %v2899_v33 = vsel %vm1423_vm2, %v2798_v39, -inf }
 0xa6f   : > { %2897 = vmax.xlane.f32.xlu1 %v2896_v41  ;;  %v4048_v42 = vpop.f32.mrf.mxu0  ;;  %2900 = vmax.xlane.f32.xlu0 %v2899_v33  ;;  %v4054_v44 = vpop.f32.mrf.mxu1 }
 0xa71   : > { %v2755_v45 = vpop.f32.mrf.mxu0  ;;  %v2801_v46 = vpop.f32.mrf.mxu1 }
 0xa73   : > { %v4049_v47 = vpop.f32.mrf.mxu0  ;;  %v4055_v30 = vpop.f32.mrf.mxu1 }
 0xa75   : > { %v5503_v49 = vpop.f32.mrf.mxu0  ;;  %v5505_v32 = vpop.f32.mrf.mxu1 }
 0xa76   : > { %v2902_v56 = vsel %vm1423_vm2, %v5503_v49, -inf  ;;  %v2905_v57 = vsel %vm1423_vm2, %v5505_v32, -inf }
 0xa77   : > { %v4060_v50 = vpop.f32.mrf.mxu0  ;;  %v4066_v51 = vpop.f32.mrf.mxu1 }
 0xa79   : > { %v2847_v52 = vpop.f32.mrf.mxu0  ;;  %v2893_v53 = vpop.f32.mrf.mxu1 }
 0xa7b   : > { %v4061_v54 = vpop.f32.mrf.mxu0  ;;  %v4067_v55 = vpop.f32.mrf.mxu1 }
 0xa80   : > { %2421 = vrot.lane.b32.xlu1 %v5421_v48, %s5778_s0  ;;  %s3819_s0 = sshll.u32 %s852_s3, 3 }
 0xa85   : > { %2424 = vrot.lane.b32.xlu0 %v5421_v48, %s5779_s22 }
 0xaa4   : > { %2903 = vmax.xlane.f32.xlu1 %v2902_v56  ;;  %2906 = vmax.xlane.f32.xlu0 %v2905_v57 }
 0xaf8   : > { %v5515_v60 = vpop.xlane.xlu1 %2897  ;;  %v5517_v61 = vpop.xlane.xlu0 %2900 }
 0xaf9   : > { %v2920_v62 = vsub.f32 %v2752_v38, %v5515_v60  ;;  %v2921_v63 = vsub.f32 %v2798_v39, %v5517_v61 }
 0xafb   : > { %v2924_v1 = vmul.f32 1.442695, %v2920_v62  ;;  %v2926_v48 = vmul.f32 1.442695, %v2921_v63 }
 0xafc   : > { %v2422_v2 = vpop.permute.xlu1 %2421  ;;  %v2425_v3 = vpop.permute.xlu0 %2424 }
 0xafd   : > { %v2459_v4 = vcombine.low %v2416_v59, %v2422_v2  ;;  %v2460_v5 = vcombine.high %v2416_v59, %v2422_v2  ;;  %v2475_v6 = vcombine.low %v2419_v58, %v2425_v3  ;;  %4366 = vpow2.f32 %v2924_v1 }
 0xafe   : > { %v2476_v40 = vcombine.high %v2419_v58, %v2425_v3  ;;  %4368 = vpow2.f32 %v2926_v48 }
 0xaff   : > { %v2467_v7 = vrot.slane %v2459_v4, %v5225_v37  ;;  %v2474_v36 = vrot.slane %v2460_v5, %v5225_v37  ;;  %v2483_v9 = vrot.slane %v2475_v6, %v5225_v37 }
 0xb00   : > { %v2490_v10 = vrot.slane %v2476_v40, %v5225_v37 }
 0xb01   : > { %v2523_v11 = vcombine.low %v2467_v7, %v2483_v9  ;;  %v2524_v12 = vcombine.high %v2467_v7, %v2483_v9 }
 0xb02   : > { %v2539_v13 = vcombine.low %v2474_v36, %v2490_v10  ;;  %v2540_v14 = vcombine.high %v2474_v36, %v2490_v10 }
 0xb03   : > { %v2531_v15 = vrot.slane %v2523_v11, %v5228_v43  ;;  %v2538_v16 = vrot.slane %v2524_v12, %v5228_v43  ;;  %v2908_v12 = vsub.f32 -inf, %v5515_v60 }
 0xb04   : > { %v2547_v17 = vrot.slane %v2539_v13, %v5228_v43  ;;  %v2554_v18 = vrot.slane %v2540_v14, %v5228_v43 }
 0xb05   : > { %v3865_v19 = vcombine.low %v2531_v15, %v2538_v16  ;;  %v3867_v28 = vcombine.high %v2531_v15, %v2538_v16  ;;  %v2909_v16 = vsub.f32 -inf, %v5517_v61 }
 0xb06   : > { %v3869_v20 = vcombine.low %v2547_v17, %v2554_v18  ;;  %v3871_v21 = vcombine.high %v2547_v17, %v2554_v18 }
 0xb07   : > { %v2578_v23 = vrot.slane %v3865_v19, %v5225_v37  ;;  %v2594_v24 = vrot.slane %v3867_v28, %v5225_v37  ;;  %v2912_v28 = vmul.f32 1.442695, %v2908_v12  ;;  %v4327_v12 = vld [vmem:[#allocation16] sm:$0xff]  }
 0xb08   : > { %v2610_v25 = vrot.slane %v3869_v20, %v5225_v37  ;;  %v2626_v27 = vrot.slane %v3871_v21, %v5225_v37  ;;  %v2914_v21 = vmul.f32 1.442695, %v2909_v16 }
 0xb09   : > { %v2643_v29 = vcombine.low %v2578_v23, %v2594_v24  ;;  %v2644_v31 = vcombine.high %v2578_v23, %v2594_v24 }
 0xb0a   : > { %v2675_v34 = vcombine.low %v2610_v25, %v2626_v27  ;;  %v2676_v35 = vcombine.high %v2610_v25, %v2626_v27  ;;  %v4367_v0 = vpop.eup %4366 }
 0xb0b   : > { %v2651_v22 = vrot.slane %v2643_v29, %v5228_v43  ;;  %v2658_v38 = vrot.slane %v2644_v31, %v5228_v43  ;;  %v2936_v39 = vsel %vm1423_vm2, %v4367_v0, 0.0  ;;  %v4369_v42 = vpop.eup %4368  ;;  %v2952_v56 = vpack.c.bf16 %v4367_v0, %v4367_v0 }
 0xb0c   : > { %v2683_v41 = vrot.slane %v2675_v34, %v5228_v43  ;;  %v2690_v33 = vrot.slane %v2676_v35, %v5228_v43  ;;  %2937 = vadd.xlane.f32.xlu0 %v2936_v39  ;;  %v2939_v44 = vsel %vm1423_vm2, %v4369_v42, 0.0  ;;  %v2953_v57 = vpack.c.bf16 %v4369_v42, %v4369_v42 }
 0xb0d   : > { %2940 = vadd.xlane.f32.xlu1 %v2939_v44 }
 0xb0e   : > { %v2695_v45 = vcombine.low %v2651_v22, %v2683_v41  ;;  %v2696_v46 = vcombine.high %v2651_v22, %v2683_v41  ;;  %v2697_v47 = vcombine.low %v2658_v38, %v2690_v33  ;;  %v2698_v30 = vcombine.high %v2658_v38, %v2690_v33 }
 0xb10   : > { %v2703_v50 = vpack.c.bf16 %v2695_v45, %v2695_v45  ;;  %v2704_v51 = vpack.c.bf16 %v2696_v46, %v2696_v46  ;;  %v2705_v54 = vpack.c.bf16 %v2697_v47, %v2697_v47  ;;  %v2706_v55 = vpack.c.bf16 %v2698_v30, %v2698_v30 }
 0xb12   : > { %v2960_v52 = vsel %vm1682_vm4, %v2703_v50, 0  ;;  %v3006_v53 = vsel %vm1682_vm4, %v2704_v51, 0  ;;  %v3052_v58 = vsel %vm1682_vm4, %v2705_v54, 0  ;;  %v3098_v59 = vsel %vm1682_vm4, %v2706_v55, 0 }
 0xb13   : > { %4069 = vmatpush3.bf16.msra.mxu0 %v2960_v52  ;;  %4075 = vmatpush3.bf16.msra.mxu1 %v3006_v53 }
 0xb14   : > { %4080 = vmatprep.subr.bf16.mxu0 %v4835_v8  ;;  %4086 = vmatprep.subr.bf16.mxu1 %v4835_v8 }
 0xb16   : > { %4071 = vmatmul.mubr.msk.bf16.vlgmr.msra.gmra.mxu0 %vm1423_vm2, %v2952_v56  ;;  %4077 = vmatmul.mubr.msk.bf16.vlgmr.msra.gmra.mxu1 %vm1423_vm2, %v2953_v57 }
 0xb17   : > { %4081 = vmatpush3.bf16.msra.mxu0 %v3052_v58  ;;  %4087 = vmatpush3.bf16.msra.mxu1 %v3098_v59 }
 0xb18   : > { %4082 = vmatprep.mubr.msk.bf16.mxu0 %vm4836_vm1, %v4835_v8  ;;  %4088 = vmatprep.mubr.msk.bf16.mxu1 %vm4836_vm1, %v4835_v8 }
 0xb19   : > { %4092 = vmatprep.subr.bf16.mxu0 %v4835_v8  ;;  %4100 = vmatprep.subr.bf16.mxu1 %v4835_v8 }
 0xb2d   : > { %v2904_v62 = vpop.xlane.xlu1 %2903  ;;  %v2907_v63 = vpop.xlane.xlu0 %2906 }
 0xb2e   : > { %v2922_v1 = vsub.f32 %v5503_v49, %v2904_v62  ;;  %v2923_v48 = vsub.f32 %v5505_v32, %v2907_v63  ;;  %v4326_v49 = vld [vmem:[#allocation16 + $0x8] sm:$0xff]   ;;  %v2910_v13 = vsub.f32 -inf, %v2904_v62  ;;  %v2911_v17 = vsub.f32 -inf, %v2907_v63 }
 0xb30   : > { %v2928_v2 = vmul.f32 1.442695, %v2922_v1  ;;  %v2930_v3 = vmul.f32 1.442695, %v2923_v48  ;;  %v2916_v20 = vmul.f32 1.442695, %v2910_v13 }
 0xb31   : > { %v2918_v23 = vmul.f32 1.442695, %v2911_v17 }
 0xb32   : > { %4370 = vpow2.f32 %v2928_v2 }
 0xb33   : > { %4372 = vpow2.f32 %v2930_v3 }
 0xb34   : > { %4374 = vpow2.f32 %v2912_v28 }
 0xb35   : > { %4376 = vpow2.f32 %v2916_v20 }
 0xb36   : > { %4378 = vpow2.f32 %v2914_v21 }
 0xb37   : > { %4380 = vpow2.f32 %v2918_v23 }
 0xb3f   : > { %v4371_v4 = vpop.eup %4370 }
 0xb40   : > { %v2942_v5 = vsel %vm1423_vm2, %v4371_v4, 0.0  ;;  %v2954_v6 = vpack.c.bf16 %v4371_v4, %v4371_v4  ;;  %v4373_v40 = vpop.eup %4372 }
 0xb41   : > { %2943 = vadd.xlane.f32.xlu0 %v2942_v5  ;;  %v2945_v7 = vsel %vm1423_vm2, %v4373_v40, 0.0  ;;  %v2955_v36 = vpack.c.bf16 %v4373_v40, %v4373_v40  ;;  %v4375_v25 = vpop.eup %4374 }
 0xb42   : > { %4083 = vmatmul.mubr.msk.bf16.vlgmr.msra.gmra.mxu0 %vm1423_vm2, %v2954_v6  ;;  %2946 = vadd.xlane.f32.xlu1 %v2945_v7  ;;  %v4377_v27 = vpop.eup %4376  ;;  %v2932_v34 = vmul.f32 0.0, %v4375_v25 }
 0xb43   : > { %4096 = vmatprep.mubr.msk.bf16.mxu0 %vm4836_vm1, %v4835_v8  ;;  %4089 = vmatmul.mubr.msk.bf16.vlgmr.msra.gmra.mxu1 %vm1423_vm2, %v2955_v36  ;;  %v4379_v29 = vpop.eup %4378  ;;  %v2934_v61 = vmul.f32 0.0, %v4377_v27 }
 0xb44   : > { %4104 = vmatprep.mubr.msk.bf16.mxu1 %vm4836_vm1, %v4835_v8  ;;  %4093 = vmatpush3.bf16.msra.mxu0 %v4326_v49  ;;  %v4381_v31 = vpop.eup %4380  ;;  %v2933_v0 = vmul.f32 0.0, %v4379_v29 }
 0xb45   : > { %4094 = vmatprep.subr.bf16.mxu0 %v4835_v8  ;;  %v2935_v39 = vmul.f32 0.0, %v4381_v31 }
 0xb48   : > { %4095 = vmatpush3.bf16.msra.mxu0 %v4327_v12  ;;  %v4336_v12 = vld [vmem:[%s5706_s20 + $0x8] sm:$0xff]  }
 0xb49   : > { %4108 = vmatprep.subr.bf16.mxu0 %v4835_v8 }
 0xb95   : > { %v2938_v24 = vpop.xlane.xlu0 %2937 }
 0xb96   : > { %v2941_v60 = vpop.xlane.xlu1 %2940  ;;  %v2948_v22 = vadd.f32 %v2938_v24, %v2932_v34 }
 0xb97   : > { %v2949_v33 = vadd.f32 %v2941_v60, %v2933_v0 }
 0xb98   : > { %4382 = vrcp.f32 %v2948_v22 }
 0xba5   : > { %v4383_v46 = vpop.eup %4382 }
 0xbca   : > { %v2944_v35 = vpop.xlane.xlu0 %2943 }
 0xbcb   : > { %v2947_v38 = vpop.xlane.xlu1 %2946  ;;  %v2950_v41 = vadd.f32 %v2944_v35, %v2934_v61 }
 0xbcc   : > { %v2951_v42 = vadd.f32 %v2947_v38, %v2935_v39 }
 0xbcd   : > { %4384 = vrcp.f32 %v2950_v41 }
 0xbce   : > { %4386 = vrcp.f32 %v2949_v33 }
 0xbcf   : > { %4388 = vrcp.f32 %v2951_v42 }
 0xbd6   : > { %v2996_v32 = vpop.f32.mrf.mxu0  ;;  %v3042_v9 = vpop.f32.mrf.mxu1 }
 0xbd7   : > { %v3140_v44 = vadd.f32 %v2996_v32, %v2932_v34  ;;  %v3141_v47 = vadd.f32 %v3042_v9, %v2933_v0 }
 0xbd8   : > { %v4072_v10 = vpop.f32.mrf.mxu0  ;;  %v4078_v11 = vpop.f32.mrf.mxu1 }
 0xbd9   : > { %v3148_v54 = vmul.f32 %v4383_v46, %v3140_v44  ;;  %v3882_v46 = vld [vmem:[#allocation17] ss:$0 sm:$0xff] }
 0xbda   : > { %v2999_v14 = vpop.f32.mrf.mxu0  ;;  %v3045_v15 = vpop.f32.mrf.mxu1 }
 0xbdb   : > { %v4385_v50 = vpop.eup %4384 }
 0xbdc   : > { %v4073_v18 = vpop.f32.mrf.mxu0  ;;  %v4079_v19 = vpop.f32.mrf.mxu1 }
 0xbdd   : > { %v4387_v53 = vpop.eup %4386 }
 0xbde   : > { %v4389_v57 = vpop.eup %4388  ;;  %v3149_v62 = vmul.f32 %v4387_v53, %v3141_v47 }
 0xc02   : > { %v3088_v45 = vpop.f32.mrf.mxu0 }
 0xc03   : > { %v3142_v30 = vadd.f32 %v3088_v45, %v2934_v61  ;;  %v3134_v51 = vpop.f32.mrf.mxu1 }
 0xc04   : > { %v4084_v52 = vpop.f32.mrf.mxu0  ;;  %v3143_v56 = vadd.f32 %v3134_v51, %v2935_v39 }
 0xc05   : > { %v3150_v55 = vmul.f32 %v4385_v50, %v3142_v30  ;;  %v4090_v58 = vpop.f32.mrf.mxu1 }
 0xc06   : > { %v3091_v59 = vpop.f32.mrf.mxu0  ;;  %v3151_v48 = vmul.f32 %v4389_v57, %v3143_v56 }
 0xc07   : > { %v3152_v63 = vcombine.low %v3148_v54, %v3150_v55  ;;  %v3153_v1 = vcombine.high %v3148_v54, %v3150_v55  ;;  %v3137_v2 = vpop.f32.mrf.mxu1 }
 0xc08   : > { %v4085_v3 = vpop.f32.mrf.mxu0  ;;  %v3168_v6 = vcombine.low %v3149_v62, %v3151_v48  ;;  %v3169_v40 = vcombine.high %v3149_v62, %v3151_v48  ;;  %v4328_v62 = vld [vmem:[#allocation22 + $0x8] sm:$0xff]   ;;  %v4333_v2 = vld [vmem:[%s5706_s20 + $0x20] sm:$0xff]  }
 0xc09   : > { %v3160_v4 = vrot.slane %v3152_v63, %v5225_v37  ;;  %v3167_v5 = vrot.slane %v3153_v1, %v5225_v37  ;;  %v4091_v7 = vpop.f32.mrf.mxu1  ;;  %4101 = vmatpush3.bf16.msra.mxu1 %v4328_v62  ;;  %v4329_v63 = vld [vmem:[#allocation22] sm:$0xff]   ;;  %v4331_v1 = vld [vmem:[%s5706_s20 + $0x30] sm:$0xff]   ;;  %v4334_v3 = vld [vmem:[%s5706_s20 + $0x18] sm:$0xff]  }
 0xc0a   : > { %v3176_v36 = vrot.slane %v3168_v6, %v5225_v37  ;;  %v3183_v49 = vrot.slane %v3169_v40, %v5225_v37  ;;  %4102 = vmatprep.subr.bf16.mxu1 %v4835_v8  ;;  %v4332_v48 = vld [vmem:[%s5706_s20 + $0x28] sm:$0xff]  }
 0xc0c   : > { %v3184_v32 = vcombine.low %v3160_v4, %v3176_v36  ;;  %v3185_v9 = vcombine.high %v3160_v4, %v3176_v36  ;;  %v3200_v10 = vcombine.low %v3167_v5, %v3183_v49  ;;  %v3201_v11 = vcombine.high %v3167_v5, %v3183_v49  ;;  %v4335_v4 = vld [vmem:[%s5706_s20 + $0x10] sm:$0xff]   ;;  %v3886_v36 = vld [vmem:[#allocation19] ss:$0 sm:$0xff] }
 0xc0d   : > { %4103 = vmatpush3.bf16.msra.mxu1 %v4329_v63 }
 0xc0e   : > { %v3192_v13 = vrot.slane %v3184_v32, %v5228_v43  ;;  %v3199_v14 = vrot.slane %v3185_v9, %v5228_v43  ;;  %v3208_v15 = vrot.slane %v3200_v10, %v5228_v43  ;;  %v3215_v16 = vrot.slane %v3201_v11, %v5228_v43  ;;  %v3887_v32 = vld [vmem:[#allocation20] ss:$0 sm:$0xff] }
 0xc10   : > { %v3220_v17 = vcombine.low %v3192_v13, %v3199_v14  ;;  %v3880_v18 = vcombine.high %v3192_v13, %v3199_v14  ;;  %v3236_v19 = vcombine.low %v3208_v15, %v3215_v16  ;;  %v3881_v28 = vcombine.high %v3208_v15, %v3215_v16  ;;  %v4337_v13 = vld [vmem:[%s5706_s20] sm:$0xff]  }
 0xc11   : > { %v3888_v14 = vld [vmem:[%s5705_s19] ss:$0 sm:$0xff] }
 0xc12   : > { %v3227_v20 = vrot.slane %v3220_v17, %v5225_v37  ;;  %v3235_v21 = vrot.slane %v3880_v18, %v5225_v37  ;;  %v3243_v23 = vrot.slane %v3236_v19, %v5225_v37  ;;  %v3251_v24 = vrot.slane %v3881_v28, %v5225_v37 }
 0xc14   : > { %v3253_v25 = vcombine.high %v3227_v20, %v3235_v21  ;;  %v3269_v27 = vcombine.high %v3243_v23, %v3251_v24  ;;  %v3252_v60 = vcombine.low %v3227_v20, %v3235_v21  ;;  %v3268_v29 = vcombine.low %v3243_v23, %v3251_v24  ;;  %v3900_v21 = vld [vmem:[%s5707_s21] ss:$0 sm:$0xff] }
 0xc16   : > { %v3267_v31 = vrot.slane %v3253_v25, %v5228_v43  ;;  %v3283_v34 = vrot.slane %v3269_v27, %v5228_v43  ;;  %v3260_v35 = vrot.slane %v3252_v60, %v5228_v43  ;;  %v3276_v61 = vrot.slane %v3268_v29, %v5228_v43 }
 0xc18   : > { %v3286_v0 = vcombine.low %v3267_v31, %v3283_v34  ;;  %v3285_v22 = vcombine.high %v3260_v35, %v3276_v61  ;;  %v3287_v38 = vcombine.high %v3267_v31, %v3283_v34  ;;  %v3284_v39 = vcombine.low %v3260_v35, %v3276_v61 }
 0xc1a   : > { %3293 = vrot.lane.b32.xlu1 %v3286_v0, %s5780_s30  ;;  %3289 = vrot.lane.b32.xlu0 %v3285_v22, %s5781_s2  ;;  %s3902_s2 = sshll.u32 %s4990_s4, 7  ;;  %s3579_s4 = scalar_lea.sflag [#allocation4], %s852_s3 }
 0xc1b   : > { %s5644_s5 = scalar_lea.hbm %s5783_s1, %s3902_s2 }
 0xc1e   : > { %3297 = vrot.lane.b32.xlu1 %v3287_v38, %s5782_s29  ;;  %s854_s29 = scalar_lea.vmem [#allocation23], %s3819_s0  ;;  %s4853_s0 = smov [#allocation23]  }
 0xc1f   : > { %s3592_s23 = sshll.u32 %s854_s29, 4  ;;  %s4734_s22 = sshll.u32 %s4853_s0, 4  ;;  %s5646_s23 = int_to_ptr.vmem [resolvable:$true] %s3592_s23  ;;  %s4735_s22 = int_to_ptr.vmem [resolvable:$false] %s4734_s22 }
 0xc20   : > { %s4730_s7 = scalar_lea.vmem %s5646_s23, 128  ;;  %s4736_s30 = scalar_lea.vmem %s4735_s22, 256 }
 0xc21   : > { %p4731_p4 = scmp.ne.s32.totalorder %s5646_s23, %s4730_s7  ;;  %p4737_p12 = scmp.lt.s32.totalorder %s5646_s23, %s4735_s22 }
 0xc22   : > { %p4738_p0 = scmp.lt.s32.totalorder %s4736_s30, %s4730_s7 }
 0xc23   : > { %p4732_p8 = pnand %p4731_p4, %p5784_p7 }
 0xc24   : > { %p4739_p1 = por %p4738_p0, %p4737_p12 }
 0xc25   : > { %p4733_p11 = pneg %p4732_p8 }
 0xc27   : > { %p4740_p2 = pnand %p4739_p1, %p4733_p11 }
 0xc8c   : > { %v3294_v37 = vpop.permute.xlu1 %3293  ;;  %v3290_v41 = vpop.permute.xlu0 %3289 }
 0xc8d   : > { %v3300_v33 = vsel %vm1423_vm2, %v3284_v39, %v3290_v41 }
 0xc8e   : > { %v3301_v44 = vsel %vm2025_vm5, %v3300_v33, %v3294_v37 }
 0xc90   : > { %v3298_v42 = vpop.permute.xlu1 %3297 }
 0xc91   : > { %v3302_v45 = vsel %vm2027_vm6, %v3301_v44, %v3298_v42 }
 0xc92   : > { %v3303_v43 = vpack.c.bf16 %v3302_v45, %v3302_v45 }
 0xc94   : > { %4097 = vmatmul.mubr.msk.bf16.vlgmr.msra.gmra.mxu0 %vm868_vm0, %v3303_v43 }
 0xc95   : > { %4124 = vmatprep.mubr.msk.bf16.mxu0 %vm4836_vm1, %v4835_v8 }
 0xd54   : > { %v3359_v47 = vpop.f32.mrf.mxu0 }
 0xd55   : > { %v3360_v30 = vadd.f32 %v3882_v46, %v3359_v47 }
 0xd56   : > { %v4098_v50 = vpop.f32.mrf.mxu0 }
 0xd57   : > { %v5593_v51 = vadd.f32 %v3360_v30, %v5391_v26  ;;  %v4330_v26 = vld [vmem:[%s5706_s20 + $0x38] sm:$0xff]  }
 0xd58   : > { %v3362_v52 = vpop.f32.mrf.mxu0  ;;  %4109 = vmatpush3.bf16.msra.mxu0 %v4330_v26 }
 0xd59   : > { %v3368_v53 = vsel %vm868_vm0, %v5593_v51, 0.0  ;;  %4110 = vmatprep.subr.bf16.mxu0 %v4835_v8 }
 0xd5a   : > { %3369 = vadd.xlane.f32.xlu0 %v3368_v53  ;;  %v4099_v54 = vpop.f32.mrf.mxu0 }
 0xd5c   : > { %4111 = vmatpush3.bf16.msra.mxu0 %v4331_v1 }
 0xd5d   : > { %4112 = vmatprep.subr.bf16.mxu0 %v4835_v8 }
 0xd60   : > { %4113 = vmatpush3.bf16.msra.mxu0 %v4332_v48 }
 0xd61   : > { %4114 = vmatprep.subr.bf16.mxu0 %v4835_v8 }
 0xd64   : > { %4115 = vmatpush3.bf16.msra.mxu0 %v4333_v2 }
 0xd65   : > { %4116 = vmatprep.subr.bf16.mxu0 %v4835_v8 }
 0xd68   : > { %4117 = vmatpush3.bf16.msra.mxu0 %v4334_v3 }
 0xd69   : > { %4118 = vmatprep.subr.bf16.mxu0 %v4835_v8 }
 0xd6c   : > { %4119 = vmatpush3.bf16.msra.mxu0 %v4335_v4 }
 0xd6d   : > { %4120 = vmatprep.subr.bf16.mxu0 %v4835_v8 }
 0xd70   : > { %4121 = vmatpush3.bf16.msra.mxu0 %v4336_v12 }
 0xd71   : > { %4122 = vmatprep.subr.bf16.mxu0 %v4835_v8 }
 0xd74   : > { %4123 = vmatpush3.bf16.msra.mxu0 %v4337_v13 }
 0xde3   : > { %v3370_v55 = vpop.xlane.xlu0 %3369 }
 0xde4   : > { %v3371_v56 = vmul.f32 0.03125, %v3370_v55 }
 0xde6   : > { %v3372_v57 = vsub.f32 %v5593_v51, %v3371_v56 }
 0xde8   : > { %v3373_v58 = vmul.f32 %v3372_v57, %v3372_v57 }
 0xdea   : > { %v3374_v59 = vsel %vm868_vm0, %v3373_v58, 0.0 }
 0xdeb   : > { %3375 = vadd.xlane.f32.xlu1 %v3374_v59 }
 0xe74   : > { %v3376_v5 = vpop.xlane.xlu1 %3375 }
 0xe75   : > { %v3377_v6 = vmul.f32 0.03125, %v3376_v5 }
 0xe77   : > { %v3378_v40 = vadd.f32 1e-05, %v3377_v6 }
 0xe79   : > { %4390 = vrsqrt.f32 %v3378_v40 }
 0xe86   : > { %v4391_v7 = vpop.eup %4390 }
 0xe87   : > { %v3380_v49 = vmul.f32 %v4391_v7, %v3372_v57 }
 0xe89   : > { %v3387_v9 = vmul.f32 %v3886_v36, %v3380_v49 }
 0xe8b   : > { %v3394_v10 = vadd.f32 %v3887_v32, %v3387_v9 }
 0xe8d   : > { %v3395_v11 = vpack.c.bf16 %v3394_v10, %v3394_v10 }
 0xe8f   : > { %4105 = vmatmul.mubr.msk.bf16.vlgmr.msra.gmra.mxu1 %vm868_vm0, %v3395_v11 }
 0xf4f   : > { %v3456_v15 = vpop.f32.mrf.mxu1 }
 0xf50   : > { %v3457_v16 = vadd.f32 %v3888_v14, %v3456_v15 }
 0xf51   : > { %v4106_v17 = vpop.f32.mrf.mxu1 }
 0xf52   : > { %v3462_v18 = vmax.f32 %v3457_v16, 0.0 }
 0xf53   : > { %v3459_v19 = vpop.f32.mrf.mxu1 }
 0xf54   : > { %v3463_v28 = vpack.c.bf16 %v3462_v18, %v3462_v18 }
 0xf55   : > { %v4107_v20 = vpop.f32.mrf.mxu1 }
 0xf56   : > { %4125 = vmatmul.mubr.bf16.vlgmr.msra.gmra.mxu0 %v3463_v28 }
0x1016   : > { %v3562_v8 = vpop.f32.mrf.mxu0 }
0x1017   : > { %v3568_v23 = vadd.f32 %v3562_v8, %v5593_v51 }
0x1018   : > { %v4126_v24 = vpop.f32.mrf.mxu0 }
0x1019   : > { %v3576_v25 = vadd.f32 %v3900_v21, %v3568_v23 }
0x101a   : > { %v3565_v27 = vpop.f32.mrf.mxu0 }
0x101b   : > { %3577 = vst.msk [vmem:[%s854_s29] sm:$0xff] %vm868_vm0, %v3576_v25 }
0x101c   : > { %v4127_v60 = vpop.f32.mrf.mxu0 }
0x101d   : > { %4743 = shalt.err (!%p4740_p2)
}
0x101e   : > { %s4744_s2 = scalar_lea.hbm %s5644_s5, 128  ;;  %s4748_s26 = scalar_lea.hbm %s5783_s1, 256 }
0x101f   : > { %p4745_p9 = scmp.ne.s32.totalorder %s5644_s5, %s4744_s2  ;;  %p4749_p6 = scmp.lt.s32.totalorder %s5644_s5, %s5783_s1 }
0x1020   : > { %p4750_p10 = scmp.lt.s32.totalorder %s4748_s26, %s4744_s2 }
0x1021   : > { %p4746_p3 = pnand %p4745_p9, %p5784_p7 }
0x1022   : > { %p4751_p13 = por %p4750_p10, %p4749_p6 }
0x1023   : > { %p4747_p5 = pneg %p4746_p3 }
0x1025   : > { %p4752_p4 = pnand %p4751_p13, %p4747_p5 }
0x1027   : > { %4755 = shalt.err (!%p4752_p4)
}
0x1028   : > { %4180 = dma.vmem_to_hbm [thread:$0]  (%p5784_p7), %s5646_s23, 128, %s5644_s5, %s3579_s4  }
0x1029 PF: > { %s5785_s7 = sld [smem:[#allocation34_spill]] }
0x102a   : > { %s5786_s22 = sld [smem:[#allocation32_spill]] }
0x102b   : > { %s5787_s30 = sld [smem:[#allocation37_spill]] }
0x102f   : > { %p4252_p8 = scmp.ge.s32.totalorder %s5785_s7, 2 }
0x1030   : > { %s3604_s3 = sand.u32 1, %s5786_s22  }
0x1031   : > { %p5788_p11 = scmp.ne.s32.totalorder %s5787_s30, 0  ;;  %s3605_s29 = scalar_lea.sflag [#allocation4], %s3604_s3 }
0x1033   : > { %p4223_p12 = pnand %p4252_p8, %p5788_p11 }
0x1035   : > { %p4224_p0 = pneg %p4223_p12 }
0x1037   : > { %4801 = dma.done.wait (%p4224_p0), %s3605_s29, 128  }
0x1038   : > { %4803 = vsyncadd (%p4224_p0), %s3605_s29, 4294967168  ;;  %s5789_s30 = sld [smem:[#allocation35_spill]]  ;;  %s5792_s3 = smov %s4810_s28 }
0x1039   : > { %s5790_s2 = sld [smem:[#allocation33_spill]] }
0x103a   : > { %s5791_s29 = sld [smem:[#allocation36_spill]] }
0x103e   : > { %p39_p1 = scmp.ge.s32.totalorder %s5789_s30, 4  }
0x103f   : > { %s5793_s28 = smov %s5790_s2 }
0x1040   :  { %41 = sbr.rel (!%p39_p1) target bundleno = 20 (0x14), region = 199 }
0x1045   :  { %3610 = vsyncpa [#allocation3], 1 }
0x1046   :  { %3612 = vsyncpa [#allocation3 + $0x1], 1 }
0x1047   :  { %3613 = vsyncpa [#allocation6], 1 }
0x1048   :  { %3614 = vsyncpa [#allocation9], 1 }
0x1049   :  { %3615 = vsyncpa [#allocation12], 1 }
0x104a   :  { %3616 = vsyncpa [#allocation15], 1 }
0x104b   :  { %3617 = vsyncpa [#allocation18], 1 }
0x104c   :  { %3618 = vsyncpa [#allocation21], 1 }
0x104d   :  { %3619 = vsyncpa [#allocation4], 1 }
0x104e   :  { %3621 = vsyncpa [#allocation4 + $0x1], 1 }

// kernel: tpu_custom_call.1
= control target key start
LH: loop header
LB: loop body
LE: loop exit
PB: predicated region body
PF: predicated region fallthrough
CT: control target
= control target key end

     0   :  { %s5686_s0 = inlined_call_operand.vmem [shape: f32[2,8,32], index: 0, kind: input, shape index: {}]   ;;  %s5687_s1 = inlined_call_operand.vmem [shape: f32[2,8,32], index: 1, kind: input, shape index: {}]   ;;  %s5688_s2 = inlined_call_operand.hbm [shape: f32[1,32], index: 2, kind: input, shape index: {}]   ;;  %s5689_s3 = inlined_call_operand.hbm [shape: f32[1,32], index: 3, kind: input, shape index: {}]   ;;  %s5690_s4 = inlined_call_operand.vmem [shape: bf16[32,96], index: 4, kind: input, shape index: {}]   ;;  %s5691_s5 = inlined_call_operand.hbm [shape: f32[1,96], index: 5, kind: input, shape index: {}]   ;;  %s5692_s6 = inlined_call_operand.vmem [shape: bf16[32,32], index: 6, kind: input, shape index: {}]   ;;  %s5693_s7 = inlined_call_operand.hbm [shape: f32[1,32], index: 7, kind: input, shape index: {}]   ;;  %s5694_s8 = inlined_call_operand.hbm [shape: f32[1,32], index: 8, kind: input, shape index: {}]   ;;  %s5695_s9 = inlined_call_operand.hbm [shape: f32[1,32], index: 9, kind: input, shape index: {}]   ;;  %s5696_s10 = inlined_call_operand.vmem [shape: bf16[32,32], index: 10, kind: input, shape index: {}]   ;;  %s5697_s11 = inlined_call_operand.hbm [shape: f32[1,32], index: 11, kind: input, shape index: {}]   ;;  %s5698_s12 = inlined_call_operand.vmem [shape: bf16[32,64], index: 12, kind: input, shape index: {}]   ;;  %s5699_s13 = inlined_call_operand.hbm [shape: f32[1,64], index: 13, kind: input, shape index: {}]   ;;  %s5700_s14 = inlined_call_operand.hbm [shape: bf16[32,32], index: 14, kind: input, shape index: {}]   ;;  %s5701_s15 = inlined_call_operand.hbm [shape: f32[1,32], index: 15, kind: input, shape index: {}]   ;;  %s5702_s16 = inlined_call_operand.hbm [shape: f32[1,32], index: 16, kind: input, shape index: {}]   ;;  %s5703_s17 = inlined_call_operand.hbm [shape: f32[1,32], index: 17, kind: input, shape index: {}]   ;;  %s5704_s18 = inlined_call_operand.hbm [shape: bf16[32,128], index: 18, kind: input, shape index: {}]   ;;  %s5705_s19 = inlined_call_operand.vmem [shape: f32[1,128], index: 19, kind: input, shape index: {}]   ;;  %s5706_s20 = inlined_call_operand.vmem [shape: bf16[128,32], index: 20, kind: input, shape index: {}]   ;;  %s5707_s21 = inlined_call_operand.vmem [shape: f32[1,32], index: 21, kind: input, shape index: {}]   ;;  %s5708_s22 = inlined_call_operand.hbm [shape: f32[2,8,32], index: 22, kind: output, shape index: {}]  }
   0x1   :  { %5730 = sst [smem:[#allocation38_spill]] %s5686_s0 }
   0x2   :  { %5731 = sst [smem:[#allocation39_spill]] %s5687_s1 }
   0x3   :  { %5732 = sst [smem:[#allocation40_spill]] %s5688_s2 }
   0x4   :  { %5733 = sst [smem:[#allocation41_spill]] %s5689_s3 }
   0x5   :  { %5734 = sst [smem:[#allocation42_spill]] %s5690_s4 }
   0x6   :  { %5735 = sst [smem:[#allocation43_spill]] %s5691_s5 }
   0x7   :  { %5736 = sst [smem:[#allocation44_spill]] %s5692_s6 }
   0x8   :  { %5737 = sst [smem:[#allocation45_spill]] %s5693_s7 }
   0x9   :  { %5738 = sst [smem:[#allocation46_spill]] %s5708_s22 }
   0xa   :  { %27 = vsyncpa [#allocation3], 0 }
   0xb   :  { %28 = vsyncpa [#allocation6], 0 }
   0xc   :  { %29 = vsyncpa [#allocation9], 0 }
   0xd   :  { %30 = vsyncpa [#allocation12], 0 }
   0xe   :  { %31 = vsyncpa [#allocation15], 0 }
   0xf   :  { %32 = vsyncpa [#allocation18], 0 }
  0x10   :  { %33 = vsyncpa [#allocation21], 0 }
  0x11   :  { %34 = vsyncpa [#allocation4], 0 }
  0x12   :  { %36 = vsyncpa [#allocation4 + $0x1], 0  ;;  %s4969_s3 = smov 0   ;;  %s4971_s28 = smov 0  }
  0x13   :  { %s4973_s29 = smov 0   ;;  %s4975_s30 = smov 0  }
  0x14 LB: > { %5739 = sst [smem:[#allocation32_spill]] %s4806_s3  ;;  %s4990_s4 = sadd.s32 4294967295, %s4818_s30   ;;  %s4818_s30 = sphi %s4975_s30, %s5789_s30   ;;  %s4814_s29 = sphi %s4973_s29, %s5791_s29   ;;  %s4810_s28 = sphi %s4971_s28, %s5793_s28   ;;  %s4806_s3 = sphi %s4969_s3, %s5792_s3  }
  0x15   : > { %5740 = sst [smem:[#allocation33_spill]] %s4814_s29  ;;  %s3789_s0 = sadd.s32 4294967294, %s4818_s30  }
  0x16   : > { %5741 = sst [smem:[#allocation34_spill]] %s4818_s30  ;;  %s4994_s23 = sadd.s32 1, %s4818_s30  }
  0x17   : > { %5742 = sst [smem:[#allocation35_spill]] %s4994_s23  ;;  %s521_s1 = sadd.s32 1, %s4814_s29 }
  0x18   : > { %s518_s5 = ssub.s32 %s4818_s30, %s4994_s23  ;;  %p531_p0 = scmp.ne.s32.totalorder %s4814_s29, %s4810_s28 }
  0x19   : > { %p519_p1 = scmp.eq.s32.totalorder %s518_s5, 0  ;;  %p532_p2 = scmp.eq.s32.totalorder %s4990_s4, 1 }
  0x1a   : > { %p537_p3 = scmp.ne.s32.totalorder %s4810_s28, %s4806_s3  ;;  %p538_p4 = scmp.eq.s32.totalorder %s3789_s0, 1 }
  0x1b   : > { %s5005_s24 = scalar_select %p519_p1, %s4814_s29, %s521_s1  }
  0x1c   : > { %p5007_p5 = por %p532_p2, %p531_p0  ;;  %p5011_p6 = por %p538_p4, %p537_p3 }
  0x1d   : > { %5743 = sst [smem:[#allocation36_spill]] %s5005_s24  ;;  %p3790_p7 = scmp.ge.s32.totalorder %s4818_s30, 1 }
  0x1e   : > { %s5744_s6 = scalar_select %p5007_p5, 1, 0 }
  0x1f   : > { %s5745_s25 = scalar_select %p5011_p6, 1, 0 }
  0x20   : > { %p545_p8 = scmp.lt.s32.totalorder %s4818_s30, 3  ;;  %p5717_p9 = scmp.eq.s32.totalorder %s4990_s4, 0 }
  0x21   : > { %5746 = sst [smem:[#allocation37_spill]] %s5745_s25  ;;  %s4820_s2 = smov [#allocation5]  }
  0x22   : > { %p5018_p10 = pnand %p3790_p7, %p545_p8  ;;  %s569_s27 = sshll.u32 %s4820_s2, 4  ;;  %s570_s27 = int_to_ptr.vmem [resolvable:$true] %s569_s27 }
  0x23   : > { %s4821_s0 = smov [#allocation8]   ;;  %s4822_s24 = smov [#allocation11]  }
  0x24   : > { %s5747_s26 = scalar_select %p5018_p10, 1, 0 }
  0x25   : > { %p4182_p11 = pneg %p5018_p10  ;;  %s597_s1 = sshll.u32 %s4821_s0, 4  ;;  %s598_s1 = int_to_ptr.vmem [resolvable:$true] %s597_s1 }
  0x26   : > { %s619_s29 = sshll.u32 %s4822_s24, 4  ;;  %s4403_s2 = scalar_lea.vmem %s570_s27, 16  ;;  %s5030_s29 = int_to_ptr.vmem [resolvable:$true] %s619_s29 }
  0x27   : > { %p5026_p12 = pnand %p5717_p9, %p4182_p11  ;;  %p4404_p0 = scmp.ne.s32.totalorder %s570_s27, %s4403_s2 }
  0x28   : > { %s4410_s0 = scalar_lea.vmem %s570_s27, 32  ;;  %p4411_p3 = scmp.lt.s32.totalorder %s570_s27, %s570_s27 }
  0x29   : > { %p5034_p13 = pneg %p5026_p12  ;;  %p4412_p4 = scmp.lt.s32.totalorder %s4410_s0, %s4403_s2 }
  0x2b   : > { %p4406_p1 = pnand %p4404_p0, %p5034_p13  ;;  %p4413_p7 = por %p4412_p4, %p4411_p3 }
  0x2d   : > { %p4407_p2 = pneg %p4406_p1 }
  0x2f   : > { %p4414_p8 = pnand %p4413_p7, %p4407_p2 }
  0x31   : > { %4417 = shalt.err (!%p4414_p8)
}
  0x32   : > { %s5750_s3 = sld [smem:[#allocation41_spill]]  ;;  %s4429_s30 = scalar_lea.vmem %s598_s1, 16 }
  0x33   : > { %p4430_p11 = scmp.ne.s32.totalorder %s598_s1, %s4429_s30  ;;  %s4436_s22 = scalar_lea.vmem %s598_s1, 32 }
  0x34   : > { %p4437_p0 = scmp.lt.s32.totalorder %s598_s1, %s598_s1  ;;  %p4438_p1 = scmp.lt.s32.totalorder %s4436_s22, %s4429_s30 }
  0x35   : > { %p4432_p9 = pnand %p4430_p11, %p5034_p13 }
  0x36   : > { %p4439_p5 = por %p4438_p1, %p4437_p0 }
  0x37   : > { %p4433_p6 = pneg %p4432_p9 }
  0x38   : > { %4188 = dma.hbm_to_vmem [thread:$0]  (!%p5026_p12), %s5750_s3, 16, %s570_s27, [#allocation6]  }
  0x39   : > { %p4440_p10 = pnand %p4439_p5, %p4433_p6 }
  0x3b   : > { %4443 = shalt.err (!%p4440_p10)
}
  0x3c   : > { %s5751_s7 = sld [smem:[#allocation45_spill]]  ;;  %s4455_s3 = scalar_lea.vmem %s5030_s29, 16 }
  0x3d   : > { %p4456_p2 = scmp.ne.s32.totalorder %s5030_s29, %s4455_s3  ;;  %s4462_s22 = scalar_lea.vmem %s5030_s29, 32 }
  0x3e   : > { %p4463_p5 = scmp.lt.s32.totalorder %s5030_s29, %s5030_s29  ;;  %p4464_p6 = scmp.lt.s32.totalorder %s4462_s22, %s4455_s3 }
  0x3f   : > { %p4458_p9 = pnand %p4456_p2, %p5034_p13 }
  0x40   : > { %p4465_p10 = por %p4464_p6, %p4463_p5 }
  0x41   : > { %p4459_p3 = pneg %p4458_p9 }
  0x42   : > { %4194 = dma.hbm_to_vmem [thread:$0]  (!%p5026_p12), %s5751_s7, 16, %s598_s1, [#allocation9]  }
  0x43   : > { %p4466_p4 = pnand %p4465_p10, %p4459_p3 }
  0x45   : > { %4469 = shalt.err (!%p4466_p4)
}
  0x46   : > { %4200 = dma.hbm_to_vmem [thread:$0]  (!%p5026_p12), %s5695_s9, 16, %s5030_s29, [#allocation12]  }
  0x47   : > { %s4823_s27 = smov [#allocation14]   ;;  %s4824_s24 = smov [#allocation17]  }
  0x48   : > { %s647_s1 = sshll.u32 %s4823_s27, 4  ;;  %s671_s2 = sshll.u32 %s4824_s24, 4  ;;  %s648_s1 = int_to_ptr.vmem [resolvable:$true] %s647_s1  ;;  %s672_s2 = int_to_ptr.vmem [resolvable:$true] %s671_s2 }
  0x49   : > { %s4481_s0 = scalar_lea.vmem %s648_s1, 16  ;;  %s4488_s3 = scalar_lea.vmem %s648_s1, 32 }
  0x4a   : > { %p4482_p7 = scmp.ne.s32.totalorder %s648_s1, %s4481_s0  ;;  %p4489_p0 = scmp.lt.s32.totalorder %s648_s1, %s648_s1 }
  0x4b   : > { %p4490_p1 = scmp.lt.s32.totalorder %s4488_s3, %s4481_s0 }
  0x4c   : > { %p4484_p8 = pnand %p4482_p7, %p5034_p13 }
  0x4d   : > { %p4491_p2 = por %p4490_p1, %p4489_p0 }
  0x4e   : > { %p4485_p11 = pneg %p4484_p8 }
  0x50   : > { %p4492_p9 = pnand %p4491_p2, %p4485_p11 }
  0x52   : > { %4495 = shalt.err (!%p4492_p9)
}
  0x53   : > { %4206 = dma.hbm_to_vmem [thread:$0]  (!%p5026_p12), %s5699_s13, 16, %s648_s1, [#allocation15]  }
  0x54   : > { %s4507_s30 = scalar_lea.vmem %s672_s2, 16  ;;  %s4514_s25 = scalar_lea.vmem %s672_s2, 32 }
  0x55   : > { %p4508_p3 = scmp.ne.s32.totalorder %s672_s2, %s4507_s30  ;;  %p4515_p10 = scmp.lt.s32.totalorder %s672_s2, %s672_s2 }
  0x56   : > { %p4516_p4 = scmp.lt.s32.totalorder %s4514_s25, %s4507_s30 }
  0x57   : > { %p4510_p5 = pnand %p4508_p3, %p5034_p13 }
  0x58   : > { %p4517_p7 = por %p4516_p4, %p4515_p10 }
  0x59   : > { %p4511_p6 = pneg %p4510_p5 }
  0x5b   : > { %p4518_p8 = pnand %p4517_p7, %p4511_p6 }
  0x5d   : > { %4521 = shalt.err (!%p4518_p8)
}
  0x5e   : > { %4212 = dma.hbm_to_vmem [thread:$0]  (!%p5026_p12), %s5701_s15, 16, %s672_s2, [#allocation18]  }
  0x5f   : > { %s4825_s1 = smov [#allocation20]   ;;  %s4826_s3 = smov [#allocation2]  }
  0x60   : > { %s693_s0 = sshll.u32 %s4825_s1, 4  ;;  %s558_s22 = sshll.u32 %s4826_s3, 4  ;;  %s694_s0 = int_to_ptr.vmem [resolvable:$true] %s693_s0  ;;  %s559_s22 = int_to_ptr.vmem [resolvable:$true] %s558_s22 }
  0x61   : > { %s4533_s29 = scalar_lea.vmem %s694_s0, 16  ;;  %s4540_s30 = scalar_lea.vmem %s694_s0, 32 }
  0x62   : > { %p4534_p11 = scmp.ne.s32.totalorder %s694_s0, %s4533_s29  ;;  %p4541_p2 = scmp.lt.s32.totalorder %s694_s0, %s694_s0 }
  0x63   : > { %p4542_p9 = scmp.lt.s32.totalorder %s4540_s30, %s4533_s29 }
  0x64   : > { %p4536_p0 = pnand %p4534_p11, %p5034_p13 }
  0x65   : > { %p4543_p3 = por %p4542_p9, %p4541_p2 }
  0x66   : > { %p4537_p1 = pneg %p4536_p0 }
  0x68   : > { %p4544_p5 = pnand %p4543_p3, %p4537_p1 }
  0x6a   : > { %4547 = shalt.err (!%p4544_p5)
}
  0x6b   : > { %4218 = dma.hbm_to_vmem [thread:$0]  (!%p5026_p12), %s5703_s17, 16, %s694_s0, [#allocation21]  }
  0x6c   : > { %s4559_s27 = scalar_lea.vmem %s559_s22, 16  ;;  %s4566_s24 = scalar_lea.vmem %s559_s22, 32 }
  0x6d   : > { %p4560_p6 = scmp.ne.s32.totalorder %s559_s22, %s4559_s27  ;;  %p4567_p7 = scmp.lt.s32.totalorder %s559_s22, %s559_s22 }
  0x6e   : > { %p4568_p8 = scmp.lt.s32.totalorder %s4566_s24, %s4559_s27 }
  0x6f   : > { %p4562_p10 = pnand %p4560_p6, %p5034_p13 }
  0x70   : > { %p4569_p11 = por %p4568_p8, %p4567_p7 }
  0x71   : > { %p4563_p4 = pneg %p4562_p10 }
  0x73   : > { %p4570_p0 = pnand %p4569_p11, %p4563_p4 }
  0x75   : > { %4573 = shalt.err (!%p4570_p0)
}
  0x76   : > { %s5752_s29 = sld [smem:[#allocation40_spill]]  ;;  %s4827_s0 = smov [#allocation7]  }
  0x77   : > { %s583_s30 = sshll.u32 %s4827_s0, 4  ;;  %s4828_s25 = smov [#allocation10]   ;;  %s584_s30 = int_to_ptr.vmem [resolvable:$true] %s583_s30 }
  0x78   : > { %s608_s2 = sshll.u32 %s4828_s25, 4  ;;  %s4585_s7 = scalar_lea.vmem %s584_s30, 16  ;;  %s609_s2 = int_to_ptr.vmem [resolvable:$true] %s608_s2 }
  0x79   : > { %p4586_p1 = scmp.ne.s32.totalorder %s584_s30, %s4585_s7  ;;  %s4592_s27 = scalar_lea.vmem %s584_s30, 32 }
  0x7a   : > { %p4593_p3 = scmp.lt.s32.totalorder %s584_s30, %s584_s30  ;;  %p4594_p5 = scmp.lt.s32.totalorder %s4592_s27, %s4585_s7 }
  0x7b   : > { %p4588_p2 = pnand %p4586_p1, %p5034_p13 }
  0x7c   : > { %4185 = dma.hbm_to_vmem [thread:$0]  (!%p5026_p12), %s5752_s29, 16, %s559_s22, [#allocation3]  }
  0x7d   : > { %p4589_p9 = pneg %p4588_p2  ;;  %p4595_p6 = por %p4594_p5, %p4593_p3 }
  0x7f   : > { %p4596_p10 = pnand %p4595_p6, %p4589_p9 }
  0x81   : > { %4599 = shalt.err (!%p4596_p10)
}
  0x82   : > { %s5753_s1 = sld [smem:[#allocation43_spill]]  ;;  %s4611_s3 = scalar_lea.vmem %s609_s2, 16 }
  0x83   : > { %p4612_p4 = scmp.ne.s32.totalorder %s609_s2, %s4611_s3  ;;  %s4618_s29 = scalar_lea.vmem %s609_s2, 32 }
  0x84   : > { %p4619_p11 = scmp.lt.s32.totalorder %s609_s2, %s609_s2  ;;  %p4620_p0 = scmp.lt.s32.totalorder %s4618_s29, %s4611_s3 }
  0x85   : > { %p4614_p7 = pnand %p4612_p4, %p5034_p13 }
  0x86   : > { %p4621_p1 = por %p4620_p0, %p4619_p11 }
  0x87   : > { %p4615_p8 = pneg %p4614_p7 }
  0x88   : > { %4191 = dma.hbm_to_vmem [thread:$0]  (!%p5026_p12), %s5753_s1, 16, %s584_s30, [#allocation6]  }
  0x89   : > { %p4622_p2 = pnand %p4621_p1, %p4615_p8 }
  0x8b   : > { %4625 = shalt.err (!%p4622_p2)
}
  0x8c   : > { %4197 = dma.hbm_to_vmem [thread:$0]  (!%p5026_p12), %s5694_s8, 16, %s609_s2, [#allocation9]  }
  0x8d   : > { %s4829_s30 = smov [#allocation13]   ;;  %s4830_s27 = smov [#allocation16]  }
  0x8e   : > { %s633_s25 = sshll.u32 %s4829_s30, 4  ;;  %s657_s24 = sshll.u32 %s4830_s27, 4  ;;  %s634_s25 = int_to_ptr.vmem [resolvable:$true] %s633_s25  ;;  %s658_s24 = int_to_ptr.vmem [resolvable:$true] %s657_s24 }
  0x8f   : > { %s4637_s22 = scalar_lea.vmem %s634_s25, 16  ;;  %s4644_s1 = scalar_lea.vmem %s634_s25, 32 }
  0x90   : > { %p4638_p9 = scmp.ne.s32.totalorder %s634_s25, %s4637_s22  ;;  %p4645_p6 = scmp.lt.s32.totalorder %s634_s25, %s634_s25 }
  0x91   : > { %p4646_p10 = scmp.lt.s32.totalorder %s4644_s1, %s4637_s22 }
  0x92   : > { %p4640_p3 = pnand %p4638_p9, %p5034_p13 }
  0x93   : > { %p4647_p4 = por %p4646_p10, %p4645_p6 }
  0x94   : > { %p4641_p5 = pneg %p4640_p3 }
  0x96   : > { %p4648_p7 = pnand %p4647_p4, %p4641_p5 }
  0x98   : > { %4651 = shalt.err (!%p4648_p7)
}
  0x99   : > { %4203 = dma.hbm_to_vmem [thread:$0]  (!%p5026_p12), %s5697_s11, 16, %s634_s25, [#allocation12]  }
  0x9a   : > { %s4663_s29 = scalar_lea.vmem %s658_s24, 256  ;;  %p4671_p1 = scmp.lt.s32.totalorder %s658_s24, %s658_s24 }
  0x9b   : > { %p4664_p8 = scmp.ne.s32.totalorder %s658_s24, %s4663_s29  ;;  %p4672_p2 = scmp.lt.s32.totalorder %s4663_s29, %s4663_s29 }
  0x9d   : > { %p4666_p11 = pnand %p4664_p8, %p5034_p13  ;;  %p4673_p9 = por %p4672_p2, %p4671_p1 }
  0x9f   : > { %p4667_p0 = pneg %p4666_p11 }
  0xa1   : > { %p4674_p3 = pnand %p4673_p9, %p4667_p0 }
  0xa3   : > { %4677 = shalt.err (!%p4674_p3)
}
  0xa4   : > { %s4831_s7 = smov 64   ;;  %s4832_s0 = smov 4  }
  0xa5   : > { %4209 = dma.hbm_to_vmem [thread:$0]  (!%p5026_p12), %s5700_s14, 256, %s658_s24, [#allocation15], %s4831_s7, %s4831_s7, %s4832_s0  }
  0xa6   : > { %s4833_s27 = smov [#allocation19]   ;;  %s4834_s1 = smov [#allocation22]  }
  0xa7   : > { %s682_s22 = sshll.u32 %s4833_s27, 4  ;;  %s703_s3 = sshll.u32 %s4834_s1, 4  ;;  %s683_s22 = int_to_ptr.vmem [resolvable:$true] %s682_s22  ;;  %s704_s3 = int_to_ptr.vmem [resolvable:$true] %s703_s3 }
  0xa8   : > { %s4689_s2 = scalar_lea.vmem %s683_s22, 16  ;;  %s4696_s29 = scalar_lea.vmem %s683_s22, 32 }
  0xa9   : > { %p4690_p5 = scmp.ne.s32.totalorder %s683_s22, %s4689_s2  ;;  %p4697_p4 = scmp.lt.s32.totalorder %s683_s22, %s683_s22 }
  0xaa   : > { %p4698_p7 = scmp.lt.s32.totalorder %s4696_s29, %s4689_s2 }
  0xab   : > { %p4692_p6 = pnand %p4690_p5, %p5034_p13 }
  0xac   : > { %p4699_p8 = por %p4698_p7, %p4697_p4 }
  0xad   : > { %p4693_p10 = pneg %p4692_p6 }
  0xaf   : > { %p4700_p11 = pnand %p4699_p8, %p4693_p10 }
  0xb1   : > { %4703 = shalt.err (!%p4700_p11)
}
  0xb2   : > { %4215 = dma.hbm_to_vmem [thread:$0]  (!%p5026_p12), %s5702_s16, 16, %s683_s22, [#allocation18]  }
  0xb3   : > { %s4715_s25 = scalar_lea.vmem %s704_s3, 256  ;;  %p4723_p9 = scmp.lt.s32.totalorder %s704_s3, %s704_s3 }
  0xb4   : > { %p4716_p0 = scmp.ne.s32.totalorder %s704_s3, %s4715_s25  ;;  %p4724_p3 = scmp.lt.s32.totalorder %s4715_s25, %s4715_s25 }
  0xb6   : > { %p4718_p1 = pnand %p4716_p0, %p5034_p13  ;;  %p4725_p5 = por %p4724_p3, %p4723_p9 }
  0xb8   : > { %p4719_p2 = pneg %p4718_p1 }
  0xba   : > { %p4726_p6 = pnand %p4725_p5, %p4719_p2 }
  0xbc   : > { %4729 = shalt.err (!%p4726_p6)
}
  0xbd   : > { %4221 = dma.hbm_to_vmem [thread:$0]  (!%p5026_p12), %s5704_s18, 256, %s704_s3, [#allocation21], %s4831_s7, %s4831_s7, %s4832_s0  }
  0xbe   : > { %p5754_p10 = scmp.ne.s32.totalorder %s5747_s26, 0 }
  0xbf   : > { %p5755_p13 = scmp.eq.s32.totalorder (!%p5754_p10), %s4990_s4, 0 }
  0xc0   : > { %742 = sbr.rel (%p5754_p10) target bundleno = 4137 (0x1029), region = 108 }
  0xc5   : > { %4773 = dma.done.wait (%p5755_p13), [#allocation3], 16   ;;  %p5756_p4 = pmov %p5755_p13 }
  0xc7   : > { %4775 = vsyncadd (%p5756_p4), [#allocation3], 4294967280  ;;  %p5757_p7 = pmov %p5756_p4 }
  0xc8   : > { %p5758_p8 = pmov %p5756_p4 }
  0xc9   : > { %4777 = dma.done.wait (%p5757_p7), [#allocation6], 32  }
  0xca   : > { %4779 = vsyncadd (%p5758_p8), [#allocation6], 4294967264  ;;  %p5759_p11 = pmov %p5756_p4 }
  0xcb   : > { %p5760_p12 = pmov %p5756_p4 }
  0xcc   : > { %4781 = dma.done.wait (%p5759_p11), [#allocation9], 32  }
  0xcd   : > { %4783 = vsyncadd (%p5760_p12), [#allocation9], 4294967264  ;;  %p5761_p0 = pmov %p5756_p4 }
  0xcf   : > { %4785 = dma.done.wait (%p5761_p0), [#allocation12], 32   ;;  %p5762_p1 = pmov %p5761_p0 }
  0xd0   : > { %p5763_p2 = pmov %p5761_p0 }
  0xd1   : > { %4787 = vsyncadd (%p5762_p1), [#allocation12], 4294967264 }
  0xd2   : > { %4789 = dma.done.wait (%p5763_p2), [#allocation15], 272   ;;  %p5764_p9 = pmov %p5761_p0 }
  0xd3   : > { %p5765_p3 = pmov %p5761_p0 }
  0xd4   : > { %4791 = vsyncadd (%p5764_p9), [#allocation15], 4294967024 }
  0xd5   : > { %4793 = dma.done.wait (%p5765_p3), [#allocation18], 32   ;;  %p5766_p5 = pmov %p5761_p0 }
  0xd6   : > { %p5767_p6 = pmov %p5761_p0 }
  0xd7   : > { %4795 = vsyncadd (%p5766_p5), [#allocation18], 4294967264 }
  0xd8   : > { %4797 = dma.done.wait (%p5767_p6), [#allocation21], 272   ;;  %p5768_p10 = pmov %p5761_p0 }
  0xd9   : > { %p855_p13 = scmp.lt.s32.totalorder %s4990_s4, 1  ;;  %s5769_s0 = sld [smem:[#allocation38_spill]]  ;;  %vm868_vm0 = vcmask 261120   ;;  %v4835_v8 = vmov 0.0   ;;  %vm4836_vm1 = vmmov 0   ;;  %v1003_v28 = vlaneseq }
  0xda   : > { %4799 = vsyncadd (%p5768_p10), [#allocation21], 4294967024  ;;  %s5770_s29 = sld [smem:[#allocation42_spill]]  ;;  %3964 = vmatprep.subr.bf16.mxu1 %v4835_v8  ;;  %3968 = vmatprep.mubr.msk.bf16.mxu1 %vm4836_vm1, %v4835_v8  ;;  %v3822_v14 = vld [vmem:[#allocation2] ss:$0 sm:$0xff]  ;;  %s5725_s27 = smov 80  }
  0xdb   : > { %s5173_s23 = scalar_select %p855_p13, %s4990_s4, 1  ;;  %3990 = vmatprep.subr.bf16.mxu0 %v4835_v8  ;;  %3992 = vmatprep.mubr.msk.bf16.mxu0 %vm4836_vm1, %v4835_v8  ;;  %v3823_v16 = vld [vmem:[#allocation5] ss:$0 sm:$0xff]  ;;  %v3824_v20 = vld [vmem:[#allocation7] ss:$0 sm:$0xff]  ;;  %v5222_v33 = vshrl.u32 %v1003_v28, 7 }
  0xdc   : > { %s5726_s1 = smov 96   ;;  %s5727_s5 = smov 88   ;;  %v4845_v26 = vmov 1983009808   ;;  %v4846_v30 = vmov 1934713408  }
  0xdd   : > { %s3820_s26 = sshll.u32 %s5173_s23, 3  ;;  %s5724_s7 = smov 72   ;;  %v1001_v27 = vunpack.c.l.s4 %v4845_v26  ;;  %v1065_v31 = vunpack.c.l.s4 %v4846_v30  ;;  %vm1423_vm2 = vcmask 64512   ;;  %vm1682_vm4 = vcmask 1043456  }
  0xde   : > { %s5728_s3 = smov 104   ;;  %s4844_s2 = smov 64   ;;  %vm2025_vm5 = vcmask 130048   ;;  %vm2027_vm6 = vcmask 195584  }
  0xdf   : > { %s858_s22 = scalar_lea.vmem %s5769_s0, %s3820_s26  ;;  %s4841_s0 = smov 120   ;;  %v1002_v32 = vunpack.c.0.s8 %v1001_v27  ;;  %v1066_v36 = vunpack.c.0.s8 %v1065_v31 }
  0xe0   : > { %v5181_v0 = vld [vmem:[%s858_s22] sm:$0xff]  ;;  %s5771_s24 = smov %s5770_s29  ;;  %v4318_v7 = vld [vmem:[%s5770_s29 + $0x8] sm:$0xff]   ;;  %s4842_s22 = smov 112  }
  0xe1   : > { %v869_v1 = vsel %vm868_vm0, %v5181_v0, 0.0  ;;  %3965 = vmatpush3.bf16.msra.mxu1 %v4318_v7  ;;  %v4319_v9 = vld [vmem:[%s5771_s24] sm:$0xff]   ;;  %v5225_v37 = vsub.s32 %v1002_v32, %v5222_v33  ;;  %v5228_v43 = vsub.s32 %v1066_v36, %v5222_v33  ;;  %s4847_s29 = smov 48   ;;  %s4848_s30 = smov 40  }
  0xe2   : > { %870 = vadd.xlane.f32.xlu0 %v869_v1  ;;  %3966 = vmatprep.subr.bf16.mxu1 %v4835_v8  ;;  %s4849_s25 = smov 56   ;;  %p5784_p7 = scmp.ne.s32.totalorder %s5744_s6, 0 }
  0xe5   : > { %3967 = vmatpush3.bf16.msra.mxu1 %v4319_v9 }
  0xe6   : > { %3972 = vmatprep.subr.bf16.mxu1 %v4835_v8 }
 0x16b   : > { %v871_v2 = vpop.xlane.xlu0 %870 }
 0x16c   : > { %v873_v3 = vmul.f32 0.03125, %v871_v2 }
 0x16e   : > { %v874_v4 = vsub.f32 %v5181_v0, %v873_v3 }
 0x170   : > { %v875_v5 = vmul.f32 %v874_v4, %v874_v4 }
 0x172   : > { %v876_v6 = vsel %vm868_vm0, %v875_v5, 0.0 }
 0x173   : > { %877 = vadd.xlane.f32.xlu0 %v876_v6 }
 0x1fc   : > { %v878_v10 = vpop.xlane.xlu0 %877 }
 0x1fd   : > { %v879_v11 = vmul.f32 0.03125, %v878_v10 }
 0x1ff   : > { %v880_v12 = vadd.f32 1e-05, %v879_v11 }
 0x201   : > { %4338 = vrsqrt.f32 %v880_v12 }
 0x20e   : > { %v4339_v13 = vpop.eup %4338 }
 0x20f   : > { %v882_v15 = vmul.f32 %v4339_v13, %v874_v4 }
 0x211   : > { %v889_v17 = vmul.f32 %v3822_v14, %v882_v15 }
 0x213   : > { %v896_v18 = vadd.f32 %v3823_v16, %v889_v17 }
 0x215   : > { %v897_v19 = vpack.c.bf16 %v896_v18, %v896_v18 }
 0x217   : > { %3969 = vmatmul.mubr.msk.bf16.vlgmr.msra.gmra.mxu1 %vm868_vm0, %v897_v19 }
 0x218   : > { %3974 = vmatprep.mubr.msk.bf16.mxu1 %vm4836_vm1, %v4835_v8 }
 0x2d7   : > { %v958_v21 = vpop.f32.mrf.mxu1 }
 0x2d8   : > { %v5204_v22 = vadd.f32 %v3824_v20, %v958_v21 }
 0x2d9   : > { %v3970_v23 = vpop.f32.mrf.mxu1 }
 0x2da   : > { %980 = vrot.lane.b32.xlu0 %v5204_v22, %s5725_s27  ;;  %974 = vrot.lane.b32.xlu1 %v5204_v22, %s5726_s1  ;;  %s5783_s1 = sld [smem:[#allocation46_spill]] }
 0x2db   : > { %v961_v24 = vpop.f32.mrf.mxu1 }
 0x2dd   : > { %v3971_v25 = vpop.f32.mrf.mxu1 }
 0x2de   : > { %977 = vrot.lane.b32.xlu1 %v5204_v22, %s5727_s5  ;;  %s5775_s5 = smov 104  }
 0x2e2   : > { %983 = vrot.lane.b32.xlu1 %v5204_v22, %s5724_s7 }
 0x2e6   : > { %965 = vrot.lane.b32.xlu1 %v5204_v22, %s4841_s0 }
 0x2ea   : > { %968 = vrot.lane.b32.xlu1 %v5204_v22, %s4842_s22 }
 0x2ee   : > { %971 = vrot.lane.b32.xlu1 %v5204_v22, %s5728_s3  ;;  %s5777_s3 = smov 96  }
 0x2f2   : > { %986 = vrot.lane.b32.xlu1 %v5204_v22, %s4844_s2  ;;  %s5722_s2 = smov 8  }
 0x34c   : > { %v975_v29 = vpop.permute.xlu1 %974  ;;  %v981_v34 = vpop.permute.xlu0 %980 }
 0x34d   : > { %v1030_v38 = vcombine.low %v975_v29, %v981_v34  ;;  %v1031_v39 = vcombine.high %v975_v29, %v981_v34 }
 0x34f   : > { %v1038_v44 = vrot.slane %v1030_v38, %v5225_v37  ;;  %v1045_v45 = vrot.slane %v1031_v39, %v5225_v37 }
 0x350   : > { %v978_v35 = vpop.permute.xlu1 %977 }
 0x354   : > { %v984_v40 = vpop.permute.xlu1 %983 }
 0x355   : > { %v1046_v41 = vcombine.low %v978_v35, %v984_v40  ;;  %v1047_v42 = vcombine.high %v978_v35, %v984_v40 }
 0x357   : > { %v1054_v46 = vrot.slane %v1046_v41, %v5225_v37  ;;  %v1061_v47 = vrot.slane %v1047_v42, %v5225_v37 }
 0x358   : > { %v966_v48 = vpop.permute.xlu1 %965 }
 0x359   : > { %v1094_v49 = vcombine.low %v1038_v44, %v1054_v46  ;;  %v1095_v50 = vcombine.high %v1038_v44, %v1054_v46  ;;  %v1110_v51 = vcombine.low %v1045_v45, %v1061_v47  ;;  %v1111_v52 = vcombine.high %v1045_v45, %v1061_v47 }
 0x35b   : > { %v1102_v53 = vrot.slane %v1094_v49, %v5228_v43  ;;  %v1109_v54 = vrot.slane %v1095_v50, %v5228_v43  ;;  %v1118_v55 = vrot.slane %v1110_v51, %v5228_v43  ;;  %v1125_v56 = vrot.slane %v1111_v52, %v5228_v43 }
 0x35c   : > { %v969_v57 = vpop.permute.xlu1 %968 }
 0x35d   : > { %v3829_v58 = vcombine.low %v1102_v53, %v1109_v54  ;;  %v3831_v59 = vcombine.high %v1102_v53, %v1109_v54  ;;  %v3833_v60 = vcombine.low %v1118_v55, %v1125_v56  ;;  %v3835_v61 = vcombine.high %v1118_v55, %v1125_v56 }
 0x35e   : > { %v998_v62 = vcombine.low %v5204_v22, %v969_v57  ;;  %v999_v63 = vcombine.high %v5204_v22, %v969_v57 }
 0x35f   : > { %v1217_v1 = vrot.slane %v3829_v58, %v5225_v37  ;;  %v1233_v2 = vrot.slane %v3831_v59, %v5225_v37  ;;  %v1249_v3 = vrot.slane %v3833_v60, %v5225_v37  ;;  %v1265_v4 = vrot.slane %v3835_v61, %v5225_v37 }
 0x360   : > { %v972_v5 = vpop.permute.xlu1 %971  ;;  %v1006_v11 = vrot.slane %v998_v62, %v5225_v37  ;;  %v1013_v12 = vrot.slane %v999_v63, %v5225_v37 }
 0x361   : > { %v1014_v6 = vcombine.low %v966_v48, %v972_v5  ;;  %v1015_v7 = vcombine.high %v966_v48, %v972_v5  ;;  %v1282_v9 = vcombine.low %v1217_v1, %v1233_v2  ;;  %v1314_v10 = vcombine.low %v1249_v3, %v1265_v4 }
 0x362   : > { %v1283_v13 = vcombine.high %v1217_v1, %v1233_v2  ;;  %v1315_v14 = vcombine.high %v1249_v3, %v1265_v4 }
 0x363   : > { %v1022_v15 = vrot.slane %v1014_v6, %v5225_v37  ;;  %v1029_v16 = vrot.slane %v1015_v7, %v5225_v37  ;;  %v1290_v17 = vrot.slane %v1282_v9, %v5228_v43  ;;  %v1322_v18 = vrot.slane %v1314_v10, %v5228_v43 }
 0x364   : > { %v1297_v19 = vrot.slane %v1283_v13, %v5228_v43  ;;  %v1329_v20 = vrot.slane %v1315_v14, %v5228_v43  ;;  %v1611_v7 = vand.u32 127, %v1003_v28 }
 0x365   : > { %v1062_v21 = vcombine.low %v1006_v11, %v1022_v15  ;;  %v1063_v23 = vcombine.high %v1006_v11, %v1022_v15  ;;  %v1078_v24 = vcombine.low %v1013_v12, %v1029_v16  ;;  %v1079_v25 = vcombine.high %v1013_v12, %v1029_v16 }
 0x366   : > { %v1334_v26 = vcombine.low %v1290_v17, %v1322_v18  ;;  %v1337_v27 = vcombine.high %v1297_v19, %v1329_v20  ;;  %v1335_v48 = vcombine.high %v1290_v17, %v1322_v18  ;;  %v1336_v63 = vcombine.low %v1297_v19, %v1329_v20 }
 0x367   : > { %v1070_v29 = vrot.slane %v1062_v21, %v5228_v43  ;;  %v1077_v30 = vrot.slane %v1063_v23, %v5228_v43  ;;  %v1086_v31 = vrot.slane %v1078_v24, %v5228_v43  ;;  %v1093_v32 = vrot.slane %v1079_v25, %v5228_v43 }
 0x368   : > { %v1410_v34 = vpack.c.bf16 %v1334_v26, %v1334_v26  ;;  %v1413_v35 = vpack.c.bf16 %v1337_v27, %v1337_v27  ;;  %v1411_v58 = vpack.c.bf16 %v1335_v48, %v1335_v48  ;;  %v1412_v2 = vpack.c.bf16 %v1336_v63, %v1336_v63 }
 0x369   : > { %v3828_v36 = vcombine.low %v1070_v29, %v1077_v30  ;;  %v3830_v38 = vcombine.high %v1070_v29, %v1077_v30  ;;  %v3832_v39 = vcombine.low %v1086_v31, %v1093_v32  ;;  %v3834_v40 = vcombine.high %v1086_v31, %v1093_v32 }
 0x36a   : > { %v1428_v41 = vsel %vm1423_vm2, %v1410_v34, 0  ;;  %v1566_v42 = vsel %vm1423_vm2, %v1413_v35, 0  ;;  %v1474_v62 = vsel %vm1423_vm2, %v1411_v58, 0  ;;  %v1520_v4 = vsel %vm1423_vm2, %v1412_v2, 0  ;;  %v987_v35 = vpop.permute.xlu1 %986 }
 0x36b   : > { %v1210_v44 = vrot.slane %v3828_v36, %v5225_v37  ;;  %v1226_v45 = vrot.slane %v3830_v38, %v5225_v37  ;;  %v1242_v46 = vrot.slane %v3832_v39, %v5225_v37  ;;  %v1258_v47 = vrot.slane %v3834_v40, %v5225_v37  ;;  %3973 = vmatpush3.bf16.xpose.msra.mxu1 %v1428_v41 }
 0x36c   : > { %3991 = vmatpush3.bf16.xpose.msra.mxu0 %v1566_v42  ;;  %3978 = vmatprep.subr.bf16.mxu1 %v4835_v8  ;;  %vm1612_vm3 = vcmp.le.s32.totalorder %v1611_v7, %v5222_v33 }
 0x36d   : > { %v1266_v49 = vcombine.low %v1210_v44, %v1226_v45  ;;  %v1298_v50 = vcombine.low %v1242_v46, %v1258_v47  ;;  %v1267_v51 = vcombine.high %v1210_v44, %v1226_v45  ;;  %v1299_v52 = vcombine.high %v1242_v46, %v1258_v47  ;;  %4002 = vmatprep.subr.bf16.mxu0 %v4835_v8 }
 0x36f   : > { %v1274_v53 = vrot.slane %v1266_v49, %v5228_v43  ;;  %v1306_v54 = vrot.slane %v1298_v50, %v5228_v43  ;;  %v1281_v55 = vrot.slane %v1267_v51, %v5228_v43  ;;  %v1313_v56 = vrot.slane %v1299_v52, %v5228_v43 }
 0x371   : > { %v1330_v57 = vcombine.low %v1274_v53, %v1306_v54  ;;  %v1333_v59 = vcombine.high %v1281_v55, %v1313_v56  ;;  %v1331_v1 = vcombine.high %v1274_v53, %v1306_v54  ;;  %v1332_v5 = vcombine.low %v1281_v55, %v1313_v56 }
 0x373   : > { %v1406_v60 = vpack.c.bf16 %v1330_v57, %v1330_v57  ;;  %v1409_v61 = vpack.c.bf16 %v1333_v59, %v1333_v59  ;;  %v1407_v3 = vpack.c.bf16 %v1331_v1, %v1331_v1  ;;  %v1408_v6 = vpack.c.bf16 %v1332_v5, %v1332_v5 }
 0x375   : > { %3975 = vmatmul.mubr.msk.bf16.vlgmr.msra.gmra.mxu1 %vm1423_vm2, %v1406_v60  ;;  %3993 = vmatmul.mubr.msk.bf16.vlgmr.msra.gmra.mxu0 %vm1423_vm2, %v1409_v61 }
 0x376   : > { %3979 = vmatpush3.bf16.xpose.msra.mxu1 %v1474_v62  ;;  %3980 = vmatprep.mubr.msk.bf16.mxu1 %vm4836_vm1, %v4835_v8 }
 0x377   : > { %3984 = vmatprep.subr.bf16.mxu1 %v4835_v8  ;;  %4004 = vmatprep.mubr.msk.bf16.mxu0 %vm4836_vm1, %v4835_v8 }
 0x37d   : > { %3981 = vmatmul.mubr.msk.bf16.vlgmr.msra.gmra.mxu1 %vm1423_vm2, %v1407_v3 }
 0x37e   : > { %3985 = vmatpush3.bf16.xpose.msra.mxu1 %v1520_v4  ;;  %3986 = vmatprep.mubr.msk.bf16.mxu1 %vm4836_vm1, %v4835_v8 }
 0x37f   : > { %3996 = vmatprep.subr.bf16.mxu1 %v4835_v8 }
 0x385   : > { %3987 = vmatmul.mubr.msk.bf16.vlgmr.msra.gmra.mxu1 %vm1423_vm2, %v1408_v6 }
 0x386   : > { %3998 = vmatprep.mubr.msk.bf16.mxu1 %vm4836_vm1, %v4835_v8 }
 0x435   : > { %v1464_v9 = vpop.f32.mrf.mxu1  ;;  %v1602_v10 = vpop.f32.mrf.mxu0 }
 0x436   : > { %v1615_v11 = vsel %vm1612_vm3, %v1464_v9, -inf  ;;  %v5297_v30 = vsel %vm1612_vm3, %v1602_v10, -inf }
 0x437   : > { %v3976_v12 = vpop.f32.mrf.mxu1  ;;  %v3994_v13 = vpop.f32.mrf.mxu0  ;;  %v1619_v14 = vsel %vm1423_vm2, %v1615_v11, -inf  ;;  %v1628_v31 = vsel %vm1423_vm2, %v5297_v30, -inf }
 0x438   : > { %1620 = vmax.xlane.f32.xlu1 %v1619_v14 }
 0x439   : > { %v1467_v15 = vpop.f32.mrf.mxu1  ;;  %v1605_v16 = vpop.f32.mrf.mxu0 }
 0x43b   : > { %v3977_v17 = vpop.f32.mrf.mxu1  ;;  %v3995_v18 = vpop.f32.mrf.mxu0 }
 0x43d   : > { %v1510_v19 = vpop.f32.mrf.mxu1 }
 0x43e   : > { %v1616_v28 = vsel %vm1612_vm3, %v1510_v19, -inf }
 0x43f   : > { %v3982_v20 = vpop.f32.mrf.mxu1  ;;  %v1622_v21 = vsel %vm1423_vm2, %v1616_v28, -inf }
 0x440   : > { %1623 = vmax.xlane.f32.xlu0 %v1622_v21 }
 0x441   : > { %v1513_v23 = vpop.f32.mrf.mxu1 }
 0x443   : > { %v3983_v24 = vpop.f32.mrf.mxu1 }
 0x445   : > { %v1556_v25 = vpop.f32.mrf.mxu1 }
 0x446   : > { %v5303_v32 = vsel %vm1612_vm3, %v1556_v25, -inf }
 0x447   : > { %v3988_v26 = vpop.f32.mrf.mxu1  ;;  %v1625_v34 = vsel %vm1423_vm2, %v5303_v32, -inf }
 0x449   : > { %992 = vrot.lane.b32.xlu1 %v5204_v22, %s4847_s29  ;;  %v1559_v27 = vpop.f32.mrf.mxu1  ;;  %s5721_s29 = smov 24  }
 0x44b   : > { %v3989_v29 = vpop.f32.mrf.mxu1 }
 0x44d   : > { %995 = vrot.lane.b32.xlu1 %v5204_v22, %s4848_s30  ;;  %s5772_s30 = sld [smem:[#allocation44_spill]] }
 0x456   : > { %989 = vrot.lane.b32.xlu0 %v5204_v22, %s4849_s25  ;;  %s5773_s25 = smov %s5772_s30 }
 0x471   : > { %1629 = vmax.xlane.f32.xlu1 %v1628_v31 }
 0x475   : > { %1626 = vmax.xlane.f32.xlu0 %v1625_v34 }
 0x4c1   : > { %v5307_v36 = vpop.xlane.xlu1 %1620 }
 0x4c2   : > { %v1643_v22 = vsub.f32 %v1615_v11, %v5307_v36 }
 0x4c4   : > { %v1647_v38 = vmul.f32 1.442695, %v1643_v22 }
 0x4c5   : > { %v993_v39 = vpop.permute.xlu1 %992 }
 0x4c6   : > { %4340 = vpow2.f32 %v1647_v38  ;;  %v1134_v33 = vcombine.low %v987_v35, %v993_v39  ;;  %v1135_v42 = vcombine.high %v987_v35, %v993_v39 }
 0x4c8   : > { %v1142_v49 = vrot.slane %v1134_v33, %v5225_v37  ;;  %v1149_v50 = vrot.slane %v1135_v42, %v5225_v37 }
 0x4c9   : > { %v5310_v40 = vpop.xlane.xlu0 %1623  ;;  %v996_v45 = vpop.permute.xlu1 %995 }
 0x4ca   : > { %v1644_v41 = vsub.f32 %v1616_v28, %v5310_v40 }
 0x4cc   : > { %v1649_v44 = vmul.f32 1.442695, %v1644_v41 }
 0x4cd   : > { %v990_v46 = vpop.permute.xlu0 %989 }
 0x4ce   : > { %v1150_v47 = vcombine.low %v990_v46, %v996_v45  ;;  %v1151_v48 = vcombine.high %v990_v46, %v996_v45  ;;  %4342 = vpow2.f32 %v1649_v44 }
 0x4d0   : > { %v1158_v51 = vrot.slane %v1150_v47, %v5225_v37  ;;  %v1165_v52 = vrot.slane %v1151_v48, %v5225_v37 }
 0x4d2   : > { %v1166_v53 = vcombine.low %v1142_v49, %v1158_v51  ;;  %v1167_v54 = vcombine.high %v1142_v49, %v1158_v51  ;;  %v1182_v55 = vcombine.low %v1149_v50, %v1165_v52  ;;  %v1183_v56 = vcombine.high %v1149_v50, %v1165_v52 }
 0x4d3   : > { %v4341_v57 = vpop.eup %4340 }
 0x4d4   : > { %v1174_v58 = vrot.slane %v1166_v53, %v5228_v43  ;;  %v1181_v59 = vrot.slane %v1167_v54, %v5228_v43  ;;  %v1190_v60 = vrot.slane %v1182_v55, %v5228_v43  ;;  %v1197_v61 = vrot.slane %v1183_v56, %v5228_v43 }
 0x4d5   : > { %v1659_v62 = vsel %vm1423_vm2, %v4341_v57, 0.0  ;;  %v1675_v31 = vpack.c.bf16 %v4341_v57, %v4341_v57  ;;  %v1632_v55 = vsub.f32 -inf, %v5310_v40  ;;  %v1631_v56 = vsub.f32 -inf, %v5307_v36 }
 0x4d6   : > { %v1338_v63 = vcombine.low %v1174_v58, %v1181_v59  ;;  %v3836_v1 = vcombine.high %v1174_v58, %v1181_v59  ;;  %v1354_v2 = vcombine.low %v1190_v60, %v1197_v61  ;;  %v3837_v3 = vcombine.high %v1190_v60, %v1197_v61  ;;  %1660 = vadd.xlane.f32.xlu0 %v1659_v62 }
 0x4d8   : > { %v1345_v4 = vrot.slane %v1338_v63, %v5225_v37  ;;  %v1353_v5 = vrot.slane %v3836_v1, %v5225_v37  ;;  %v1361_v6 = vrot.slane %v1354_v2, %v5225_v37  ;;  %v1369_v7 = vrot.slane %v3837_v3, %v5225_v37 }
 0x4d9   : > { %v1637_v63 = vmul.f32 1.442695, %v1632_v55  ;;  %v1635_v1 = vmul.f32 1.442695, %v1631_v56 }
 0x4da   : > { %v1370_v9 = vcombine.low %v1345_v4, %v1353_v5  ;;  %v1386_v10 = vcombine.low %v1361_v6, %v1369_v7  ;;  %v1371_v11 = vcombine.high %v1345_v4, %v1353_v5  ;;  %v1387_v12 = vcombine.high %v1361_v6, %v1369_v7 }
 0x4db   : > { %v4343_v13 = vpop.eup %4342 }
 0x4dc   : > { %v1378_v14 = vrot.slane %v1370_v9, %v5228_v43  ;;  %v1394_v15 = vrot.slane %v1386_v10, %v5228_v43  ;;  %v1385_v16 = vrot.slane %v1371_v11, %v5228_v43  ;;  %v1401_v17 = vrot.slane %v1387_v12, %v5228_v43 }
 0x4dd   : > { %v1662_v18 = vsel %vm1423_vm2, %v4343_v13, 0.0  ;;  %v1676_v34 = vpack.c.bf16 %v4343_v13, %v4343_v13 }
 0x4de   : > { %1663 = vadd.xlane.f32.xlu0 %v1662_v18  ;;  %v1402_v19 = vcombine.low %v1378_v14, %v1394_v15  ;;  %v1403_v28 = vcombine.high %v1378_v14, %v1394_v15  ;;  %v1404_v20 = vcombine.low %v1385_v16, %v1401_v17  ;;  %v1405_v21 = vcombine.high %v1385_v16, %v1401_v17 }
 0x4e0   : > { %v1414_v23 = vpack.c.bf16 %v1402_v19, %v1402_v19  ;;  %v1415_v24 = vpack.c.bf16 %v1403_v28, %v1403_v28  ;;  %v1416_v27 = vpack.c.bf16 %v1404_v20, %v1404_v20  ;;  %v1417_v29 = vpack.c.bf16 %v1405_v21, %v1405_v21 }
 0x4e2   : > { %v1684_v25 = vsel %vm1682_vm4, %v1414_v23, 0  ;;  %v1730_v26 = vsel %vm1682_vm4, %v1415_v24, 0  ;;  %v1776_v35 = vsel %vm1682_vm4, %v1416_v27, 0  ;;  %v1822_v22 = vsel %vm1682_vm4, %v1417_v29, 0 }
 0x4e3   : > { %3997 = vmatpush3.bf16.msra.mxu1 %v1684_v25  ;;  %4003 = vmatpush3.bf16.msra.mxu0 %v1730_v26 }
 0x4e4   : > { %4008 = vmatprep.subr.bf16.mxu1 %v4835_v8  ;;  %4014 = vmatprep.subr.bf16.mxu0 %v4835_v8 }
 0x4e6   : > { %3999 = vmatmul.mubr.msk.bf16.vlgmr.msra.gmra.mxu1 %vm1423_vm2, %v1675_v31  ;;  %4005 = vmatmul.mubr.msk.bf16.vlgmr.msra.gmra.mxu0 %vm1423_vm2, %v1676_v34 }
 0x4e7   : > { %4009 = vmatpush3.bf16.msra.mxu1 %v1776_v35  ;;  %4015 = vmatpush3.bf16.msra.mxu0 %v1822_v22 }
 0x4e8   : > { %4016 = vmatprep.mubr.msk.bf16.mxu0 %vm4836_vm1, %v4835_v8  ;;  %4010 = vmatprep.mubr.msk.bf16.mxu1 %vm4836_vm1, %v4835_v8 }
 0x4e9   : > { %4020 = vmatprep.subr.bf16.mxu1 %v4835_v8  ;;  %4028 = vmatprep.subr.bf16.mxu0 %v4835_v8 }
 0x4fa   : > { %v1630_v38 = vpop.xlane.xlu1 %1629 }
 0x4fb   : > { %v1646_v39 = vsub.f32 %v5297_v30, %v1630_v38  ;;  %v1634_v52 = vsub.f32 -inf, %v1630_v38 }
 0x4fd   : > { %v1653_v41 = vmul.f32 1.442695, %v1646_v39  ;;  %v1641_v59 = vmul.f32 1.442695, %v1634_v52 }
 0x4fe   : > { %v1627_v33 = vpop.xlane.xlu0 %1626 }
 0x4ff   : > { %v1645_v42 = vsub.f32 %v5303_v32, %v1627_v33  ;;  %4344 = vpow2.f32 %v1653_v41  ;;  %v4320_v32 = vld [vmem:[%s5772_s30 + $0x8] sm:$0xff]   ;;  %v1633_v60 = vsub.f32 -inf, %v1627_v33  ;;  %s5723_s30 = smov 16  }
 0x501   : > { %v1651_v44 = vmul.f32 1.442695, %v1645_v42  ;;  %v1639_v2 = vmul.f32 1.442695, %v1633_v60 }
 0x503   : > { %4346 = vpow2.f32 %v1651_v44 }
 0x504   : > { %4348 = vpow2.f32 %v1641_v59 }
 0x505   : > { %4350 = vpow2.f32 %v1637_v63 }
 0x506   : > { %4352 = vpow2.f32 %v1635_v1 }
 0x507   : > { %4354 = vpow2.f32 %v1639_v2 }
 0x50c   : > { %v4345_v45 = vpop.eup %4344 }
 0x50d   : > { %v1668_v46 = vsel %vm1423_vm2, %v4345_v45, 0.0  ;;  %v1678_v47 = vpack.c.bf16 %v4345_v45, %v4345_v45 }
 0x50e   : > { %1669 = vadd.xlane.f32.xlu0 %v1668_v46 }
 0x50f   : > { %4017 = vmatmul.mubr.msk.bf16.vlgmr.msra.gmra.mxu0 %vm1423_vm2, %v1678_v47 }
 0x510   : > { %v4347_v48 = vpop.eup %4346  ;;  %4032 = vmatprep.mubr.msk.bf16.mxu0 %vm4836_vm1, %v4835_v8 }
 0x511   : > { %v1665_v30 = vsel %vm1423_vm2, %v4347_v48, 0.0  ;;  %v1677_v49 = vpack.c.bf16 %v4347_v48, %v4347_v48  ;;  %v4349_v5 = vpop.eup %4348 }
 0x512   : > { %1666 = vadd.xlane.f32.xlu1 %v1665_v30  ;;  %v4351_v6 = vpop.eup %4350  ;;  %v1658_v36 = vmul.f32 0.0, %v4349_v5 }
 0x513   : > { %4011 = vmatmul.mubr.msk.bf16.vlgmr.msra.gmra.mxu1 %vm1423_vm2, %v1677_v49  ;;  %v4353_v7 = vpop.eup %4352  ;;  %v1656_v10 = vmul.f32 0.0, %v4351_v6 }
 0x514   : > { %4024 = vmatprep.mubr.msk.bf16.mxu1 %vm4836_vm1, %v4835_v8  ;;  %4021 = vmatpush3.bf16.msra.mxu1 %v4320_v32  ;;  %v4355_v9 = vpop.eup %4354  ;;  %v1655_v12 = vmul.f32 0.0, %v4353_v7 }
 0x515   : > { %4022 = vmatprep.subr.bf16.mxu1 %v4835_v8  ;;  %v1657_v15 = vmul.f32 0.0, %v4355_v9 }
 0x55f   : > { %v1661_v3 = vpop.xlane.xlu0 %1660 }
 0x560   : > { %v1671_v16 = vadd.f32 %v1661_v3, %v1655_v12 }
 0x567   : > { %v1664_v4 = vpop.xlane.xlu0 %1663 }
 0x568   : > { %v1672_v14 = vadd.f32 %v1664_v4, %v1656_v10 }
 0x597   : > { %v1670_v40 = vpop.xlane.xlu0 %1669 }
 0x598   : > { %v1674_v11 = vadd.f32 %v1670_v40, %v1658_v36 }
 0x59a   : > { %4356 = vrcp.f32 %v1674_v11 }
 0x59b   : > { %v1667_v13 = vpop.xlane.xlu1 %1666  ;;  %4358 = vrcp.f32 %v1672_v14 }
 0x59c   : > { %v1673_v17 = vadd.f32 %v1667_v13, %v1657_v15  ;;  %4360 = vrcp.f32 %v1671_v16 }
 0x59e   : > { %4362 = vrcp.f32 %v1673_v17 }
 0x5a6   : > { %v1720_v50 = vpop.f32.mrf.mxu1  ;;  %v1766_v51 = vpop.f32.mrf.mxu0 }
 0x5a7   : > { %v1865_v19 = vadd.f32 %v1766_v51, %v1656_v10  ;;  %v4357_v20 = vpop.eup %4356  ;;  %v1864_v23 = vadd.f32 %v1720_v50, %v1655_v12 }
 0x5a8   : > { %v4000_v53 = vpop.f32.mrf.mxu1  ;;  %v4006_v54 = vpop.f32.mrf.mxu0 }
 0x5a9   : > { %v4359_v25 = vpop.eup %4358  ;;  %v4321_v54 = vld [vmem:[%s5773_s25] sm:$0xff]  }
 0x5aa   : > { %v1723_v57 = vpop.f32.mrf.mxu1  ;;  %v1769_v58 = vpop.f32.mrf.mxu0  ;;  %v1873_v31 = vmul.f32 %v4359_v25, %v1865_v19  ;;  %4023 = vmatpush3.bf16.msra.mxu1 %v4321_v54  ;;  %v3852_v54 = vld [vmem:[#allocation10] ss:$0 sm:$0xff] }
 0x5ab   : > { %v4361_v29 = vpop.eup %4360  ;;  %4036 = vmatprep.subr.bf16.mxu1 %v4835_v8 }
 0x5ac   : > { %v4001_v61 = vpop.f32.mrf.mxu1  ;;  %v4007_v62 = vpop.f32.mrf.mxu0  ;;  %v1872_v39 = vmul.f32 %v4361_v29, %v1864_v23 }
 0x5ad   : > { %v4363_v35 = vpop.eup %4362 }
 0x5cf   : > { %v1858_v18 = vpop.f32.mrf.mxu0 }
 0x5d0   : > { %v1867_v28 = vadd.f32 %v1858_v18, %v1658_v36 }
 0x5d1   : > { %v4018_v21 = vpop.f32.mrf.mxu0 }
 0x5d2   : > { %v1875_v24 = vmul.f32 %v4357_v20, %v1867_v28  ;;  %v3848_v21 = vld [vmem:[#allocation8] ss:$0 sm:$0xff] }
 0x5d3   : > { %v1812_v26 = vpop.f32.mrf.mxu1  ;;  %v1861_v27 = vpop.f32.mrf.mxu0 }
 0x5d4   : > { %v1866_v34 = vadd.f32 %v1812_v26, %v1657_v15  ;;  %v1892_v41 = vcombine.low %v1873_v31, %v1875_v24  ;;  %v1893_v33 = vcombine.high %v1873_v31, %v1875_v24 }
 0x5d5   : > { %v4012_v22 = vpop.f32.mrf.mxu1  ;;  %v4019_v38 = vpop.f32.mrf.mxu0 }
 0x5d6   : > { %v1874_v42 = vmul.f32 %v4363_v35, %v1866_v34  ;;  %v1900_v48 = vrot.slane %v1892_v41, %v5225_v37  ;;  %v1907_v30 = vrot.slane %v1893_v33, %v5225_v37  ;;  %v4322_v34 = vld [vmem:[%s5698_s12 + $0x8] sm:$0xff]  }
 0x5d7   : > { %v1815_v44 = vpop.f32.mrf.mxu1 }
 0x5d8   : > { %v1876_v45 = vcombine.low %v1872_v39, %v1874_v42  ;;  %v1877_v46 = vcombine.high %v1872_v39, %v1874_v42  ;;  %v4324_v44 = vld [vmem:[%s5696_s10 + $0x8] sm:$0xff]  }
 0x5d9   : > { %v4013_v47 = vpop.f32.mrf.mxu1  ;;  %4029 = vmatpush3.bf16.msra.mxu0 %v4324_v44 }
 0x5da   : > { %v1884_v49 = vrot.slane %v1876_v45, %v5225_v37  ;;  %v1891_v32 = vrot.slane %v1877_v46, %v5225_v37  ;;  %v4325_v45 = vld [vmem:[%s5696_s10] sm:$0xff]   ;;  %4030 = vmatprep.subr.bf16.mxu0 %v4835_v8  ;;  %v3858_v46 = vld [vmem:[#allocation14] ss:$0 sm:$0xff] }
 0x5dc   : > { %v1908_v50 = vcombine.low %v1884_v49, %v1900_v48  ;;  %v1909_v51 = vcombine.high %v1884_v49, %v1900_v48  ;;  %v1924_v52 = vcombine.low %v1891_v32, %v1907_v30  ;;  %v1925_v53 = vcombine.high %v1891_v32, %v1907_v30 }
 0x5dd   : > { %4031 = vmatpush3.bf16.msra.mxu0 %v4325_v45  ;;  %v3854_v45 = vld [vmem:[#allocation13] ss:$0 sm:$0xff] }
 0x5de   : > { %v1916_v55 = vrot.slane %v1908_v50, %v5228_v43  ;;  %v1923_v56 = vrot.slane %v1909_v51, %v5228_v43  ;;  %v1932_v57 = vrot.slane %v1924_v52, %v5228_v43  ;;  %v1939_v58 = vrot.slane %v1925_v53, %v5228_v43  ;;  %4044 = vmatprep.subr.bf16.mxu0 %v4835_v8 }
 0x5e0   : > { %v1944_v59 = vcombine.low %v1916_v55, %v1923_v56  ;;  %v3846_v60 = vcombine.high %v1916_v55, %v1923_v56  ;;  %v1960_v61 = vcombine.low %v1932_v57, %v1939_v58  ;;  %v3847_v62 = vcombine.high %v1932_v57, %v1939_v58  ;;  %v3853_v56 = vld [vmem:[#allocation11] ss:$0 sm:$0xff] }
 0x5e2   : > { %v1951_v63 = vrot.slane %v1944_v59, %v5225_v37  ;;  %v1959_v1 = vrot.slane %v3846_v60, %v5225_v37  ;;  %v1967_v2 = vrot.slane %v1960_v61, %v5225_v37  ;;  %v1975_v3 = vrot.slane %v3847_v62, %v5225_v37 }
 0x5e4   : > { %v1977_v4 = vcombine.high %v1951_v63, %v1959_v1  ;;  %v1993_v5 = vcombine.high %v1967_v2, %v1975_v3  ;;  %v1976_v6 = vcombine.low %v1951_v63, %v1959_v1  ;;  %v1992_v40 = vcombine.low %v1967_v2, %v1975_v3 }
 0x5e6   : > { %v1991_v7 = vrot.slane %v1977_v4, %v5228_v43  ;;  %v2007_v36 = vrot.slane %v1993_v5, %v5228_v43  ;;  %v1984_v9 = vrot.slane %v1976_v6, %v5228_v43  ;;  %v2000_v10 = vrot.slane %v1992_v40, %v5228_v43 }
 0x5e8   : > { %v2010_v11 = vcombine.low %v1991_v7, %v2007_v36  ;;  %v2009_v12 = vcombine.high %v1984_v9, %v2000_v10  ;;  %v2011_v13 = vcombine.high %v1991_v7, %v2007_v36  ;;  %v2008_v14 = vcombine.low %v1984_v9, %v2000_v10 }
 0x5ea   : > { %2017 = vrot.lane.b32.xlu0 %v2010_v11, %s5723_s30  ;;  %2013 = vrot.lane.b32.xlu1 %v2009_v12, %s5722_s2  ;;  %s5774_s30 = sld [smem:[#allocation39_spill]]  ;;  %s5781_s2 = smov 8  }
 0x5ee   : > { %2021 = vrot.lane.b32.xlu1 %v2011_v13, %s5721_s29  ;;  %s5782_s29 = smov 24  }
 0x5f0   : > { %s862_s7 = scalar_lea.vmem %s5774_s30, %s3820_s26  ;;  %s5780_s30 = smov 16  }
 0x5f1   : > { %v865_v35 = vld [vmem:[%s862_s7] sm:$0xff]  ;;  %s5776_s7 = smov 88  }
 0x5f2   : > { %v2188_v22 = vpack.c.bf16 %v865_v35, %v865_v35 }
 0x65c   : > { %v2014_v15 = vpop.permute.xlu1 %2013  ;;  %v2018_v16 = vpop.permute.xlu0 %2017 }
 0x65d   : > { %v2024_v17 = vsel %vm1423_vm2, %v2008_v14, %v2014_v15 }
 0x65e   : > { %v2026_v19 = vsel %vm2025_vm5, %v2024_v17, %v2018_v16 }
 0x660   : > { %v2022_v18 = vpop.permute.xlu1 %2021 }
 0x661   : > { %v2028_v28 = vsel %vm2027_vm6, %v2026_v19, %v2022_v18 }
 0x662   : > { %v2029_v20 = vpack.c.bf16 %v2028_v28, %v2028_v28 }
 0x664   : > { %4025 = vmatmul.mubr.msk.bf16.vlgmr.msra.gmra.mxu1 %vm868_vm0, %v2029_v20 }
 0x665   : > { %4040 = vmatprep.mubr.msk.bf16.mxu1 %vm4836_vm1, %v4835_v8  ;;  %4037 = vmatpush3.bf16.msra.mxu1 %v4322_v34 }
 0x666   : > { %4038 = vmatprep.subr.bf16.mxu1 %v4835_v8 }
 0x724   : > { %v2085_v23 = vpop.f32.mrf.mxu1 }
 0x725   : > { %v2086_v24 = vadd.f32 %v3848_v21, %v2085_v23 }
 0x726   : > { %v4026_v25 = vpop.f32.mrf.mxu1 }
 0x727   : > { %v5391_v26 = vadd.f32 %v2086_v24, %v5181_v0  ;;  %v4323_v0 = vld [vmem:[%s5698_s12] sm:$0xff]  }
 0x728   : > { %v2088_v27 = vpop.f32.mrf.mxu1  ;;  %4039 = vmatpush3.bf16.msra.mxu1 %v4323_v0 }
 0x729   : > { %v2094_v29 = vsel %vm868_vm0, %v5391_v26, 0.0  ;;  %4050 = vmatprep.subr.bf16.mxu1 %v4835_v8 }
 0x72a   : > { %2095 = vadd.xlane.f32.xlu1 %v2094_v29  ;;  %v4027_v31 = vpop.f32.mrf.mxu1 }
 0x72b   : > { %4041 = vmatmul.mubr.msk.bf16.vlgmr.msra.gmra.mxu1 %vm868_vm0, %v2188_v22 }
 0x72c   : > { %4052 = vmatprep.mubr.msk.bf16.mxu1 %vm4836_vm1, %v4835_v8 }
 0x7b3   : > { %v2096_v38 = vpop.xlane.xlu1 %2095 }
 0x7b4   : > { %v2097_v39 = vmul.f32 0.03125, %v2096_v38 }
 0x7b6   : > { %v2098_v41 = vsub.f32 %v5391_v26, %v2097_v39 }
 0x7b8   : > { %v2099_v33 = vmul.f32 %v2098_v41, %v2098_v41 }
 0x7ba   : > { %v2100_v42 = vsel %vm868_vm0, %v2099_v33, 0.0 }
 0x7bb   : > { %2101 = vadd.xlane.f32.xlu0 %v2100_v42 }
 0x7eb   : > { %v2249_v47 = vpop.f32.mrf.mxu1 }
 0x7ec   : > { %v5421_v48 = vadd.f32 %v3858_v46, %v2249_v47 }
 0x7ed   : > { %v4042_v30 = vpop.f32.mrf.mxu1 }
 0x7ee   : > { %2409 = vrot.lane.b32.xlu1 %v5421_v48, %s4842_s22  ;;  %2406 = vrot.lane.b32.xlu0 %v5421_v48, %s4841_s0 }
 0x7ef   : > { %v2252_v49 = vpop.f32.mrf.mxu1 }
 0x7f1   : > { %v4043_v32 = vpop.f32.mrf.mxu1 }
 0x7f2   : > { %2412 = vrot.lane.b32.xlu1 %v5421_v48, %s5775_s5 }
 0x844   : > { %v2102_v50 = vpop.xlane.xlu0 %2101 }
 0x845   : > { %v2103_v51 = vmul.f32 0.03125, %v2102_v50 }
 0x847   : > { %v2104_v52 = vadd.f32 1e-05, %v2103_v51 }
 0x849   : > { %4364 = vrsqrt.f32 %v2104_v52 }
 0x856   : > { %v4365_v53 = vpop.eup %4364 }
 0x857   : > { %v2106_v55 = vmul.f32 %v4365_v53, %v2098_v41 }
 0x859   : > { %v2113_v57 = vmul.f32 %v3852_v54, %v2106_v55 }
 0x85b   : > { %v2120_v58 = vadd.f32 %v3853_v56, %v2113_v57 }
 0x85d   : > { %v2121_v59 = vpack.c.bf16 %v2120_v58, %v2120_v58 }
 0x85f   : > { %4033 = vmatmul.mubr.msk.bf16.vlgmr.msra.gmra.mxu0 %vm868_vm0, %v2121_v59 }
 0x860   : > { %4046 = vmatprep.mubr.msk.bf16.mxu0 %vm4836_vm1, %v4835_v8  ;;  %v2410_v60 = vpop.permute.xlu1 %2409  ;;  %v2407_v62 = vpop.permute.xlu0 %2406 }
 0x861   : > { %v2427_v63 = vcombine.low %v5421_v48, %v2410_v60  ;;  %v2428_v1 = vcombine.high %v5421_v48, %v2410_v60 }
 0x863   : > { %v2435_v4 = vrot.slane %v2427_v63, %v5225_v37  ;;  %v2442_v5 = vrot.slane %v2428_v1, %v5225_v37 }
 0x864   : > { %v2413_v61 = vpop.permute.xlu1 %2412 }
 0x865   : > { %v2443_v2 = vcombine.low %v2407_v62, %v2413_v61  ;;  %v2444_v3 = vcombine.high %v2407_v62, %v2413_v61 }
 0x867   : > { %v2451_v6 = vrot.slane %v2443_v2, %v5225_v37  ;;  %v2458_v40 = vrot.slane %v2444_v3, %v5225_v37 }
 0x869   : > { %v2491_v7 = vcombine.low %v2435_v4, %v2451_v6  ;;  %v2492_v36 = vcombine.high %v2435_v4, %v2451_v6  ;;  %v2507_v9 = vcombine.low %v2442_v5, %v2458_v40  ;;  %v2508_v10 = vcombine.high %v2442_v5, %v2458_v40 }
 0x86b   : > { %v2499_v11 = vrot.slane %v2491_v7, %v5228_v43  ;;  %v2506_v12 = vrot.slane %v2492_v36, %v5228_v43  ;;  %v2515_v13 = vrot.slane %v2507_v9, %v5228_v43  ;;  %v2522_v14 = vrot.slane %v2508_v10, %v5228_v43 }
 0x86d   : > { %v3864_v15 = vcombine.low %v2499_v11, %v2506_v12  ;;  %v3866_v16 = vcombine.high %v2499_v11, %v2506_v12  ;;  %v3868_v17 = vcombine.low %v2515_v13, %v2522_v14  ;;  %v3870_v18 = vcombine.high %v2515_v13, %v2522_v14 }
 0x86f   : > { %v2571_v19 = vrot.slane %v3864_v15, %v5225_v37  ;;  %v2587_v28 = vrot.slane %v3866_v16, %v5225_v37  ;;  %v2603_v20 = vrot.slane %v3868_v17, %v5225_v37  ;;  %v2619_v21 = vrot.slane %v3870_v18, %v5225_v37 }
 0x871   : > { %v2627_v23 = vcombine.low %v2571_v19, %v2587_v28  ;;  %v2659_v24 = vcombine.low %v2603_v20, %v2619_v21  ;;  %v2628_v25 = vcombine.high %v2571_v19, %v2587_v28  ;;  %v2660_v27 = vcombine.high %v2603_v20, %v2619_v21 }
 0x873   : > { %v2635_v29 = vrot.slane %v2627_v23, %v5228_v43  ;;  %v2667_v31 = vrot.slane %v2659_v24, %v5228_v43  ;;  %v2642_v34 = vrot.slane %v2628_v25, %v5228_v43  ;;  %v2674_v35 = vrot.slane %v2660_v27, %v5228_v43 }
 0x875   : > { %v2691_v0 = vcombine.low %v2635_v29, %v2667_v31  ;;  %v2692_v22 = vcombine.high %v2635_v29, %v2667_v31  ;;  %v5450_v38 = vcombine.low %v2642_v34, %v2674_v35  ;;  %v5452_v39 = vcombine.high %v2642_v34, %v2674_v35 }
 0x877   : > { %v2699_v41 = vpack.c.bf16 %v2691_v0, %v2691_v0  ;;  %v2700_v33 = vpack.c.bf16 %v2692_v22, %v2692_v22  ;;  %v2701_v20 = vpack.c.bf16 %v5450_v38, %v5450_v38  ;;  %v2702_v21 = vpack.c.bf16 %v5452_v39, %v5452_v39 }
 0x879   : > { %v2716_v42 = vsel %vm1423_vm2, %v2699_v41, 0  ;;  %v2762_v44 = vsel %vm1423_vm2, %v2700_v33, 0  ;;  %v2808_v29 = vsel %vm1423_vm2, %v2701_v20, 0  ;;  %v2854_v31 = vsel %vm1423_vm2, %v2702_v21, 0 }
 0x87a   : > { %4045 = vmatpush3.bf16.xpose.msra.mxu0 %v2716_v42  ;;  %4051 = vmatpush3.bf16.xpose.msra.mxu1 %v2762_v44 }
 0x87b   : > { %4056 = vmatprep.subr.bf16.mxu0 %v4835_v8  ;;  %4062 = vmatprep.subr.bf16.mxu1 %v4835_v8 }
 0x91f   : > { %v2182_v46 = vpop.f32.mrf.mxu0 }
 0x920   : > { %v2183_v47 = vadd.f32 %v3854_v45, %v2182_v46 }
 0x921   : > { %v4034_v30 = vpop.f32.mrf.mxu0 }
 0x922   : > { %2259 = vrot.lane.b32.xlu1 %v2183_v47, %s4842_s22  ;;  %2256 = vrot.lane.b32.xlu0 %v2183_v47, %s4841_s0  ;;  %s5778_s0 = smov 80   ;;  %s5779_s22 = smov 72  }
 0x923   : > { %v2185_v49 = vpop.f32.mrf.mxu0 }
 0x925   : > { %v4035_v32 = vpop.f32.mrf.mxu0 }
 0x926   : > { %2418 = vrot.lane.b32.xlu1 %v5421_v48, %s5776_s7  ;;  %2262 = vrot.lane.b32.xlu0 %v2183_v47, %s5775_s5 }
 0x92a   : > { %2415 = vrot.lane.b32.xlu0 %v5421_v48, %s5777_s3  ;;  %s852_s3 = sand.u32 1, %s4810_s28  }
 0x994   : > { %v2260_v50 = vpop.permute.xlu1 %2259  ;;  %v2257_v51 = vpop.permute.xlu0 %2256 }
 0x995   : > { %v2265_v52 = vcombine.low %v2183_v47, %v2260_v50  ;;  %v2266_v53 = vcombine.high %v2183_v47, %v2260_v50 }
 0x997   : > { %v2273_v57 = vrot.slane %v2265_v52, %v5225_v37  ;;  %v2280_v58 = vrot.slane %v2266_v53, %v5225_v37 }
 0x998   : > { %v2263_v54 = vpop.permute.xlu0 %2262 }
 0x999   : > { %v2281_v55 = vcombine.low %v2257_v51, %v2263_v54  ;;  %v2282_v56 = vcombine.high %v2257_v51, %v2263_v54 }
 0x99b   : > { %v2289_v59 = vrot.slane %v2281_v55, %v5225_v37  ;;  %v2296_v60 = vrot.slane %v2282_v56, %v5225_v37 }
 0x99d   : > { %v2297_v61 = vcombine.low %v2273_v57, %v2289_v59  ;;  %v2298_v62 = vcombine.high %v2273_v57, %v2289_v59  ;;  %v2313_v63 = vcombine.low %v2280_v58, %v2296_v60  ;;  %v2314_v1 = vcombine.high %v2280_v58, %v2296_v60  ;;  %v2419_v58 = vpop.permute.xlu1 %2418  ;;  %v2416_v59 = vpop.permute.xlu0 %2415 }
 0x99f   : > { %v2305_v2 = vrot.slane %v2297_v61, %v5228_v43  ;;  %v2312_v3 = vrot.slane %v2298_v62, %v5228_v43  ;;  %v2321_v4 = vrot.slane %v2313_v63, %v5228_v43  ;;  %v2328_v5 = vrot.slane %v2314_v1, %v5228_v43 }
 0x9a1   : > { %v2333_v6 = vcombine.low %v2305_v2, %v2312_v3  ;;  %v3862_v40 = vcombine.high %v2305_v2, %v2312_v3  ;;  %v2349_v7 = vcombine.low %v2321_v4, %v2328_v5  ;;  %v3863_v36 = vcombine.high %v2321_v4, %v2328_v5 }
 0x9a3   : > { %v2340_v9 = vrot.slane %v2333_v6, %v5225_v37  ;;  %v2348_v10 = vrot.slane %v3862_v40, %v5225_v37  ;;  %v2356_v11 = vrot.slane %v2349_v7, %v5225_v37  ;;  %v2364_v12 = vrot.slane %v3863_v36, %v5225_v37 }
 0x9a5   : > { %v2365_v13 = vcombine.low %v2340_v9, %v2348_v10  ;;  %v2381_v14 = vcombine.low %v2356_v11, %v2364_v12  ;;  %v2366_v15 = vcombine.high %v2340_v9, %v2348_v10  ;;  %v2382_v16 = vcombine.high %v2356_v11, %v2364_v12 }
 0x9a7   : > { %v2373_v17 = vrot.slane %v2365_v13, %v5228_v43  ;;  %v2389_v18 = vrot.slane %v2381_v14, %v5228_v43  ;;  %v2380_v25 = vrot.slane %v2366_v15, %v5228_v43  ;;  %v2396_v27 = vrot.slane %v2382_v16, %v5228_v43 }
 0x9a9   : > { %v2397_v19 = vcombine.low %v2373_v17, %v2389_v18  ;;  %v2398_v28 = vcombine.high %v2373_v17, %v2389_v18  ;;  %v2399_v34 = vcombine.low %v2380_v25, %v2396_v27  ;;  %v2400_v35 = vcombine.high %v2380_v25, %v2396_v27 }
 0x9ab   : > { %v2401_v23 = vpack.c.bf16 %v2397_v19, %v2397_v19  ;;  %v2402_v24 = vpack.c.bf16 %v2398_v28, %v2398_v28  ;;  %v2403_v0 = vpack.c.bf16 %v2399_v34, %v2399_v34  ;;  %v2404_v22 = vpack.c.bf16 %v2400_v35, %v2400_v35 }
 0x9ad   : > { %4047 = vmatmul.mubr.msk.bf16.vlgmr.msra.gmra.mxu0 %vm1423_vm2, %v2401_v23  ;;  %4053 = vmatmul.mubr.msk.bf16.vlgmr.msra.gmra.mxu1 %vm1423_vm2, %v2402_v24 }
 0x9ae   : > { %4057 = vmatpush3.bf16.xpose.msra.mxu0 %v2808_v29  ;;  %4063 = vmatpush3.bf16.xpose.msra.mxu1 %v2854_v31 }
 0x9af   : > { %4058 = vmatprep.mubr.msk.bf16.mxu0 %vm4836_vm1, %v4835_v8  ;;  %4064 = vmatprep.mubr.msk.bf16.mxu1 %vm4836_vm1, %v4835_v8 }
 0x9b0   : > { %4068 = vmatprep.subr.bf16.mxu0 %v4835_v8  ;;  %4074 = vmatprep.subr.bf16.mxu1 %v4835_v8 }
 0x9b5   : > { %4059 = vmatmul.mubr.msk.bf16.vlgmr.msra.gmra.mxu0 %vm1423_vm2, %v2403_v0  ;;  %4065 = vmatmul.mubr.msk.bf16.vlgmr.msra.gmra.mxu1 %vm1423_vm2, %v2404_v22 }
 0x9b6   : > { %4070 = vmatprep.mubr.msk.bf16.mxu0 %vm4836_vm1, %v4835_v8  ;;  %4076 = vmatprep.mubr.msk.bf16.mxu1 %vm4836_vm1, %v4835_v8 }
 0xa6d   : > { %v2752_v38 = vpop.f32.mrf.mxu0  ;;  %v2798_v39 = vpop.f32.mrf.mxu1 }
 0xa6e   : > { %v2896_v41 = vsel %vm1423_vm2, %v2752_v38, -inf  ;;  %v2899_v33 = vsel %vm1423_vm2, %v2798_v39, -inf }
 0xa6f   : > { %2897 = vmax.xlane.f32.xlu1 %v2896_v41  ;;  %v4048_v42 = vpop.f32.mrf.mxu0  ;;  %2900 = vmax.xlane.f32.xlu0 %v2899_v33  ;;  %v4054_v44 = vpop.f32.mrf.mxu1 }
 0xa71   : > { %v2755_v45 = vpop.f32.mrf.mxu0  ;;  %v2801_v46 = vpop.f32.mrf.mxu1 }
 0xa73   : > { %v4049_v47 = vpop.f32.mrf.mxu0  ;;  %v4055_v30 = vpop.f32.mrf.mxu1 }
 0xa75   : > { %v5503_v49 = vpop.f32.mrf.mxu0  ;;  %v5505_v32 = vpop.f32.mrf.mxu1 }
 0xa76   : > { %v2902_v56 = vsel %vm1423_vm2, %v5503_v49, -inf  ;;  %v2905_v57 = vsel %vm1423_vm2, %v5505_v32, -inf }
 0xa77   : > { %v4060_v50 = vpop.f32.mrf.mxu0  ;;  %v4066_v51 = vpop.f32.mrf.mxu1 }
 0xa79   : > { %v2847_v52 = vpop.f32.mrf.mxu0  ;;  %v2893_v53 = vpop.f32.mrf.mxu1 }
 0xa7b   : > { %v4061_v54 = vpop.f32.mrf.mxu0  ;;  %v4067_v55 = vpop.f32.mrf.mxu1 }
 0xa80   : > { %2421 = vrot.lane.b32.xlu1 %v5421_v48, %s5778_s0  ;;  %s3819_s0 = sshll.u32 %s852_s3, 3 }
 0xa85   : > { %2424 = vrot.lane.b32.xlu0 %v5421_v48, %s5779_s22 }
 0xaa4   : > { %2903 = vmax.xlane.f32.xlu1 %v2902_v56  ;;  %2906 = vmax.xlane.f32.xlu0 %v2905_v57 }
 0xaf8   : > { %v5515_v60 = vpop.xlane.xlu1 %2897  ;;  %v5517_v61 = vpop.xlane.xlu0 %2900 }
 0xaf9   : > { %v2920_v62 = vsub.f32 %v2752_v38, %v5515_v60  ;;  %v2921_v63 = vsub.f32 %v2798_v39, %v5517_v61 }
 0xafb   : > { %v2924_v1 = vmul.f32 1.442695, %v2920_v62  ;;  %v2926_v48 = vmul.f32 1.442695, %v2921_v63 }
 0xafc   : > { %v2422_v2 = vpop.permute.xlu1 %2421  ;;  %v2425_v3 = vpop.permute.xlu0 %2424 }
 0xafd   : > { %v2459_v4 = vcombine.low %v2416_v59, %v2422_v2  ;;  %v2460_v5 = vcombine.high %v2416_v59, %v2422_v2  ;;  %v2475_v6 = vcombine.low %v2419_v58, %v2425_v3  ;;  %4366 = vpow2.f32 %v2924_v1 }
 0xafe   : > { %v2476_v40 = vcombine.high %v2419_v58, %v2425_v3  ;;  %4368 = vpow2.f32 %v2926_v48 }
 0xaff   : > { %v2467_v7 = vrot.slane %v2459_v4, %v5225_v37  ;;  %v2474_v36 = vrot.slane %v2460_v5, %v5225_v37  ;;  %v2483_v9 = vrot.slane %v2475_v6, %v5225_v37 }
 0xb00   : > { %v2490_v10 = vrot.slane %v2476_v40, %v5225_v37 }
 0xb01   : > { %v2523_v11 = vcombine.low %v2467_v7, %v2483_v9  ;;  %v2524_v12 = vcombine.high %v2467_v7, %v2483_v9 }
 0xb02   : > { %v2539_v13 = vcombine.low %v2474_v36, %v2490_v10  ;;  %v2540_v14 = vcombine.high %v2474_v36, %v2490_v10 }
 0xb03   : > { %v2531_v15 = vrot.slane %v2523_v11, %v5228_v43  ;;  %v2538_v16 = vrot.slane %v2524_v12, %v5228_v43  ;;  %v2908_v12 = vsub.f32 -inf, %v5515_v60 }
 0xb04   : > { %v2547_v17 = vrot.slane %v2539_v13, %v5228_v43  ;;  %v2554_v18 = vrot.slane %v2540_v14, %v5228_v43 }
 0xb05   : > { %v3865_v19 = vcombine.low %v2531_v15, %v2538_v16  ;;  %v3867_v28 = vcombine.high %v2531_v15, %v2538_v16  ;;  %v2909_v16 = vsub.f32 -inf, %v5517_v61 }
 0xb06   : > { %v3869_v20 = vcombine.low %v2547_v17, %v2554_v18  ;;  %v3871_v21 = vcombine.high %v2547_v17, %v2554_v18 }
 0xb07   : > { %v2578_v23 = vrot.slane %v3865_v19, %v5225_v37  ;;  %v2594_v24 = vrot.slane %v3867_v28, %v5225_v37  ;;  %v2912_v28 = vmul.f32 1.442695, %v2908_v12  ;;  %v4327_v12 = vld [vmem:[#allocation16] sm:$0xff]  }
 0xb08   : > { %v2610_v25 = vrot.slane %v3869_v20, %v5225_v37  ;;  %v2626_v27 = vrot.slane %v3871_v21, %v5225_v37  ;;  %v2914_v21 = vmul.f32 1.442695, %v2909_v16 }
 0xb09   : > { %v2643_v29 = vcombine.low %v2578_v23, %v2594_v24  ;;  %v2644_v31 = vcombine.high %v2578_v23, %v2594_v24 }
 0xb0a   : > { %v2675_v34 = vcombine.low %v2610_v25, %v2626_v27  ;;  %v2676_v35 = vcombine.high %v2610_v25, %v2626_v27  ;;  %v4367_v0 = vpop.eup %4366 }
 0xb0b   : > { %v2651_v22 = vrot.slane %v2643_v29, %v5228_v43  ;;  %v2658_v38 = vrot.slane %v2644_v31, %v5228_v43  ;;  %v2936_v39 = vsel %vm1423_vm2, %v4367_v0, 0.0  ;;  %v4369_v42 = vpop.eup %4368  ;;  %v2952_v56 = vpack.c.bf16 %v4367_v0, %v4367_v0 }
 0xb0c   : > { %v2683_v41 = vrot.slane %v2675_v34, %v5228_v43  ;;  %v2690_v33 = vrot.slane %v2676_v35, %v5228_v43  ;;  %2937 = vadd.xlane.f32.xlu0 %v2936_v39  ;;  %v2939_v44 = vsel %vm1423_vm2, %v4369_v42, 0.0  ;;  %v2953_v57 = vpack.c.bf16 %v4369_v42, %v4369_v42 }
 0xb0d   : > { %2940 = vadd.xlane.f32.xlu1 %v2939_v44 }
 0xb0e   : > { %v2695_v45 = vcombine.low %v2651_v22, %v2683_v41  ;;  %v2696_v46 = vcombine.high %v2651_v22, %v2683_v41  ;;  %v2697_v47 = vcombine.low %v2658_v38, %v2690_v33  ;;  %v2698_v30 = vcombine.high %v2658_v38, %v2690_v33 }
 0xb10   : > { %v2703_v50 = vpack.c.bf16 %v2695_v45, %v2695_v45  ;;  %v2704_v51 = vpack.c.bf16 %v2696_v46, %v2696_v46  ;;  %v2705_v54 = vpack.c.bf16 %v2697_v47, %v2697_v47  ;;  %v2706_v55 = vpack.c.bf16 %v2698_v30, %v2698_v30 }
 0xb12   : > { %v2960_v52 = vsel %vm1682_vm4, %v2703_v50, 0  ;;  %v3006_v53 = vsel %vm1682_vm4, %v2704_v51, 0  ;;  %v3052_v58 = vsel %vm1682_vm4, %v2705_v54, 0  ;;  %v3098_v59 = vsel %vm1682_vm4, %v2706_v55, 0 }
 0xb13   : > { %4069 = vmatpush3.bf16.msra.mxu0 %v2960_v52  ;;  %4075 = vmatpush3.bf16.msra.mxu1 %v3006_v53 }
 0xb14   : > { %4080 = vmatprep.subr.bf16.mxu0 %v4835_v8  ;;  %4086 = vmatprep.subr.bf16.mxu1 %v4835_v8 }
 0xb16   : > { %4071 = vmatmul.mubr.msk.bf16.vlgmr.msra.gmra.mxu0 %vm1423_vm2, %v2952_v56  ;;  %4077 = vmatmul.mubr.msk.bf16.vlgmr.msra.gmra.mxu1 %vm1423_vm2, %v2953_v57 }
 0xb17   : > { %4081 = vmatpush3.bf16.msra.mxu0 %v3052_v58  ;;  %4087 = vmatpush3.bf16.msra.mxu1 %v3098_v59 }
 0xb18   : > { %4082 = vmatprep.mubr.msk.bf16.mxu0 %vm4836_vm1, %v4835_v8  ;;  %4088 = vmatprep.mubr.msk.bf16.mxu1 %vm4836_vm1, %v4835_v8 }
 0xb19   : > { %4092 = vmatprep.subr.bf16.mxu0 %v4835_v8  ;;  %4100 = vmatprep.subr.bf16.mxu1 %v4835_v8 }
 0xb2d   : > { %v2904_v62 = vpop.xlane.xlu1 %2903  ;;  %v2907_v63 = vpop.xlane.xlu0 %2906 }
 0xb2e   : > { %v2922_v1 = vsub.f32 %v5503_v49, %v2904_v62  ;;  %v2923_v48 = vsub.f32 %v5505_v32, %v2907_v63  ;;  %v4326_v49 = vld [vmem:[#allocation16 + $0x8] sm:$0xff]   ;;  %v2910_v13 = vsub.f32 -inf, %v2904_v62  ;;  %v2911_v17 = vsub.f32 -inf, %v2907_v63 }
 0xb30   : > { %v2928_v2 = vmul.f32 1.442695, %v2922_v1  ;;  %v2930_v3 = vmul.f32 1.442695, %v2923_v48  ;;  %v2916_v20 = vmul.f32 1.442695, %v2910_v13 }
 0xb31   : > { %v2918_v23 = vmul.f32 1.442695, %v2911_v17 }
 0xb32   : > { %4370 = vpow2.f32 %v2928_v2 }
 0xb33   : > { %4372 = vpow2.f32 %v2930_v3 }
 0xb34   : > { %4374 = vpow2.f32 %v2912_v28 }
 0xb35   : > { %4376 = vpow2.f32 %v2916_v20 }
 0xb36   : > { %4378 = vpow2.f32 %v2914_v21 }
 0xb37   : > { %4380 = vpow2.f32 %v2918_v23 }
 0xb3f   : > { %v4371_v4 = vpop.eup %4370 }
 0xb40   : > { %v2942_v5 = vsel %vm1423_vm2, %v4371_v4, 0.0  ;;  %v2954_v6 = vpack.c.bf16 %v4371_v4, %v4371_v4  ;;  %v4373_v40 = vpop.eup %4372 }
 0xb41   : > { %2943 = vadd.xlane.f32.xlu0 %v2942_v5  ;;  %v2945_v7 = vsel %vm1423_vm2, %v4373_v40, 0.0  ;;  %v2955_v36 = vpack.c.bf16 %v4373_v40, %v4373_v40  ;;  %v4375_v25 = vpop.eup %4374 }
 0xb42   : > { %4083 = vmatmul.mubr.msk.bf16.vlgmr.msra.gmra.mxu0 %vm1423_vm2, %v2954_v6  ;;  %2946 = vadd.xlane.f32.xlu1 %v2945_v7  ;;  %v4377_v27 = vpop.eup %4376  ;;  %v2932_v34 = vmul.f32 0.0, %v4375_v25 }
 0xb43   : > { %4096 = vmatprep.mubr.msk.bf16.mxu0 %vm4836_vm1, %v4835_v8  ;;  %4089 = vmatmul.mubr.msk.bf16.vlgmr.msra.gmra.mxu1 %vm1423_vm2, %v2955_v36  ;;  %v4379_v29 = vpop.eup %4378  ;;  %v2934_v61 = vmul.f32 0.0, %v4377_v27 }
 0xb44   : > { %4104 = vmatprep.mubr.msk.bf16.mxu1 %vm4836_vm1, %v4835_v8  ;;  %4093 = vmatpush3.bf16.msra.mxu0 %v4326_v49  ;;  %v4381_v31 = vpop.eup %4380  ;;  %v2933_v0 = vmul.f32 0.0, %v4379_v29 }
 0xb45   : > { %4094 = vmatprep.subr.bf16.mxu0 %v4835_v8  ;;  %v2935_v39 = vmul.f32 0.0, %v4381_v31 }
 0xb48   : > { %4095 = vmatpush3.bf16.msra.mxu0 %v4327_v12  ;;  %v4336_v12 = vld [vmem:[%s5706_s20 + $0x8] sm:$0xff]  }
 0xb49   : > { %4108 = vmatprep.subr.bf16.mxu0 %v4835_v8 }
 0xb95   : > { %v2938_v24 = vpop.xlane.xlu0 %2937 }
 0xb96   : > { %v2941_v60 = vpop.xlane.xlu1 %2940  ;;  %v2948_v22 = vadd.f32 %v2938_v24, %v2932_v34 }
 0xb97   : > { %v2949_v33 = vadd.f32 %v2941_v60, %v2933_v0 }
 0xb98   : > { %4382 = vrcp.f32 %v2948_v22 }
 0xba5   : > { %v4383_v46 = vpop.eup %4382 }
 0xbca   : > { %v2944_v35 = vpop.xlane.xlu0 %2943 }
 0xbcb   : > { %v2947_v38 = vpop.xlane.xlu1 %2946  ;;  %v2950_v41 = vadd.f32 %v2944_v35, %v2934_v61 }
 0xbcc   : > { %v2951_v42 = vadd.f32 %v2947_v38, %v2935_v39 }
 0xbcd   : > { %4384 = vrcp.f32 %v2950_v41 }
 0xbce   : > { %4386 = vrcp.f32 %v2949_v33 }
 0xbcf   : > { %4388 = vrcp.f32 %v2951_v42 }
 0xbd6   : > { %v2996_v32 = vpop.f32.mrf.mxu0  ;;  %v3042_v9 = vpop.f32.mrf.mxu1 }
 0xbd7   : > { %v3140_v44 = vadd.f32 %v2996_v32, %v2932_v34  ;;  %v3141_v47 = vadd.f32 %v3042_v9, %v2933_v0 }
 0xbd8   : > { %v4072_v10 = vpop.f32.mrf.mxu0  ;;  %v4078_v11 = vpop.f32.mrf.mxu1 }
 0xbd9   : > { %v3148_v54 = vmul.f32 %v4383_v46, %v3140_v44  ;;  %v3882_v46 = vld [vmem:[#allocation17] ss:$0 sm:$0xff] }
 0xbda   : > { %v2999_v14 = vpop.f32.mrf.mxu0  ;;  %v3045_v15 = vpop.f32.mrf.mxu1 }
 0xbdb   : > { %v4385_v50 = vpop.eup %4384 }
 0xbdc   : > { %v4073_v18 = vpop.f32.mrf.mxu0  ;;  %v4079_v19 = vpop.f32.mrf.mxu1 }
 0xbdd   : > { %v4387_v53 = vpop.eup %4386 }
 0xbde   : > { %v4389_v57 = vpop.eup %4388  ;;  %v3149_v62 = vmul.f32 %v4387_v53, %v3141_v47 }
 0xc02   : > { %v3088_v45 = vpop.f32.mrf.mxu0 }
 0xc03   : > { %v3142_v30 = vadd.f32 %v3088_v45, %v2934_v61  ;;  %v3134_v51 = vpop.f32.mrf.mxu1 }
 0xc04   : > { %v4084_v52 = vpop.f32.mrf.mxu0  ;;  %v3143_v56 = vadd.f32 %v3134_v51, %v2935_v39 }
 0xc05   : > { %v3150_v55 = vmul.f32 %v4385_v50, %v3142_v30  ;;  %v4090_v58 = vpop.f32.mrf.mxu1 }
 0xc06   : > { %v3091_v59 = vpop.f32.mrf.mxu0  ;;  %v3151_v48 = vmul.f32 %v4389_v57, %v3143_v56 }
 0xc07   : > { %v3152_v63 = vcombine.low %v3148_v54, %v3150_v55  ;;  %v3153_v1 = vcombine.high %v3148_v54, %v3150_v55  ;;  %v3137_v2 = vpop.f32.mrf.mxu1 }
 0xc08   : > { %v4085_v3 = vpop.f32.mrf.mxu0  ;;  %v3168_v6 = vcombine.low %v3149_v62, %v3151_v48  ;;  %v3169_v40 = vcombine.high %v3149_v62, %v3151_v48  ;;  %v4328_v62 = vld [vmem:[#allocation22 + $0x8] sm:$0xff]   ;;  %v4333_v2 = vld [vmem:[%s5706_s20 + $0x20] sm:$0xff]  }
 0xc09   : > { %v3160_v4 = vrot.slane %v3152_v63, %v5225_v37  ;;  %v3167_v5 = vrot.slane %v3153_v1, %v5225_v37  ;;  %v4091_v7 = vpop.f32.mrf.mxu1  ;;  %4101 = vmatpush3.bf16.msra.mxu1 %v4328_v62  ;;  %v4329_v63 = vld [vmem:[#allocation22] sm:$0xff]   ;;  %v4331_v1 = vld [vmem:[%s5706_s20 + $0x30] sm:$0xff]   ;;  %v4334_v3 = vld [vmem:[%s5706_s20 + $0x18] sm:$0xff]  }
 0xc0a   : > { %v3176_v36 = vrot.slane %v3168_v6, %v5225_v37  ;;  %v3183_v49 = vrot.slane %v3169_v40, %v5225_v37  ;;  %4102 = vmatprep.subr.bf16.mxu1 %v4835_v8  ;;  %v4332_v48 = vld [vmem:[%s5706_s20 + $0x28] sm:$0xff]  }
 0xc0c   : > { %v3184_v32 = vcombine.low %v3160_v4, %v3176_v36  ;;  %v3185_v9 = vcombine.high %v3160_v4, %v3176_v36  ;;  %v3200_v10 = vcombine.low %v3167_v5, %v3183_v49  ;;  %v3201_v11 = vcombine.high %v3167_v5, %v3183_v49  ;;  %v4335_v4 = vld [vmem:[%s5706_s20 + $0x10] sm:$0xff]   ;;  %v3886_v36 = vld [vmem:[#allocation19] ss:$0 sm:$0xff] }
 0xc0d   : > { %4103 = vmatpush3.bf16.msra.mxu1 %v4329_v63 }
 0xc0e   : > { %v3192_v13 = vrot.slane %v3184_v32, %v5228_v43  ;;  %v3199_v14 = vrot.slane %v3185_v9, %v5228_v43  ;;  %v3208_v15 = vrot.slane %v3200_v10, %v5228_v43  ;;  %v3215_v16 = vrot.slane %v3201_v11, %v5228_v43  ;;  %v3887_v32 = vld [vmem:[#allocation20] ss:$0 sm:$0xff] }
 0xc10   : > { %v3220_v17 = vcombine.low %v3192_v13, %v3199_v14  ;;  %v3880_v18 = vcombine.high %v3192_v13, %v3199_v14  ;;  %v3236_v19 = vcombine.low %v3208_v15, %v3215_v16  ;;  %v3881_v28 = vcombine.high %v3208_v15, %v3215_v16  ;;  %v4337_v13 = vld [vmem:[%s5706_s20] sm:$0xff]  }
 0xc11   : > { %v3888_v14 = vld [vmem:[%s5705_s19] ss:$0 sm:$0xff] }
 0xc12   : > { %v3227_v20 = vrot.slane %v3220_v17, %v5225_v37  ;;  %v3235_v21 = vrot.slane %v3880_v18, %v5225_v37  ;;  %v3243_v23 = vrot.slane %v3236_v19, %v5225_v37  ;;  %v3251_v24 = vrot.slane %v3881_v28, %v5225_v37 }
 0xc14   : > { %v3253_v25 = vcombine.high %v3227_v20, %v3235_v21  ;;  %v3269_v27 = vcombine.high %v3243_v23, %v3251_v24  ;;  %v3252_v60 = vcombine.low %v3227_v20, %v3235_v21  ;;  %v3268_v29 = vcombine.low %v3243_v23, %v3251_v24  ;;  %v3900_v21 = vld [vmem:[%s5707_s21] ss:$0 sm:$0xff] }
 0xc16   : > { %v3267_v31 = vrot.slane %v3253_v25, %v5228_v43  ;;  %v3283_v34 = vrot.slane %v3269_v27, %v5228_v43  ;;  %v3260_v35 = vrot.slane %v3252_v60, %v5228_v43  ;;  %v3276_v61 = vrot.slane %v3268_v29, %v5228_v43 }
 0xc18   : > { %v3286_v0 = vcombine.low %v3267_v31, %v3283_v34  ;;  %v3285_v22 = vcombine.high %v3260_v35, %v3276_v61  ;;  %v3287_v38 = vcombine.high %v3267_v31, %v3283_v34  ;;  %v3284_v39 = vcombine.low %v3260_v35, %v3276_v61 }
 0xc1a   : > { %3293 = vrot.lane.b32.xlu1 %v3286_v0, %s5780_s30  ;;  %3289 = vrot.lane.b32.xlu0 %v3285_v22, %s5781_s2  ;;  %s3902_s2 = sshll.u32 %s4990_s4, 7  ;;  %s3579_s4 = scalar_lea.sflag [#allocation4], %s852_s3 }
 0xc1b   : > { %s5644_s5 = scalar_lea.hbm %s5783_s1, %s3902_s2 }
 0xc1e   : > { %3297 = vrot.lane.b32.xlu1 %v3287_v38, %s5782_s29  ;;  %s854_s29 = scalar_lea.vmem [#allocation23], %s3819_s0  ;;  %s4853_s0 = smov [#allocation23]  }
 0xc1f   : > { %s3592_s23 = sshll.u32 %s854_s29, 4  ;;  %s4734_s22 = sshll.u32 %s4853_s0, 4  ;;  %s5646_s23 = int_to_ptr.vmem [resolvable:$true] %s3592_s23  ;;  %s4735_s22 = int_to_ptr.vmem [resolvable:$false] %s4734_s22 }
 0xc20   : > { %s4730_s7 = scalar_lea.vmem %s5646_s23, 128  ;;  %s4736_s30 = scalar_lea.vmem %s4735_s22, 256 }
 0xc21   : > { %p4731_p4 = scmp.ne.s32.totalorder %s5646_s23, %s4730_s7  ;;  %p4737_p12 = scmp.lt.s32.totalorder %s5646_s23, %s4735_s22 }
 0xc22   : > { %p4738_p0 = scmp.lt.s32.totalorder %s4736_s30, %s4730_s7 }
 0xc23   : > { %p4732_p8 = pnand %p4731_p4, %p5784_p7 }
 0xc24   : > { %p4739_p1 = por %p4738_p0, %p4737_p12 }
 0xc25   : > { %p4733_p11 = pneg %p4732_p8 }
 0xc27   : > { %p4740_p2 = pnand %p4739_p1, %p4733_p11 }
 0xc8c   : > { %v3294_v37 = vpop.permute.xlu1 %3293  ;;  %v3290_v41 = vpop.permute.xlu0 %3289 }
 0xc8d   : > { %v3300_v33 = vsel %vm1423_vm2, %v3284_v39, %v3290_v41 }
 0xc8e   : > { %v3301_v44 = vsel %vm2025_vm5, %v3300_v33, %v3294_v37 }
 0xc90   : > { %v3298_v42 = vpop.permute.xlu1 %3297 }
 0xc91   : > { %v3302_v45 = vsel %vm2027_vm6, %v3301_v44, %v3298_v42 }
 0xc92   : > { %v3303_v43 = vpack.c.bf16 %v3302_v45, %v3302_v45 }
 0xc94   : > { %4097 = vmatmul.mubr.msk.bf16.vlgmr.msra.gmra.mxu0 %vm868_vm0, %v3303_v43 }
 0xc95   : > { %4124 = vmatprep.mubr.msk.bf16.mxu0 %vm4836_vm1, %v4835_v8 }
 0xd54   : > { %v3359_v47 = vpop.f32.mrf.mxu0 }
 0xd55   : > { %v3360_v30 = vadd.f32 %v3882_v46, %v3359_v47 }
 0xd56   : > { %v4098_v50 = vpop.f32.mrf.mxu0 }
 0xd57   : > { %v5593_v51 = vadd.f32 %v3360_v30, %v5391_v26  ;;  %v4330_v26 = vld [vmem:[%s5706_s20 + $0x38] sm:$0xff]  }
 0xd58   : > { %v3362_v52 = vpop.f32.mrf.mxu0  ;;  %4109 = vmatpush3.bf16.msra.mxu0 %v4330_v26 }
 0xd59   : > { %v3368_v53 = vsel %vm868_vm0, %v5593_v51, 0.0  ;;  %4110 = vmatprep.subr.bf16.mxu0 %v4835_v8 }
 0xd5a   : > { %3369 = vadd.xlane.f32.xlu0 %v3368_v53  ;;  %v4099_v54 = vpop.f32.mrf.mxu0 }
 0xd5c   : > { %4111 = vmatpush3.bf16.msra.mxu0 %v4331_v1 }
 0xd5d   : > { %4112 = vmatprep.subr.bf16.mxu0 %v4835_v8 }
 0xd60   : > { %4113 = vmatpush3.bf16.msra.mxu0 %v4332_v48 }
 0xd61   : > { %4114 = vmatprep.subr.bf16.mxu0 %v4835_v8 }
 0xd64   : > { %4115 = vmatpush3.bf16.msra.mxu0 %v4333_v2 }
 0xd65   : > { %4116 = vmatprep.subr.bf16.mxu0 %v4835_v8 }
 0xd68   : > { %4117 = vmatpush3.bf16.msra.mxu0 %v4334_v3 }
 0xd69   : > { %4118 = vmatprep.subr.bf16.mxu0 %v4835_v8 }
 0xd6c   : > { %4119 = vmatpush3.bf16.msra.mxu0 %v4335_v4 }
 0xd6d   : > { %4120 = vmatprep.subr.bf16.mxu0 %v4835_v8 }
 0xd70   : > { %4121 = vmatpush3.bf16.msra.mxu0 %v4336_v12 }
 0xd71   : > { %4122 = vmatprep.subr.bf16.mxu0 %v4835_v8 }
 0xd74   : > { %4123 = vmatpush3.bf16.msra.mxu0 %v4337_v13 }
 0xde3   : > { %v3370_v55 = vpop.xlane.xlu0 %3369 }
 0xde4   : > { %v3371_v56 = vmul.f32 0.03125, %v3370_v55 }
 0xde6   : > { %v3372_v57 = vsub.f32 %v5593_v51, %v3371_v56 }
 0xde8   : > { %v3373_v58 = vmul.f32 %v3372_v57, %v3372_v57 }
 0xdea   : > { %v3374_v59 = vsel %vm868_vm0, %v3373_v58, 0.0 }
 0xdeb   : > { %3375 = vadd.xlane.f32.xlu1 %v3374_v59 }
 0xe74   : > { %v3376_v5 = vpop.xlane.xlu1 %3375 }
 0xe75   : > { %v3377_v6 = vmul.f32 0.03125, %v3376_v5 }
 0xe77   : > { %v3378_v40 = vadd.f32 1e-05, %v3377_v6 }
 0xe79   : > { %4390 = vrsqrt.f32 %v3378_v40 }
 0xe86   : > { %v4391_v7 = vpop.eup %4390 }
 0xe87   : > { %v3380_v49 = vmul.f32 %v4391_v7, %v3372_v57 }
 0xe89   : > { %v3387_v9 = vmul.f32 %v3886_v36, %v3380_v49 }
 0xe8b   : > { %v3394_v10 = vadd.f32 %v3887_v32, %v3387_v9 }
 0xe8d   : > { %v3395_v11 = vpack.c.bf16 %v3394_v10, %v3394_v10 }
 0xe8f   : > { %4105 = vmatmul.mubr.msk.bf16.vlgmr.msra.gmra.mxu1 %vm868_vm0, %v3395_v11 }
 0xf4f   : > { %v3456_v15 = vpop.f32.mrf.mxu1 }
 0xf50   : > { %v3457_v16 = vadd.f32 %v3888_v14, %v3456_v15 }
 0xf51   : > { %v4106_v17 = vpop.f32.mrf.mxu1 }
 0xf52   : > { %v3462_v18 = vmax.f32 %v3457_v16, 0.0 }
 0xf53   : > { %v3459_v19 = vpop.f32.mrf.mxu1 }
 0xf54   : > { %v3463_v28 = vpack.c.bf16 %v3462_v18, %v3462_v18 }
 0xf55   : > { %v4107_v20 = vpop.f32.mrf.mxu1 }
 0xf56   : > { %4125 = vmatmul.mubr.bf16.vlgmr.msra.gmra.mxu0 %v3463_v28 }
0x1016   : > { %v3562_v8 = vpop.f32.mrf.mxu0 }
0x1017   : > { %v3568_v23 = vadd.f32 %v3562_v8, %v5593_v51 }
0x1018   : > { %v4126_v24 = vpop.f32.mrf.mxu0 }
0x1019   : > { %v3576_v25 = vadd.f32 %v3900_v21, %v3568_v23 }
0x101a   : > { %v3565_v27 = vpop.f32.mrf.mxu0 }
0x101b   : > { %3577 = vst.msk [vmem:[%s854_s29] sm:$0xff] %vm868_vm0, %v3576_v25 }
0x101c   : > { %v4127_v60 = vpop.f32.mrf.mxu0 }
0x101d   : > { %4743 = shalt.err (!%p4740_p2)
}
0x101e   : > { %s4744_s2 = scalar_lea.hbm %s5644_s5, 128  ;;  %s4748_s26 = scalar_lea.hbm %s5783_s1, 256 }
0x101f   : > { %p4745_p9 = scmp.ne.s32.totalorder %s5644_s5, %s4744_s2  ;;  %p4749_p6 = scmp.lt.s32.totalorder %s5644_s5, %s5783_s1 }
0x1020   : > { %p4750_p10 = scmp.lt.s32.totalorder %s4748_s26, %s4744_s2 }
0x1021   : > { %p4746_p3 = pnand %p4745_p9, %p5784_p7 }
0x1022   : > { %p4751_p13 = por %p4750_p10, %p4749_p6 }
0x1023   : > { %p4747_p5 = pneg %p4746_p3 }
0x1025   : > { %p4752_p4 = pnand %p4751_p13, %p4747_p5 }
0x1027   : > { %4755 = shalt.err (!%p4752_p4)
}
0x1028   : > { %4180 = dma.vmem_to_hbm [thread:$0]  (%p5784_p7), %s5646_s23, 128, %s5644_s5, %s3579_s4  }
0x1029 PF: > { %s5785_s7 = sld [smem:[#allocation34_spill]] }
0x102a   : > { %s5786_s22 = sld [smem:[#allocation32_spill]] }
0x102b   : > { %s5787_s30 = sld [smem:[#allocation37_spill]] }
0x102f   : > { %p4252_p8 = scmp.ge.s32.totalorder %s5785_s7, 2 }
0x1030   : > { %s3604_s3 = sand.u32 1, %s5786_s22  }
0x1031   : > { %p5788_p11 = scmp.ne.s32.totalorder %s5787_s30, 0  ;;  %s3605_s29 = scalar_lea.sflag [#allocation4], %s3604_s3 }
0x1033   : > { %p4223_p12 = pnand %p4252_p8, %p5788_p11 }
0x1035   : > { %p4224_p0 = pneg %p4223_p12 }
0x1037   : > { %4801 = dma.done.wait (%p4224_p0), %s3605_s29, 128  }
0x1038   : > { %4803 = vsyncadd (%p4224_p0), %s3605_s29, 4294967168  ;;  %s5789_s30 = sld [smem:[#allocation35_spill]]  ;;  %s5792_s3 = smov %s4810_s28 }
0x1039   : > { %s5790_s2 = sld [smem:[#allocation33_spill]] }
0x103a   : > { %s5791_s29 = sld [smem:[#allocation36_spill]] }
0x103e   : > { %p39_p1 = scmp.ge.s32.totalorder %s5789_s30, 4  }
0x103f   : > { %s5793_s28 = smov %s5790_s2 }
0x1040   :  { %41 = sbr.rel (!%p39_p1) target bundleno = 20 (0x14), region = 199 }
0x1045   :  { %3610 = vsyncpa [#allocation3], 1 }
0x1046   :  { %3612 = vsyncpa [#allocation3 + $0x1], 1 }
0x1047   :  { %3613 = vsyncpa [#allocation6], 1 }
0x1048   :  { %3614 = vsyncpa [#allocation9], 1 }
0x1049   :  { %3615 = vsyncpa [#allocation12], 1 }
0x104a   :  { %3616 = vsyncpa [#allocation15], 1 }
0x104b   :  { %3617 = vsyncpa [#allocation18], 1 }
0x104c   :  { %3618 = vsyncpa [#allocation21], 1 }
0x104d   :  { %3619 = vsyncpa [#allocation4], 1 }
0x104e   :  { %3621 = vsyncpa [#allocation4 + $0x1], 1 }

</bundles_post_ra>
